<compile_context>
chip_gen: v6e
topology: v6e:2x2x1
jax: 0.10.0
libtpu: 0.0.40
codegen_flags: <defaults>
</compile_context>

<pallas_src>
import math

import jax
import jax.numpy as jnp
from jax import lax
from jax.experimental import pallas as pl
from jax.experimental.pallas import tpu as pltpu


# Architecture constants (match the PyTorch module).
K1, S1, C1 = 8, 4, 32      # conv1: Conv2d(C, 32, 8, 4)
K2, S2, C2 = 4, 2, 64      # conv2: Conv2d(32, 64, 4, 2)
K3, S3, C3 = 3, 1, 64      # conv3: Conv2d(64, 64, 3, 1)
FC_H = 512                 # hidden width of each FC stream


def _conv_out(s, k, st):
    return (s - k) // st + 1


# ----------------------------------------------------------------------------
# Fused forward kernel: conv1 mm -> conv2 (in-VMEM im2col + mm) -> conv3 (3x3
# accumulation) -> fused value||advantage FC -> folded dueling head.
# ----------------------------------------------------------------------------
def _make_fused_kernel(N, OH1, OW1, OH2, OW2, OH3, OW3, A):
    def kernel(p1_ref, w1_ref, b1_ref, w2_ref, b2_ref, w3_ref, b3_ref,
               wf_ref, bfc_ref, wq_ref, bq_ref,
               q_ref, h1_ref, p2_ref, h2_ref):
        f32 = jnp.float32
        bf16 = jnp.bfloat16

        # ---- conv1 + ReLU: one MXU matmul on the pre-built im2col patches.
        # h1 rows are (n, oh1, ow1); cols = 32 channels.
        z1 = jnp.dot(p1_ref[...], w1_ref[...], preferred_element_type=f32)
        h1_ref[...] = jnp.maximum(z1 + b1_ref[...], 0.0)

        # ---- conv2 + ReLU: build the im2col patch matrix in VMEM scratch via
        # strided row copies (rows = (n, oh2, ow2), cols = (ki, kj, cin)),
        # then a single MXU matmul.
        for n in range(N):
            for oh in range(OH2):
                dst = (n * OH2 + oh) * OW2
                for ki in range(K2):
                    for kj in range(K2):
                        src = n * OH1 * OW1 + (S2 * oh + ki) * OW1 + kj
                        p2_ref[pl.ds(dst, OW2), pl.ds((ki * K2 + kj) * C1, C1)] = (
                            h1_ref[pl.ds(src, OW2, stride=S2), :])
        z2 = jnp.dot(p2_ref[...].astype(bf16), w2_ref[...],
                     preferred_element_type=f32)
        h2_ref[...] = jnp.maximum(z2 + b2_ref[...], 0.0)

        # ---- conv3 + ReLU fused with the (value || advantage) 1024-wide FC:
        # per conv3 output position, accumulate the 3x3 channel matmuls, apply
        # bias+ReLU, then accumulate that position's FC contribution.
        fc_acc = jnp.zeros((N, 2 * FC_H), dtype=f32)
        for oh in range(OH3):
            for ow in range(OW3):
                z3 = jnp.zeros((N, C3), dtype=f32)
                for ki in range(K3):
                    for kj in range(K3):
                        row0 = (S3 * oh + ki) * OW2 + (S3 * ow + kj)
                        rows = h2_ref[pl.ds(row0, N, stride=OH2 * OW2), :]
                        w3_blk = w3_ref[pl.ds((ki * K3 + kj) * C2, C2), :]
                        z3 = z3 + jnp.dot(rows.astype(bf16), w3_blk,
                                          preferred_element_type=f32)
                h3 = jnp.maximum(z3 + b3_ref[...], 0.0).astype(bf16)
                s = oh * OW3 + ow
                fc_acc = fc_acc + jnp.dot(h3, wf_ref[pl.ds(s * C3, C3), :],
                                          preferred_element_type=f32)

        hidden = jnp.maximum(fc_acc + bfc_ref[...], 0.0).astype(bf16)

        # ---- dueling head: value / advantage / mean-subtraction were folded
        # offline into (wq, bq), so the head is a single matmul.
        q_ref[...] = (jnp.dot(hidden, wq_ref[...], preferred_element_type=f32)
                      + bq_ref[...])

    return kernel


# ----------------------------------------------------------------------------
# One-time parameter preparation (layout plumbing, outside the hot path).
# ----------------------------------------------------------------------------
def prepare_params(params, in_shape, n_actions):
    C, H, W = in_shape
    oh1, ow1 = _conv_out(H, K1, S1), _conv_out(W, K1, S1)
    oh2, ow2 = _conv_out(oh1, K2, S2), _conv_out(ow1, K2, S2)
    oh3, ow3 = _conv_out(oh2, K3, S3), _conv_out(ow2, K3, S3)
    flat = C3 * oh3 * ow3
    bf16 = jnp.bfloat16
    f32 = jnp.float32

    def conv_mat(w):  # OIHW -> (KH*KW*Cin, Cout), rows ordered (kh, kw, cin)
        co, ci, kh, kw = w.shape
        return jnp.transpose(w, (2, 3, 1, 0)).reshape(kh * kw * ci, co)

    def fc_rows_hwc(w):  # (512, flat_chw) -> (flat_hwc, 512)
        return (w.reshape(FC_H, C3, oh3, ow3).transpose(0, 2, 3, 1)
                 .reshape(FC_H, flat).T)

    # Fused value||advantage FC weight (flat, 1024) and bias (1, 1024).
    wf = jnp.concatenate([fc_rows_hwc(params["v1_w"]),
                          fc_rows_hwc(params["a1_w"])], axis=1)
    bfc = jnp.concatenate([params["v1_b"], params["a1_b"]]).reshape(1, 2 * FC_H)

    # Folded dueling head:  q = v + a - mean(a)  ==  hidden @ wq + bq  with
    #   wq[:512, k] = wv,  wq[512:, k] = wa[:, k] - mean_m wa[:, m]
    #   bq[k]       = bv + ba[k] - mean(ba)
    wv = params["v2_w"].T                                   # (512, 1)
    wa = params["a2_w"].T                                   # (512, A)
    wq = jnp.concatenate([jnp.tile(wv, (1, n_actions)),
                          wa - wa.mean(axis=1, keepdims=True)], axis=0)
    bq = (params["v2_b"][0] + params["a2_b"]
          - params["a2_b"].mean()).reshape(1, n_actions)

    return {
        "w1": conv_mat(params["conv1_w"]).astype(bf16),
        "b1": params["conv1_b"].reshape(1, -1).astype(f32),
        "w2": conv_mat(params["conv2_w"]).astype(bf16),
        "b2": params["conv2_b"].reshape(1, -1).astype(f32),
        "w3": conv_mat(params["conv3_w"]).astype(bf16),
        "b3": params["conv3_b"].reshape(1, -1).astype(f32),
        "wf": wf.astype(bf16), "bfc": bfc.astype(f32),
        "wq": wq.astype(bf16), "bq": bq.astype(f32),
    }


# ----------------------------------------------------------------------------
# Boundary glue: NCHW -> NHWC + conv1 im2col of the raw input.
# ----------------------------------------------------------------------------
def _im2col(x_nhwc, kh, kw, stride):
    n, h, w, c = x_nhwc.shape
    ho = (h - kh) // stride + 1
    wo = (w - kw) // stride + 1
    cols = []
    for i in range(kh):
        for j in range(kw):
            cols.append(x_nhwc[:, i:i + stride * ho:stride,
                               j:j + stride * wo:stride, :])
    patches = jnp.stack(cols, axis=3)               # (N, HO, WO, KH*KW, C)
    return patches.reshape(n * ho * wo, kh * kw * c)


def dueling_cnn_forward(prep, x_nchw):
    N, C, H, W = x_nchw.shape
    oh1, ow1 = _conv_out(H, K1, S1), _conv_out(W, K1, S1)
    oh2, ow2 = _conv_out(oh1, K2, S2), _conv_out(ow1, K2, S2)
    oh3, ow3 = _conv_out(oh2, K3, S3), _conv_out(ow2, K3, S3)
    A = prep["wq"].shape[1]
    assert prep["wf"].shape[0] == C3 * oh3 * ow3

    x_nhwc = jnp.transpose(x_nchw, (0, 2, 3, 1)).astype(jnp.float32)
    p1 = _im2col(x_nhwc, K1, K1, S1).astype(jnp.bfloat16)   # (N*OH1*OW1, K1*K1*C)

    kernel = _make_fused_kernel(N, oh1, ow1, oh2, ow2, oh3, ow3, A)

    def full(shape):
        nd = len(shape)
        return pl.BlockSpec(shape, lambda i: (0,) * nd)

    args = (p1, prep["w1"], prep["b1"], prep["w2"], prep["b2"],
            prep["w3"], prep["b3"], prep["wf"], prep["bfc"],
            prep["wq"], prep["bq"])

    return pl.pallas_call(
        kernel,
        out_shape=jax.ShapeDtypeStruct((N, A), jnp.float32),
        grid=(1,),
        in_specs=[full(a.shape) for a in args],
        out_specs=pl.BlockSpec((N, A), lambda i: (0, 0)),
        scratch_shapes=[
            pltpu.VMEM((N * oh1 * ow1, C1), jnp.float32),          # h1
            pltpu.VMEM((N * oh2 * ow2, K2 * K2 * C1), jnp.float32),  # conv2 im2col
            pltpu.VMEM((N * oh2 * ow2, C2), jnp.float32),          # h2
        ],
        compiler_params=pltpu.CompilerParams(
            dimension_semantics=("arbitrary",)),
    )(*args)


# ----------------------------------------------------------------------------
# Deterministic parameter init (PyTorch-style uniform fan-in bounds).
# ----------------------------------------------------------------------------
def _init_params(key, in_shape, n_actions):
    C, H, W = in_shape
    h1, w1 = _conv_out(H, K1, S1), _conv_out(W, K1, S1)
    h2, w2 = _conv_out(h1, K2, S2), _conv_out(w1, K2, S2)
    h3, w3 = _conv_out(h2, K3, S3), _conv_out(w2, K3, S3)
    flat = C3 * h3 * w3

    ks = iter(jax.random.split(key, 14))

    def u(k, shape, fan_in):
        bound = 1.0 / math.sqrt(fan_in)
        return jax.random.uniform(k, shape, jnp.float32, -bound, bound)

    p = {}
    p["conv1_w"] = u(next(ks), (C1, C, K1, K1), C * K1 * K1)
    p["conv1_b"] = u(next(ks), (C1,), C * K1 * K1)
    p["conv2_w"] = u(next(ks), (C2, C1, K2, K2), C1 * K2 * K2)
    p["conv2_b"] = u(next(ks), (C2,), C1 * K2 * K2)
    p["conv3_w"] = u(next(ks), (C3, C2, K3, K3), C2 * K3 * K3)
    p["conv3_b"] = u(next(ks), (C3,), C2 * K3 * K3)
    p["v1_w"] = u(next(ks), (FC_H, flat), flat)
    p["v1_b"] = u(next(ks), (FC_H,), flat)
    p["v2_w"] = u(next(ks), (1, FC_H), FC_H)
    p["v2_b"] = u(next(ks), (1,), FC_H)
    p["a1_w"] = u(next(ks), (FC_H, flat), flat)
    p["a1_b"] = u(next(ks), (FC_H,), flat)
    p["a2_w"] = u(next(ks), (n_actions, FC_H), FC_H)
    p["a2_b"] = u(next(ks), (n_actions,), FC_H)
    return p


# ----------------------------------------------------------------------------
# Plain-JAX f32 reference (verification only).
# ----------------------------------------------------------------------------
def reference_forward(params, x_nchw):
    hp = lax.Precision.HIGHEST

    def conv(x, w, b, s):
        y = lax.conv_general_dilated(x, w, (s, s), "VALID",
                                     dimension_numbers=("NCHW", "OIHW", "NCHW"),
                                     precision=hp)
        return jnp.maximum(y + b[None, :, None, None], 0.0)

    x = conv(x_nchw, params["conv1_w"], params["conv1_b"], S1)
    x = conv(x, params["conv2_w"], params["conv2_b"], S2)
    x = conv(x, params["conv3_w"], params["conv3_b"], S3)
    f = x.reshape(x.shape[0], -1)
    vh = jnp.maximum(jnp.dot(f, params["v1_w"].T, precision=hp) + params["v1_b"], 0.0)
    ah = jnp.maximum(jnp.dot(f, params["a1_w"].T, precision=hp) + params["a1_b"], 0.0)
    v = jnp.dot(vh, params["v2_w"].T, precision=hp) + params["v2_b"]
    a = jnp.dot(ah, params["a2_w"].T, precision=hp) + params["a2_b"]
    return v + a - a.mean(axis=1, keepdims=True)


if __name__ == "__main__":
    key = jax.random.PRNGKey(0)
    k_params, k_x = jax.random.split(key)

    # Smallest spatial extent the conv stack admits: 36 -> 8 -> 3 -> 1 (flat=64).
    in_shape = (4, 36, 36)
    n_actions = 6
    batch = 2

    params = _init_params(k_params, in_shape, n_actions)
    x = jax.random.normal(k_x, (batch,) + in_shape, dtype=jnp.float32)

    prep = prepare_params(params, in_shape, n_actions)   # one-time weight prep
    fwd = jax.jit(dueling_cnn_forward)

    q = jax.block_until_ready(fwd(prep, x))

    q_ref = reference_forward(params, x)
    assert q.shape == (batch, n_actions), q.shape
    # bf16 MXU operands (f32 accumulation) vs. an f32-HIGHEST reference.
    assert jnp.allclose(q, q_ref, rtol=2e-2, atol=2e-2), (q, q_ref)

    print("KERNEL_OK")
</pallas_src>

<mosaic_0001>
module attributes {stable_mosaic.version = 11 : i64} {
  func.func @kernel(%arg0: i32, %arg1: memref<128x256xbf16, #tpu.memory_space<vmem>>, %arg2: memref<256x32xbf16, #tpu.memory_space<vmem>>, %arg3: memref<1x32xf32, #tpu.memory_space<vmem>>, %arg4: memref<512x64xbf16, #tpu.memory_space<vmem>>, %arg5: memref<1x64xf32, #tpu.memory_space<vmem>>, %arg6: memref<576x64xbf16, #tpu.memory_space<vmem>>, %arg7: memref<1x64xf32, #tpu.memory_space<vmem>>, %arg8: memref<64x1024xbf16, #tpu.memory_space<vmem>>, %arg9: memref<1x1024xf32, #tpu.memory_space<vmem>>, %arg10: memref<1024x6xbf16, #tpu.memory_space<vmem>>, %arg11: memref<1x6xf32, #tpu.memory_space<vmem>>, %arg12: memref<2x6xf32, #tpu.memory_space<vmem>>, %arg13: memref<128x32xf32, #tpu.memory_space<vmem>>, %arg14: memref<18x512xf32, #tpu.memory_space<vmem>>, %arg15: memref<18x64xf32, #tpu.memory_space<vmem>>) attributes {dimension_semantics = [#tpu.dimension_semantics<arbitrary>], iteration_bounds = array<i64: 1>, scalar_prefetch = 0 : i64, scratch_operands = 3 : i64, tpu.core_type = #tpu.core_type<tc>, window_params = [{pipeline_mode = #tpu.pipeline_mode<synchronous>, transform_indices = @transform_0, window_bounds = array<i64: 128, 256>}, {pipeline_mode = #tpu.pipeline_mode<synchronous>, transform_indices = @transform_1, window_bounds = array<i64: 256, 32>}, {pipeline_mode = #tpu.pipeline_mode<synchronous>, transform_indices = @transform_2, window_bounds = array<i64: 1, 32>}, {pipeline_mode = #tpu.pipeline_mode<synchronous>, transform_indices = @transform_3, window_bounds = array<i64: 512, 64>}, {pipeline_mode = #tpu.pipeline_mode<synchronous>, transform_indices = @transform_4, window_bounds = array<i64: 1, 64>}, {pipeline_mode = #tpu.pipeline_mode<synchronous>, transform_indices = @transform_5, window_bounds = array<i64: 576, 64>}, {pipeline_mode = #tpu.pipeline_mode<synchronous>, transform_indices = @transform_6, window_bounds = array<i64: 1, 64>}, {pipeline_mode = #tpu.pipeline_mode<synchronous>, transform_indices = @transform_7, window_bounds = array<i64: 64, 1024>}, {pipeline_mode = #tpu.pipeline_mode<synchronous>, transform_indices = @transform_8, window_bounds = array<i64: 1, 1024>}, {pipeline_mode = #tpu.pipeline_mode<synchronous>, transform_indices = @transform_9, window_bounds = array<i64: 1024, 6>}, {pipeline_mode = #tpu.pipeline_mode<synchronous>, transform_indices = @transform_10, window_bounds = array<i64: 1, 6>}, {pipeline_mode = #tpu.pipeline_mode<synchronous>, transform_indices = @transform_11, window_bounds = array<i64: 2, 6>}]} {
    %c0 = arith.constant 0 : index
    %c0_0 = arith.constant 0 : index
    %0 = vector.load %arg1[%c0, %c0_0] : memref<128x256xbf16, #tpu.memory_space<vmem>>, vector<128x256xbf16>
    %c0_1 = arith.constant 0 : index
    %c0_2 = arith.constant 0 : index
    %1 = vector.load %arg2[%c0_1, %c0_2] : memref<256x32xbf16, #tpu.memory_space<vmem>>, vector<256x32xbf16>
    %cst = arith.constant dense<0.000000e+00> : vector<128x32xf32>
    %2 = tpu.matmul %0, %1, %cst {dimension_numbers = #tpu.dot_dimension_numbers<[1], [0], [0], [1], [0, 0, 1, 1], [], []>} : vector<128x256xbf16>, vector<256x32xbf16>, vector<128x32xf32> -> vector<128x32xf32>
    %c0_3 = arith.constant 0 : index
    %c0_4 = arith.constant 0 : index
    %3 = vector.load %arg3[%c0_3, %c0_4] : memref<1x32xf32, #tpu.memory_space<vmem>>, vector<1x32xf32>
    %4 = vector.broadcast %3 : vector<1x32xf32> to vector<128x32xf32>
    %5 = arith.addf %2, %4 : vector<128x32xf32>
    %cst_5 = arith.constant 0.000000e+00 : f32
    %6 = vector.broadcast %cst_5 : f32 to vector<128x32xf32>
    %7 = arith.maximumf %5, %6 : vector<128x32xf32>
    %c0_6 = arith.constant 0 : index
    %c0_7 = arith.constant 0 : index
    %8 = vector.load %arg13[%c0_6, %c0_7] : memref<128x32xf32, #tpu.memory_space<vmem>>, vector<128x32xf32>
    tpu.vector_store %arg13[%c0_6, %c0_7], %7 {strides = array<i32>} : memref<128x32xf32, #tpu.memory_space<vmem>>, vector<128x32xf32>,
    %c0_8 = arith.constant 0 : index
    %c0_9 = arith.constant 0 : index
    %9 = tpu.strided_load %arg13[%c0_8, %c0_9] {strides = array<i32: 2, 1>} : memref<128x32xf32, #tpu.memory_space<vmem>>, vector<3x32xf32>
    %c0_10 = arith.constant 0 : index
    %c0_11 = arith.constant 0 : index
    %10 = vector.load %arg14[%c0_10, %c0_11] : memref<18x512xf32, #tpu.memory_space<vmem>>, vector<3x32xf32>
    tpu.vector_store %arg14[%c0_10, %c0_11], %9 {strides = array<i32>} : memref<18x512xf32, #tpu.memory_space<vmem>>, vector<3x32xf32>,
    %c1 = arith.constant 1 : index
    %c0_12 = arith.constant 0 : index
    %11 = tpu.strided_load %arg13[%c1, %c0_12] {strides = array<i32: 2, 1>} : memref<128x32xf32, #tpu.memory_space<vmem>>, vector<3x32xf32>
    %c0_13 = arith.constant 0 : index
    %c32 = arith.constant 32 : index
    %12 = vector.load %arg14[%c0_13, %c32] : memref<18x512xf32, #tpu.memory_space<vmem>>, vector<3x32xf32>
    tpu.vector_store %arg14[%c0_13, %c32], %11 {strides = array<i32>} : memref<18x512xf32, #tpu.memory_space<vmem>>, vector<3x32xf32>,
    %c2 = arith.constant 2 : index
    %c0_14 = arith.constant 0 : index
    %13 = tpu.strided_load %arg13[%c2, %c0_14] {strides = array<i32: 2, 1>} : memref<128x32xf32, #tpu.memory_space<vmem>>, vector<3x32xf32>
    %c0_15 = arith.constant 0 : index
    %c64 = arith.constant 64 : index
    %14 = vector.load %arg14[%c0_15, %c64] : memref<18x512xf32, #tpu.memory_space<vmem>>, vector<3x32xf32>
    tpu.vector_store %arg14[%c0_15, %c64], %13 {strides = array<i32>} : memref<18x512xf32, #tpu.memory_space<vmem>>, vector<3x32xf32>,
    %c3 = arith.constant 3 : index
    %c0_16 = arith.constant 0 : index
    %15 = tpu.strided_load %arg13[%c3, %c0_16] {strides = array<i32: 2, 1>} : memref<128x32xf32, #tpu.memory_space<vmem>>, vector<3x32xf32>
    %c0_17 = arith.constant 0 : index
    %c96 = arith.constant 96 : index
    %16 = vector.load %arg14[%c0_17, %c96] : memref<18x512xf32, #tpu.memory_space<vmem>>, vector<3x32xf32>
    tpu.vector_store %arg14[%c0_17, %c96], %15 {strides = array<i32>} : memref<18x512xf32, #tpu.memory_space<vmem>>, vector<3x32xf32>,
    %c8 = arith.constant 8 : index
    %c0_18 = arith.constant 0 : index
    %17 = tpu.strided_load %arg13[%c8, %c0_18] {strides = array<i32: 2, 1>} : memref<128x32xf32, #tpu.memory_space<vmem>>, vector<3x32xf32>
    %c0_19 = arith.constant 0 : index
    %c128 = arith.constant 128 : index
    %18 = vector.load %arg14[%c0_19, %c128] : memref<18x512xf32, #tpu.memory_space<vmem>>, vector<3x32xf32>
    tpu.vector_store %arg14[%c0_19, %c128], %17 {strides = array<i32>} : memref<18x512xf32, #tpu.memory_space<vmem>>, vector<3x32xf32>,
    %c9 = arith.constant 9 : index
    %c0_20 = arith.constant 0 : index
    %19 = tpu.strided_load %arg13[%c9, %c0_20] {strides = array<i32: 2, 1>} : memref<128x32xf32, #tpu.memory_space<vmem>>, vector<3x32xf32>
    %c0_21 = arith.constant 0 : index
    %c160 = arith.constant 160 : index
    %20 = vector.load %arg14[%c0_21, %c160] : memref<18x512xf32, #tpu.memory_space<vmem>>, vector<3x32xf32>
    tpu.vector_store %arg14[%c0_21, %c160], %19 {strides = array<i32>} : memref<18x512xf32, #tpu.memory_space<vmem>>, vector<3x32xf32>,
    %c10 = arith.constant 10 : index
    %c0_22 = arith.constant 0 : index
    %21 = tpu.strided_load %arg13[%c10, %c0_22] {strides = array<i32: 2, 1>} : memref<128x32xf32, #tpu.memory_space<vmem>>, vector<3x32xf32>
    %c0_23 = arith.constant 0 : index
    %c192 = arith.constant 192 : index
    %22 = vector.load %arg14[%c0_23, %c192] : memref<18x512xf32, #tpu.memory_space<vmem>>, vector<3x32xf32>
    tpu.vector_store %arg14[%c0_23, %c192], %21 {strides = array<i32>} : memref<18x512xf32, #tpu.memory_space<vmem>>, vector<3x32xf32>,
    %c11 = arith.constant 11 : index
    %c0_24 = arith.constant 0 : index
    %23 = tpu.strided_load %arg13[%c11, %c0_24] {strides = array<i32: 2, 1>} : memref<128x32xf32, #tpu.memory_space<vmem>>, vector<3x32xf32>
    %c0_25 = arith.constant 0 : index
    %c224 = arith.constant 224 : index
    %24 = vector.load %arg14[%c0_25, %c224] : memref<18x512xf32, #tpu.memory_space<vmem>>, vector<3x32xf32>
    tpu.vector_store %arg14[%c0_25, %c224], %23 {strides = array<i32>} : memref<18x512xf32, #tpu.memory_space<vmem>>, vector<3x32xf32>,
    %c16 = arith.constant 16 : index
    %c0_26 = arith.constant 0 : index
    %25 = tpu.strided_load %arg13[%c16, %c0_26] {strides = array<i32: 2, 1>} : memref<128x32xf32, #tpu.memory_space<vmem>>, vector<3x32xf32>
    %c0_27 = arith.constant 0 : index
    %c256 = arith.constant 256 : index
    %26 = vector.load %arg14[%c0_27, %c256] : memref<18x512xf32, #tpu.memory_space<vmem>>, vector<3x32xf32>
    tpu.vector_store %arg14[%c0_27, %c256], %25 {strides = array<i32>} : memref<18x512xf32, #tpu.memory_space<vmem>>, vector<3x32xf32>,
    %c17 = arith.constant 17 : index
    %c0_28 = arith.constant 0 : index
    %27 = tpu.strided_load %arg13[%c17, %c0_28] {strides = array<i32: 2, 1>} : memref<128x32xf32, #tpu.memory_space<vmem>>, vector<3x32xf32>
    %c0_29 = arith.constant 0 : index
    %c288 = arith.constant 288 : index
    %28 = vector.load %arg14[%c0_29, %c288] : memref<18x512xf32, #tpu.memory_space<vmem>>, vector<3x32xf32>
    tpu.vector_store %arg14[%c0_29, %c288], %27 {strides = array<i32>} : memref<18x512xf32, #tpu.memory_space<vmem>>, vector<3x32xf32>,
    %c18 = arith.constant 18 : index
    %c0_30 = arith.constant 0 : index
    %29 = tpu.strided_load %arg13[%c18, %c0_30] {strides = array<i32: 2, 1>} : memref<128x32xf32, #tpu.memory_space<vmem>>, vector<3x32xf32>
    %c0_31 = arith.constant 0 : index
    %c320 = arith.constant 320 : index
    %30 = vector.load %arg14[%c0_31, %c320] : memref<18x512xf32, #tpu.memory_space<vmem>>, vector<3x32xf32>
    tpu.vector_store %arg14[%c0_31, %c320], %29 {strides = array<i32>} : memref<18x512xf32, #tpu.memory_space<vmem>>, vector<3x32xf32>,
    %c19 = arith.constant 19 : index
    %c0_32 = arith.constant 0 : index
    %31 = tpu.strided_load %arg13[%c19, %c0_32] {strides = array<i32: 2, 1>} : memref<128x32xf32, #tpu.memory_space<vmem>>, vector<3x32xf32>
    %c0_33 = arith.constant 0 : index
    %c352 = arith.constant 352 : index
    %32 = vector.load %arg14[%c0_33, %c352] : memref<18x512xf32, #tpu.memory_space<vmem>>, vector<3x32xf32>
    tpu.vector_store %arg14[%c0_33, %c352], %31 {strides = array<i32>} : memref<18x512xf32, #tpu.memory_space<vmem>>, vector<3x32xf32>,
    %c24 = arith.constant 24 : index
    %c0_34 = arith.constant 0 : index
    %33 = tpu.strided_load %arg13[%c24, %c0_34] {strides = array<i32: 2, 1>} : memref<128x32xf32, #tpu.memory_space<vmem>>, vector<3x32xf32>
    %c0_35 = arith.constant 0 : index
    %c384 = arith.constant 384 : index
    %34 = vector.load %arg14[%c0_35, %c384] : memref<18x512xf32, #tpu.memory_space<vmem>>, vector<3x32xf32>
    tpu.vector_store %arg14[%c0_35, %c384], %33 {strides = array<i32>} : memref<18x512xf32, #tpu.memory_space<vmem>>, vector<3x32xf32>,
    %c25 = arith.constant 25 : index
    %c0_36 = arith.constant 0 : index
    %35 = tpu.strided_load %arg13[%c25, %c0_36] {strides = array<i32: 2, 1>} : memref<128x32xf32, #tpu.memory_space<vmem>>, vector<3x32xf32>
    %c0_37 = arith.constant 0 : index
    %c416 = arith.constant 416 : index
    %36 = vector.load %arg14[%c0_37, %c416] : memref<18x512xf32, #tpu.memory_space<vmem>>, vector<3x32xf32>
    tpu.vector_store %arg14[%c0_37, %c416], %35 {strides = array<i32>} : memref<18x512xf32, #tpu.memory_space<vmem>>, vector<3x32xf32>,
    %c26 = arith.constant 26 : index
    %c0_38 = arith.constant 0 : index
    %37 = tpu.strided_load %arg13[%c26, %c0_38] {strides = array<i32: 2, 1>} : memref<128x32xf32, #tpu.memory_space<vmem>>, vector<3x32xf32>
    %c0_39 = arith.constant 0 : index
    %c448 = arith.constant 448 : index
    %38 = vector.load %arg14[%c0_39, %c448] : memref<18x512xf32, #tpu.memory_space<vmem>>, vector<3x32xf32>
    tpu.vector_store %arg14[%c0_39, %c448], %37 {strides = array<i32>} : memref<18x512xf32, #tpu.memory_space<vmem>>, vector<3x32xf32>,
    %c27 = arith.constant 27 : index
    %c0_40 = arith.constant 0 : index
    %39 = tpu.strided_load %arg13[%c27, %c0_40] {strides = array<i32: 2, 1>} : memref<128x32xf32, #tpu.memory_space<vmem>>, vector<3x32xf32>
    %c0_41 = arith.constant 0 : index
    %c480 = arith.constant 480 : index
    %40 = vector.load %arg14[%c0_41, %c480] : memref<18x512xf32, #tpu.memory_space<vmem>>, vector<3x32xf32>
    tpu.vector_store %arg14[%c0_41, %c480], %39 {strides = array<i32>} : memref<18x512xf32, #tpu.memory_space<vmem>>, vector<3x32xf32>,
    %c16_42 = arith.constant 16 : index
    %c0_43 = arith.constant 0 : index
    %41 = tpu.strided_load %arg13[%c16_42, %c0_43] {strides = array<i32: 2, 1>} : memref<128x32xf32, #tpu.memory_space<vmem>>, vector<3x32xf32>
    %c3_44 = arith.constant 3 : index
    %c0_45 = arith.constant 0 : index
    %42 = vector.load %arg14[%c3_44, %c0_45] : memref<18x512xf32, #tpu.memory_space<vmem>>, vector<3x32xf32>
    tpu.vector_store %arg14[%c3_44, %c0_45], %41 {strides = array<i32>} : memref<18x512xf32, #tpu.memory_space<vmem>>, vector<3x32xf32>,
    %c17_46 = arith.constant 17 : index
    %c0_47 = arith.constant 0 : index
    %43 = tpu.strided_load %arg13[%c17_46, %c0_47] {strides = array<i32: 2, 1>} : memref<128x32xf32, #tpu.memory_space<vmem>>, vector<3x32xf32>
    %c3_48 = arith.constant 3 : index
    %c32_49 = arith.constant 32 : index
    %44 = vector.load %arg14[%c3_48, %c32_49] : memref<18x512xf32, #tpu.memory_space<vmem>>, vector<3x32xf32>
    tpu.vector_store %arg14[%c3_48, %c32_49], %43 {strides = array<i32>} : memref<18x512xf32, #tpu.memory_space<vmem>>, vector<3x32xf32>,
    %c18_50 = arith.constant 18 : index
    %c0_51 = arith.constant 0 : index
    %45 = tpu.strided_load %arg13[%c18_50, %c0_51] {strides = array<i32: 2, 1>} : memref<128x32xf32, #tpu.memory_space<vmem>>, vector<3x32xf32>
    %c3_52 = arith.constant 3 : index
    %c64_53 = arith.constant 64 : index
    %46 = vector.load %arg14[%c3_52, %c64_53] : memref<18x512xf32, #tpu.memory_space<vmem>>, vector<3x32xf32>
    tpu.vector_store %arg14[%c3_52, %c64_53], %45 {strides = array<i32>} : memref<18x512xf32, #tpu.memory_space<vmem>>, vector<3x32xf32>,
    %c19_54 = arith.constant 19 : index
    %c0_55 = arith.constant 0 : index
    %47 = tpu.strided_load %arg13[%c19_54, %c0_55] {strides = array<i32: 2, 1>} : memref<128x32xf32, #tpu.memory_space<vmem>>, vector<3x32xf32>
    %c3_56 = arith.constant 3 : index
    %c96_57 = arith.constant 96 : index
    %48 = vector.load %arg14[%c3_56, %c96_57] : memref<18x512xf32, #tpu.memory_space<vmem>>, vector<3x32xf32>
    tpu.vector_store %arg14[%c3_56, %c96_57], %47 {strides = array<i32>} : memref<18x512xf32, #tpu.memory_space<vmem>>, vector<3x32xf32>,
    %c24_58 = arith.constant 24 : index
    %c0_59 = arith.constant 0 : index
    %49 = tpu.strided_load %arg13[%c24_58, %c0_59] {strides = array<i32: 2, 1>} : memref<128x32xf32, #tpu.memory_space<vmem>>, vector<3x32xf32>
    %c3_60 = arith.constant 3 : index
    %c128_61 = arith.constant 128 : index
    %50 = vector.load %arg14[%c3_60, %c128_61] : memref<18x512xf32, #tpu.memory_space<vmem>>, vector<3x32xf32>
    tpu.vector_store %arg14[%c3_60, %c128_61], %49 {strides = array<i32>} : memref<18x512xf32, #tpu.memory_space<vmem>>, vector<3x32xf32>,
    %c25_62 = arith.constant 25 : index
    %c0_63 = arith.constant 0 : index
    %51 = tpu.strided_load %arg13[%c25_62, %c0_63] {strides = array<i32: 2, 1>} : memref<128x32xf32, #tpu.memory_space<vmem>>, vector<3x32xf32>
    %c3_64 = arith.constant 3 : index
    %c160_65 = arith.constant 160 : index
    %52 = vector.load %arg14[%c3_64, %c160_65] : memref<18x512xf32, #tpu.memory_space<vmem>>, vector<3x32xf32>
    tpu.vector_store %arg14[%c3_64, %c160_65], %51 {strides = array<i32>} : memref<18x512xf32, #tpu.memory_space<vmem>>, vector<3x32xf32>,
    %c26_66 = arith.constant 26 : index
    %c0_67 = arith.constant 0 : index
    %53 = tpu.strided_load %arg13[%c26_66, %c0_67] {strides = array<i32: 2, 1>} : memref<128x32xf32, #tpu.memory_space<vmem>>, vector<3x32xf32>
    %c3_68 = arith.constant 3 : index
    %c192_69 = arith.constant 192 : index
    %54 = vector.load %arg14[%c3_68, %c192_69] : memref<18x512xf32, #tpu.memory_space<vmem>>, vector<3x32xf32>
    tpu.vector_store %arg14[%c3_68, %c192_69], %53 {strides = array<i32>} : memref<18x512xf32, #tpu.memory_space<vmem>>, vector<3x32xf32>,
    %c27_70 = arith.constant 27 : index
    %c0_71 = arith.constant 0 : index
    %55 = tpu.strided_load %arg13[%c27_70, %c0_71] {strides = array<i32: 2, 1>} : memref<128x32xf32, #tpu.memory_space<vmem>>, vector<3x32xf32>
    %c3_72 = arith.constant 3 : index
    %c224_73 = arith.constant 224 : index
    %56 = vector.load %arg14[%c3_72, %c224_73] : memref<18x512xf32, #tpu.memory_space<vmem>>, vector<3x32xf32>
    tpu.vector_store %arg14[%c3_72, %c224_73], %55 {strides = array<i32>} : memref<18x512xf32, #tpu.memory_space<vmem>>, vector<3x32xf32>,
    %c32_74 = arith.constant 32 : index
    %c0_75 = arith.constant 0 : index
    %57 = tpu.strided_load %arg13[%c32_74, %c0_75] {strides = array<i32: 2, 1>} : memref<128x32xf32, #tpu.memory_space<vmem>>, vector<3x32xf32>
    %c3_76 = arith.constant 3 : index
    %c256_77 = arith.constant 256 : index
    %58 = vector.load %arg14[%c3_76, %c256_77] : memref<18x512xf32, #tpu.memory_space<vmem>>, vector<3x32xf32>
    tpu.vector_store %arg14[%c3_76, %c256_77], %57 {strides = array<i32>} : memref<18x512xf32, #tpu.memory_space<vmem>>, vector<3x32xf32>,
    %c33 = arith.constant 33 : index
    %c0_78 = arith.constant 0 : index
    %59 = tpu.strided_load %arg13[%c33, %c0_78] {strides = array<i32: 2, 1>} : memref<128x32xf32, #tpu.memory_space<vmem>>, vector<3x32xf32>
    %c3_79 = arith.constant 3 : index
    %c288_80 = arith.constant 288 : index
    %60 = vector.load %arg14[%c3_79, %c288_80] : memref<18x512xf32, #tpu.memory_space<vmem>>, vector<3x32xf32>
    tpu.vector_store %arg14[%c3_79, %c288_80], %59 {strides = array<i32>} : memref<18x512xf32, #tpu.memory_space<vmem>>, vector<3x32xf32>,
    %c34 = arith.constant 34 : index
    %c0_81 = arith.constant 0 : index
    %61 = tpu.strided_load %arg13[%c34, %c0_81] {strides = array<i32: 2, 1>} : memref<128x32xf32, #tpu.memory_space<vmem>>, vector<3x32xf32>
    %c3_82 = arith.constant 3 : index
    %c320_83 = arith.constant 320 : index
    %62 = vector.load %arg14[%c3_82, %c320_83] : memref<18x512xf32, #tpu.memory_space<vmem>>, vector<3x32xf32>
    tpu.vector_store %arg14[%c3_82, %c320_83], %61 {strides = array<i32>} : memref<18x512xf32, #tpu.memory_space<vmem>>, vector<3x32xf32>,
    %c35 = arith.constant 35 : index
    %c0_84 = arith.constant 0 : index
    %63 = tpu.strided_load %arg13[%c35, %c0_84] {strides = array<i32: 2, 1>} : memref<128x32xf32, #tpu.memory_space<vmem>>, vector<3x32xf32>
    %c3_85 = arith.constant 3 : index
    %c352_86 = arith.constant 352 : index
    %64 = vector.load %arg14[%c3_85, %c352_86] : memref<18x512xf32, #tpu.memory_space<vmem>>, vector<3x32xf32>
    tpu.vector_store %arg14[%c3_85, %c352_86], %63 {strides = array<i32>} : memref<18x512xf32, #tpu.memory_space<vmem>>, vector<3x32xf32>,
    %c40 = arith.constant 40 : index
    %c0_87 = arith.constant 0 : index
    %65 = tpu.strided_load %arg13[%c40, %c0_87] {strides = array<i32: 2, 1>} : memref<128x32xf32, #tpu.memory_space<vmem>>, vector<3x32xf32>
    %c3_88 = arith.constant 3 : index
    %c384_89 = arith.constant 384 : index
    %66 = vector.load %arg14[%c3_88, %c384_89] : memref<18x512xf32, #tpu.memory_space<vmem>>, vector<3x32xf32>
    tpu.vector_store %arg14[%c3_88, %c384_89], %65 {strides = array<i32>} : memref<18x512xf32, #tpu.memory_space<vmem>>, vector<3x32xf32>,
    %c41 = arith.constant 41 : index
    %c0_90 = arith.constant 0 : index
    %67 = tpu.strided_load %arg13[%c41, %c0_90] {strides = array<i32: 2, 1>} : memref<128x32xf32, #tpu.memory_space<vmem>>, vector<3x32xf32>
    %c3_91 = arith.constant 3 : index
    %c416_92 = arith.constant 416 : index
    %68 = vector.load %arg14[%c3_91, %c416_92] : memref<18x512xf32, #tpu.memory_space<vmem>>, vector<3x32xf32>
    tpu.vector_store %arg14[%c3_91, %c416_92], %67 {strides = array<i32>} : memref<18x512xf32, #tpu.memory_space<vmem>>, vector<3x32xf32>,
    %c42 = arith.constant 42 : index
    %c0_93 = arith.constant 0 : index
    %69 = tpu.strided_load %arg13[%c42, %c0_93] {strides = array<i32: 2, 1>} : memref<128x32xf32, #tpu.memory_space<vmem>>, vector<3x32xf32>
    %c3_94 = arith.constant 3 : index
    %c448_95 = arith.constant 448 : index
    %70 = vector.load %arg14[%c3_94, %c448_95] : memref<18x512xf32, #tpu.memory_space<vmem>>, vector<3x32xf32>
    tpu.vector_store %arg14[%c3_94, %c448_95], %69 {strides = array<i32>} : memref<18x512xf32, #tpu.memory_space<vmem>>, vector<3x32xf32>,
    %c43 = arith.constant 43 : index
    %c0_96 = arith.constant 0 : index
    %71 = tpu.strided_load %arg13[%c43, %c0_96] {strides = array<i32: 2, 1>} : memref<128x32xf32, #tpu.memory_space<vmem>>, vector<3x32xf32>
    %c3_97 = arith.constant 3 : index
    %c480_98 = arith.constant 480 : index
    %72 = vector.load %arg14[%c3_97, %c480_98] : memref<18x512xf32, #tpu.memory_space<vmem>>, vector<3x32xf32>
    tpu.vector_store %arg14[%c3_97, %c480_98], %71 {strides = array<i32>} : memref<18x512xf32, #tpu.memory_space<vmem>>, vector<3x32xf32>,
    %c32_99 = arith.constant 32 : index
    %c0_100 = arith.constant 0 : index
    %73 = tpu.strided_load %arg13[%c32_99, %c0_100] {strides = array<i32: 2, 1>} : memref<128x32xf32, #tpu.memory_space<vmem>>, vector<3x32xf32>
    %c6 = arith.constant 6 : index
    %c0_101 = arith.constant 0 : index
    %74 = vector.load %arg14[%c6, %c0_101] : memref<18x512xf32, #tpu.memory_space<vmem>>, vector<3x32xf32>
    tpu.vector_store %arg14[%c6, %c0_101], %73 {strides = array<i32>} : memref<18x512xf32, #tpu.memory_space<vmem>>, vector<3x32xf32>,
    %c33_102 = arith.constant 33 : index
    %c0_103 = arith.constant 0 : index
    %75 = tpu.strided_load %arg13[%c33_102, %c0_103] {strides = array<i32: 2, 1>} : memref<128x32xf32, #tpu.memory_space<vmem>>, vector<3x32xf32>
    %c6_104 = arith.constant 6 : index
    %c32_105 = arith.constant 32 : index
    %76 = vector.load %arg14[%c6_104, %c32_105] : memref<18x512xf32, #tpu.memory_space<vmem>>, vector<3x32xf32>
    tpu.vector_store %arg14[%c6_104, %c32_105], %75 {strides = array<i32>} : memref<18x512xf32, #tpu.memory_space<vmem>>, vector<3x32xf32>,
    %c34_106 = arith.constant 34 : index
    %c0_107 = arith.constant 0 : index
    %77 = tpu.strided_load %arg13[%c34_106, %c0_107] {strides = array<i32: 2, 1>} : memref<128x32xf32, #tpu.memory_space<vmem>>, vector<3x32xf32>
    %c6_108 = arith.constant 6 : index
    %c64_109 = arith.constant 64 : index
    %78 = vector.load %arg14[%c6_108, %c64_109] : memref<18x512xf32, #tpu.memory_space<vmem>>, vector<3x32xf32>
    tpu.vector_store %arg14[%c6_108, %c64_109], %77 {strides = array<i32>} : memref<18x512xf32, #tpu.memory_space<vmem>>, vector<3x32xf32>,
    %c35_110 = arith.constant 35 : index
    %c0_111 = arith.constant 0 : index
    %79 = tpu.strided_load %arg13[%c35_110, %c0_111] {strides = array<i32: 2, 1>} : memref<128x32xf32, #tpu.memory_space<vmem>>, vector<3x32xf32>
    %c6_112 = arith.constant 6 : index
    %c96_113 = arith.constant 96 : index
    %80 = vector.load %arg14[%c6_112, %c96_113] : memref<18x512xf32, #tpu.memory_space<vmem>>, vector<3x32xf32>
    tpu.vector_store %arg14[%c6_112, %c96_113], %79 {strides = array<i32>} : memref<18x512xf32, #tpu.memory_space<vmem>>, vector<3x32xf32>,
    %c40_114 = arith.constant 40 : index
    %c0_115 = arith.constant 0 : index
    %81 = tpu.strided_load %arg13[%c40_114, %c0_115] {strides = array<i32: 2, 1>} : memref<128x32xf32, #tpu.memory_space<vmem>>, vector<3x32xf32>
    %c6_116 = arith.constant 6 : index
    %c128_117 = arith.constant 128 : index
    %82 = vector.load %arg14[%c6_116, %c128_117] : memref<18x512xf32, #tpu.memory_space<vmem>>, vector<3x32xf32>
    tpu.vector_store %arg14[%c6_116, %c128_117], %81 {strides = array<i32>} : memref<18x512xf32, #tpu.memory_space<vmem>>, vector<3x32xf32>,
    %c41_118 = arith.constant 41 : index
    %c0_119 = arith.constant 0 : index
    %83 = tpu.strided_load %arg13[%c41_118, %c0_119] {strides = array<i32: 2, 1>} : memref<128x32xf32, #tpu.memory_space<vmem>>, vector<3x32xf32>
    %c6_120 = arith.constant 6 : index
    %c160_121 = arith.constant 160 : index
    %84 = vector.load %arg14[%c6_120, %c160_121] : memref<18x512xf32, #tpu.memory_space<vmem>>, vector<3x32xf32>
    tpu.vector_store %arg14[%c6_120, %c160_121], %83 {strides = array<i32>} : memref<18x512xf32, #tpu.memory_space<vmem>>, vector<3x32xf32>,
    %c42_122 = arith.constant 42 : index
    %c0_123 = arith.constant 0 : index
    %85 = tpu.strided_load %arg13[%c42_122, %c0_123] {strides = array<i32: 2, 1>} : memref<128x32xf32, #tpu.memory_space<vmem>>, vector<3x32xf32>
    %c6_124 = arith.constant 6 : index
    %c192_125 = arith.constant 192 : index
    %86 = vector.load %arg14[%c6_124, %c192_125] : memref<18x512xf32, #tpu.memory_space<vmem>>, vector<3x32xf32>
    tpu.vector_store %arg14[%c6_124, %c192_125], %85 {strides = array<i32>} : memref<18x512xf32, #tpu.memory_space<vmem>>, vector<3x32xf32>,
    %c43_126 = arith.constant 43 : index
    %c0_127 = arith.constant 0 : index
    %87 = tpu.strided_load %arg13[%c43_126, %c0_127] {strides = array<i32: 2, 1>} : memref<128x32xf32, #tpu.memory_space<vmem>>, vector<3x32xf32>
    %c6_128 = arith.constant 6 : index
    %c224_129 = arith.constant 224 : index
    %88 = vector.load %arg14[%c6_128, %c224_129] : memref<18x512xf32, #tpu.memory_space<vmem>>, vector<3x32xf32>
    tpu.vector_store %arg14[%c6_128, %c224_129], %87 {strides = array<i32>} : memref<18x512xf32, #tpu.memory_space<vmem>>, vector<3x32xf32>,
    %c48 = arith.constant 48 : index
    %c0_130 = arith.constant 0 : index
    %89 = tpu.strided_load %arg13[%c48, %c0_130] {strides = array<i32: 2, 1>} : memref<128x32xf32, #tpu.memory_space<vmem>>, vector<3x32xf32>
    %c6_131 = arith.constant 6 : index
    %c256_132 = arith.constant 256 : index
    %90 = vector.load %arg14[%c6_131, %c256_132] : memref<18x512xf32, #tpu.memory_space<vmem>>, vector<3x32xf32>
    tpu.vector_store %arg14[%c6_131, %c256_132], %89 {strides = array<i32>} : memref<18x512xf32, #tpu.memory_space<vmem>>, vector<3x32xf32>,
    %c49 = arith.constant 49 : index
    %c0_133 = arith.constant 0 : index
    %91 = tpu.strided_load %arg13[%c49, %c0_133] {strides = array<i32: 2, 1>} : memref<128x32xf32, #tpu.memory_space<vmem>>, vector<3x32xf32>
    %c6_134 = arith.constant 6 : index
    %c288_135 = arith.constant 288 : index
    %92 = vector.load %arg14[%c6_134, %c288_135] : memref<18x512xf32, #tpu.memory_space<vmem>>, vector<3x32xf32>
    tpu.vector_store %arg14[%c6_134, %c288_135], %91 {strides = array<i32>} : memref<18x512xf32, #tpu.memory_space<vmem>>, vector<3x32xf32>,
    %c50 = arith.constant 50 : index
    %c0_136 = arith.constant 0 : index
    %93 = tpu.strided_load %arg13[%c50, %c0_136] {strides = array<i32: 2, 1>} : memref<128x32xf32, #tpu.memory_space<vmem>>, vector<3x32xf32>
    %c6_137 = arith.constant 6 : index
    %c320_138 = arith.constant 320 : index
    %94 = vector.load %arg14[%c6_137, %c320_138] : memref<18x512xf32, #tpu.memory_space<vmem>>, vector<3x32xf32>
    tpu.vector_store %arg14[%c6_137, %c320_138], %93 {strides = array<i32>} : memref<18x512xf32, #tpu.memory_space<vmem>>, vector<3x32xf32>,
    %c51 = arith.constant 51 : index
    %c0_139 = arith.constant 0 : index
    %95 = tpu.strided_load %arg13[%c51, %c0_139] {strides = array<i32: 2, 1>} : memref<128x32xf32, #tpu.memory_space<vmem>>, vector<3x32xf32>
    %c6_140 = arith.constant 6 : index
    %c352_141 = arith.constant 352 : index
    %96 = vector.load %arg14[%c6_140, %c352_141] : memref<18x512xf32, #tpu.memory_space<vmem>>, vector<3x32xf32>
    tpu.vector_store %arg14[%c6_140, %c352_141], %95 {strides = array<i32>} : memref<18x512xf32, #tpu.memory_space<vmem>>, vector<3x32xf32>,
    %c56 = arith.constant 56 : index
    %c0_142 = arith.constant 0 : index
    %97 = tpu.strided_load %arg13[%c56, %c0_142] {strides = array<i32: 2, 1>} : memref<128x32xf32, #tpu.memory_space<vmem>>, vector<3x32xf32>
    %c6_143 = arith.constant 6 : index
    %c384_144 = arith.constant 384 : index
    %98 = vector.load %arg14[%c6_143, %c384_144] : memref<18x512xf32, #tpu.memory_space<vmem>>, vector<3x32xf32>
    tpu.vector_store %arg14[%c6_143, %c384_144], %97 {strides = array<i32>} : memref<18x512xf32, #tpu.memory_space<vmem>>, vector<3x32xf32>,
    %c57 = arith.constant 57 : index
    %c0_145 = arith.constant 0 : index
    %99 = tpu.strided_load %arg13[%c57, %c0_145] {strides = array<i32: 2, 1>} : memref<128x32xf32, #tpu.memory_space<vmem>>, vector<3x32xf32>
    %c6_146 = arith.constant 6 : index
    %c416_147 = arith.constant 416 : index
    %100 = vector.load %arg14[%c6_146, %c416_147] : memref<18x512xf32, #tpu.memory_space<vmem>>, vector<3x32xf32>
    tpu.vector_store %arg14[%c6_146, %c416_147], %99 {strides = array<i32>} : memref<18x512xf32, #tpu.memory_space<vmem>>, vector<3x32xf32>,
    %c58 = arith.constant 58 : index
    %c0_148 = arith.constant 0 : index
    %101 = tpu.strided_load %arg13[%c58, %c0_148] {strides = array<i32: 2, 1>} : memref<128x32xf32, #tpu.memory_space<vmem>>, vector<3x32xf32>
    %c6_149 = arith.constant 6 : index
    %c448_150 = arith.constant 448 : index
    %102 = vector.load %arg14[%c6_149, %c448_150] : memref<18x512xf32, #tpu.memory_space<vmem>>, vector<3x32xf32>
    tpu.vector_store %arg14[%c6_149, %c448_150], %101 {strides = array<i32>} : memref<18x512xf32, #tpu.memory_space<vmem>>, vector<3x32xf32>,
    %c59 = arith.constant 59 : index
    %c0_151 = arith.constant 0 : index
    %103 = tpu.strided_load %arg13[%c59, %c0_151] {strides = array<i32: 2, 1>} : memref<128x32xf32, #tpu.memory_space<vmem>>, vector<3x32xf32>
    %c6_152 = arith.constant 6 : index
    %c480_153 = arith.constant 480 : index
    %104 = vector.load %arg14[%c6_152, %c480_153] : memref<18x512xf32, #tpu.memory_space<vmem>>, vector<3x32xf32>
    tpu.vector_store %arg14[%c6_152, %c480_153], %103 {strides = array<i32>} : memref<18x512xf32, #tpu.memory_space<vmem>>, vector<3x32xf32>,
    %c64_154 = arith.constant 64 : index
    %c0_155 = arith.constant 0 : index
    %105 = tpu.strided_load %arg13[%c64_154, %c0_155] {strides = array<i32: 2, 1>} : memref<128x32xf32, #tpu.memory_space<vmem>>, vector<3x32xf32>
    %c9_156 = arith.constant 9 : index
    %c0_157 = arith.constant 0 : index
    %106 = vector.load %arg14[%c9_156, %c0_157] : memref<18x512xf32, #tpu.memory_space<vmem>>, vector<3x32xf32>
    tpu.vector_store %arg14[%c9_156, %c0_157], %105 {strides = array<i32>} : memref<18x512xf32, #tpu.memory_space<vmem>>, vector<3x32xf32>,
    %c65 = arith.constant 65 : index
    %c0_158 = arith.constant 0 : index
    %107 = tpu.strided_load %arg13[%c65, %c0_158] {strides = array<i32: 2, 1>} : memref<128x32xf32, #tpu.memory_space<vmem>>, vector<3x32xf32>
    %c9_159 = arith.constant 9 : index
    %c32_160 = arith.constant 32 : index
    %108 = vector.load %arg14[%c9_159, %c32_160] : memref<18x512xf32, #tpu.memory_space<vmem>>, vector<3x32xf32>
    tpu.vector_store %arg14[%c9_159, %c32_160], %107 {strides = array<i32>} : memref<18x512xf32, #tpu.memory_space<vmem>>, vector<3x32xf32>,
    %c66 = arith.constant 66 : index
    %c0_161 = arith.constant 0 : index
    %109 = tpu.strided_load %arg13[%c66, %c0_161] {strides = array<i32: 2, 1>} : memref<128x32xf32, #tpu.memory_space<vmem>>, vector<3x32xf32>
    %c9_162 = arith.constant 9 : index
    %c64_163 = arith.constant 64 : index
    %110 = vector.load %arg14[%c9_162, %c64_163] : memref<18x512xf32, #tpu.memory_space<vmem>>, vector<3x32xf32>
    tpu.vector_store %arg14[%c9_162, %c64_163], %109 {strides = array<i32>} : memref<18x512xf32, #tpu.memory_space<vmem>>, vector<3x32xf32>,
    %c67 = arith.constant 67 : index
    %c0_164 = arith.constant 0 : index
    %111 = tpu.strided_load %arg13[%c67, %c0_164] {strides = array<i32: 2, 1>} : memref<128x32xf32, #tpu.memory_space<vmem>>, vector<3x32xf32>
    %c9_165 = arith.constant 9 : index
    %c96_166 = arith.constant 96 : index
    %112 = vector.load %arg14[%c9_165, %c96_166] : memref<18x512xf32, #tpu.memory_space<vmem>>, vector<3x32xf32>
    tpu.vector_store %arg14[%c9_165, %c96_166], %111 {strides = array<i32>} : memref<18x512xf32, #tpu.memory_space<vmem>>, vector<3x32xf32>,
    %c72 = arith.constant 72 : index
    %c0_167 = arith.constant 0 : index
    %113 = tpu.strided_load %arg13[%c72, %c0_167] {strides = array<i32: 2, 1>} : memref<128x32xf32, #tpu.memory_space<vmem>>, vector<3x32xf32>
    %c9_168 = arith.constant 9 : index
    %c128_169 = arith.constant 128 : index
    %114 = vector.load %arg14[%c9_168, %c128_169] : memref<18x512xf32, #tpu.memory_space<vmem>>, vector<3x32xf32>
    tpu.vector_store %arg14[%c9_168, %c128_169], %113 {strides = array<i32>} : memref<18x512xf32, #tpu.memory_space<vmem>>, vector<3x32xf32>,
    %c73 = arith.constant 73 : index
    %c0_170 = arith.constant 0 : index
    %115 = tpu.strided_load %arg13[%c73, %c0_170] {strides = array<i32: 2, 1>} : memref<128x32xf32, #tpu.memory_space<vmem>>, vector<3x32xf32>
    %c9_171 = arith.constant 9 : index
    %c160_172 = arith.constant 160 : index
    %116 = vector.load %arg14[%c9_171, %c160_172] : memref<18x512xf32, #tpu.memory_space<vmem>>, vector<3x32xf32>
    tpu.vector_store %arg14[%c9_171, %c160_172], %115 {strides = array<i32>} : memref<18x512xf32, #tpu.memory_space<vmem>>, vector<3x32xf32>,
    %c74 = arith.constant 74 : index
    %c0_173 = arith.constant 0 : index
    %117 = tpu.strided_load %arg13[%c74, %c0_173] {strides = array<i32: 2, 1>} : memref<128x32xf32, #tpu.memory_space<vmem>>, vector<3x32xf32>
    %c9_174 = arith.constant 9 : index
    %c192_175 = arith.constant 192 : index
    %118 = vector.load %arg14[%c9_174, %c192_175] : memref<18x512xf32, #tpu.memory_space<vmem>>, vector<3x32xf32>
    tpu.vector_store %arg14[%c9_174, %c192_175], %117 {strides = array<i32>} : memref<18x512xf32, #tpu.memory_space<vmem>>, vector<3x32xf32>,
    %c75 = arith.constant 75 : index
    %c0_176 = arith.constant 0 : index
    %119 = tpu.strided_load %arg13[%c75, %c0_176] {strides = array<i32: 2, 1>} : memref<128x32xf32, #tpu.memory_space<vmem>>, vector<3x32xf32>
    %c9_177 = arith.constant 9 : index
    %c224_178 = arith.constant 224 : index
    %120 = vector.load %arg14[%c9_177, %c224_178] : memref<18x512xf32, #tpu.memory_space<vmem>>, vector<3x32xf32>
    tpu.vector_store %arg14[%c9_177, %c224_178], %119 {strides = array<i32>} : memref<18x512xf32, #tpu.memory_space<vmem>>, vector<3x32xf32>,
    %c80 = arith.constant 80 : index
    %c0_179 = arith.constant 0 : index
    %121 = tpu.strided_load %arg13[%c80, %c0_179] {strides = array<i32: 2, 1>} : memref<128x32xf32, #tpu.memory_space<vmem>>, vector<3x32xf32>
    %c9_180 = arith.constant 9 : index
    %c256_181 = arith.constant 256 : index
    %122 = vector.load %arg14[%c9_180, %c256_181] : memref<18x512xf32, #tpu.memory_space<vmem>>, vector<3x32xf32>
    tpu.vector_store %arg14[%c9_180, %c256_181], %121 {strides = array<i32>} : memref<18x512xf32, #tpu.memory_space<vmem>>, vector<3x32xf32>,
    %c81 = arith.constant 81 : index
    %c0_182 = arith.constant 0 : index
    %123 = tpu.strided_load %arg13[%c81, %c0_182] {strides = array<i32: 2, 1>} : memref<128x32xf32, #tpu.memory_space<vmem>>, vector<3x32xf32>
    %c9_183 = arith.constant 9 : index
    %c288_184 = arith.constant 288 : index
    %124 = vector.load %arg14[%c9_183, %c288_184] : memref<18x512xf32, #tpu.memory_space<vmem>>, vector<3x32xf32>
    tpu.vector_store %arg14[%c9_183, %c288_184], %123 {strides = array<i32>} : memref<18x512xf32, #tpu.memory_space<vmem>>, vector<3x32xf32>,
    %c82 = arith.constant 82 : index
    %c0_185 = arith.constant 0 : index
    %125 = tpu.strided_load %arg13[%c82, %c0_185] {strides = array<i32: 2, 1>} : memref<128x32xf32, #tpu.memory_space<vmem>>, vector<3x32xf32>
    %c9_186 = arith.constant 9 : index
    %c320_187 = arith.constant 320 : index
    %126 = vector.load %arg14[%c9_186, %c320_187] : memref<18x512xf32, #tpu.memory_space<vmem>>, vector<3x32xf32>
    tpu.vector_store %arg14[%c9_186, %c320_187], %125 {strides = array<i32>} : memref<18x512xf32, #tpu.memory_space<vmem>>, vector<3x32xf32>,
    %c83 = arith.constant 83 : index
    %c0_188 = arith.constant 0 : index
    %127 = tpu.strided_load %arg13[%c83, %c0_188] {strides = array<i32: 2, 1>} : memref<128x32xf32, #tpu.memory_space<vmem>>, vector<3x32xf32>
    %c9_189 = arith.constant 9 : index
    %c352_190 = arith.constant 352 : index
    %128 = vector.load %arg14[%c9_189, %c352_190] : memref<18x512xf32, #tpu.memory_space<vmem>>, vector<3x32xf32>
    tpu.vector_store %arg14[%c9_189, %c352_190], %127 {strides = array<i32>} : memref<18x512xf32, #tpu.memory_space<vmem>>, vector<3x32xf32>,
    %c88 = arith.constant 88 : index
    %c0_191 = arith.constant 0 : index
    %129 = tpu.strided_load %arg13[%c88, %c0_191] {strides = array<i32: 2, 1>} : memref<128x32xf32, #tpu.memory_space<vmem>>, vector<3x32xf32>
    %c9_192 = arith.constant 9 : index
    %c384_193 = arith.constant 384 : index
    %130 = vector.load %arg14[%c9_192, %c384_193] : memref<18x512xf32, #tpu.memory_space<vmem>>, vector<3x32xf32>
    tpu.vector_store %arg14[%c9_192, %c384_193], %129 {strides = array<i32>} : memref<18x512xf32, #tpu.memory_space<vmem>>, vector<3x32xf32>,
    %c89 = arith.constant 89 : index
    %c0_194 = arith.constant 0 : index
    %131 = tpu.strided_load %arg13[%c89, %c0_194] {strides = array<i32: 2, 1>} : memref<128x32xf32, #tpu.memory_space<vmem>>, vector<3x32xf32>
    %c9_195 = arith.constant 9 : index
    %c416_196 = arith.constant 416 : index
    %132 = vector.load %arg14[%c9_195, %c416_196] : memref<18x512xf32, #tpu.memory_space<vmem>>, vector<3x32xf32>
    tpu.vector_store %arg14[%c9_195, %c416_196], %131 {strides = array<i32>} : memref<18x512xf32, #tpu.memory_space<vmem>>, vector<3x32xf32>,
    %c90 = arith.constant 90 : index
    %c0_197 = arith.constant 0 : index
    %133 = tpu.strided_load %arg13[%c90, %c0_197] {strides = array<i32: 2, 1>} : memref<128x32xf32, #tpu.memory_space<vmem>>, vector<3x32xf32>
    %c9_198 = arith.constant 9 : index
    %c448_199 = arith.constant 448 : index
    %134 = vector.load %arg14[%c9_198, %c448_199] : memref<18x512xf32, #tpu.memory_space<vmem>>, vector<3x32xf32>
    tpu.vector_store %arg14[%c9_198, %c448_199], %133 {strides = array<i32>} : memref<18x512xf32, #tpu.memory_space<vmem>>, vector<3x32xf32>,
    %c91 = arith.constant 91 : index
    %c0_200 = arith.constant 0 : index
    %135 = tpu.strided_load %arg13[%c91, %c0_200] {strides = array<i32: 2, 1>} : memref<128x32xf32, #tpu.memory_space<vmem>>, vector<3x32xf32>
    %c9_201 = arith.constant 9 : index
    %c480_202 = arith.constant 480 : index
    %136 = vector.load %arg14[%c9_201, %c480_202] : memref<18x512xf32, #tpu.memory_space<vmem>>, vector<3x32xf32>
    tpu.vector_store %arg14[%c9_201, %c480_202], %135 {strides = array<i32>} : memref<18x512xf32, #tpu.memory_space<vmem>>, vector<3x32xf32>,
    %c80_203 = arith.constant 80 : index
    %c0_204 = arith.constant 0 : index
    %137 = tpu.strided_load %arg13[%c80_203, %c0_204] {strides = array<i32: 2, 1>} : memref<128x32xf32, #tpu.memory_space<vmem>>, vector<3x32xf32>
    %c12 = arith.constant 12 : index
    %c0_205 = arith.constant 0 : index
    %138 = vector.load %arg14[%c12, %c0_205] : memref<18x512xf32, #tpu.memory_space<vmem>>, vector<3x32xf32>
    tpu.vector_store %arg14[%c12, %c0_205], %137 {strides = array<i32>} : memref<18x512xf32, #tpu.memory_space<vmem>>, vector<3x32xf32>,
    %c81_206 = arith.constant 81 : index
    %c0_207 = arith.constant 0 : index
    %139 = tpu.strided_load %arg13[%c81_206, %c0_207] {strides = array<i32: 2, 1>} : memref<128x32xf32, #tpu.memory_space<vmem>>, vector<3x32xf32>
    %c12_208 = arith.constant 12 : index
    %c32_209 = arith.constant 32 : index
    %140 = vector.load %arg14[%c12_208, %c32_209] : memref<18x512xf32, #tpu.memory_space<vmem>>, vector<3x32xf32>
    tpu.vector_store %arg14[%c12_208, %c32_209], %139 {strides = array<i32>} : memref<18x512xf32, #tpu.memory_space<vmem>>, vector<3x32xf32>,
    %c82_210 = arith.constant 82 : index
    %c0_211 = arith.constant 0 : index
    %141 = tpu.strided_load %arg13[%c82_210, %c0_211] {strides = array<i32: 2, 1>} : memref<128x32xf32, #tpu.memory_space<vmem>>, vector<3x32xf32>
    %c12_212 = arith.constant 12 : index
    %c64_213 = arith.constant 64 : index
    %142 = vector.load %arg14[%c12_212, %c64_213] : memref<18x512xf32, #tpu.memory_space<vmem>>, vector<3x32xf32>
    tpu.vector_store %arg14[%c12_212, %c64_213], %141 {strides = array<i32>} : memref<18x512xf32, #tpu.memory_space<vmem>>, vector<3x32xf32>,
    %c83_214 = arith.constant 83 : index
    %c0_215 = arith.constant 0 : index
    %143 = tpu.strided_load %arg13[%c83_214, %c0_215] {strides = array<i32: 2, 1>} : memref<128x32xf32, #tpu.memory_space<vmem>>, vector<3x32xf32>
    %c12_216 = arith.constant 12 : index
    %c96_217 = arith.constant 96 : index
    %144 = vector.load %arg14[%c12_216, %c96_217] : memref<18x512xf32, #tpu.memory_space<vmem>>, vector<3x32xf32>
    tpu.vector_store %arg14[%c12_216, %c96_217], %143 {strides = array<i32>} : memref<18x512xf32, #tpu.memory_space<vmem>>, vector<3x32xf32>,
    %c88_218 = arith.constant 88 : index
    %c0_219 = arith.constant 0 : index
    %145 = tpu.strided_load %arg13[%c88_218, %c0_219] {strides = array<i32: 2, 1>} : memref<128x32xf32, #tpu.memory_space<vmem>>, vector<3x32xf32>
    %c12_220 = arith.constant 12 : index
    %c128_221 = arith.constant 128 : index
    %146 = vector.load %arg14[%c12_220, %c128_221] : memref<18x512xf32, #tpu.memory_space<vmem>>, vector<3x32xf32>
    tpu.vector_store %arg14[%c12_220, %c128_221], %145 {strides = array<i32>} : memref<18x512xf32, #tpu.memory_space<vmem>>, vector<3x32xf32>,
    %c89_222 = arith.constant 89 : index
    %c0_223 = arith.constant 0 : index
    %147 = tpu.strided_load %arg13[%c89_222, %c0_223] {strides = array<i32: 2, 1>} : memref<128x32xf32, #tpu.memory_space<vmem>>, vector<3x32xf32>
    %c12_224 = arith.constant 12 : index
    %c160_225 = arith.constant 160 : index
    %148 = vector.load %arg14[%c12_224, %c160_225] : memref<18x512xf32, #tpu.memory_space<vmem>>, vector<3x32xf32>
    tpu.vector_store %arg14[%c12_224, %c160_225], %147 {strides = array<i32>} : memref<18x512xf32, #tpu.memory_space<vmem>>, vector<3x32xf32>,
    %c90_226 = arith.constant 90 : index
    %c0_227 = arith.constant 0 : index
    %149 = tpu.strided_load %arg13[%c90_226, %c0_227] {strides = array<i32: 2, 1>} : memref<128x32xf32, #tpu.memory_space<vmem>>, vector<3x32xf32>
    %c12_228 = arith.constant 12 : index
    %c192_229 = arith.constant 192 : index
    %150 = vector.load %arg14[%c12_228, %c192_229] : memref<18x512xf32, #tpu.memory_space<vmem>>, vector<3x32xf32>
    tpu.vector_store %arg14[%c12_228, %c192_229], %149 {strides = array<i32>} : memref<18x512xf32, #tpu.memory_space<vmem>>, vector<3x32xf32>,
    %c91_230 = arith.constant 91 : index
    %c0_231 = arith.constant 0 : index
    %151 = tpu.strided_load %arg13[%c91_230, %c0_231] {strides = array<i32: 2, 1>} : memref<128x32xf32, #tpu.memory_space<vmem>>, vector<3x32xf32>
    %c12_232 = arith.constant 12 : index
    %c224_233 = arith.constant 224 : index
    %152 = vector.load %arg14[%c12_232, %c224_233] : memref<18x512xf32, #tpu.memory_space<vmem>>, vector<3x32xf32>
    tpu.vector_store %arg14[%c12_232, %c224_233], %151 {strides = array<i32>} : memref<18x512xf32, #tpu.memory_space<vmem>>, vector<3x32xf32>,
    %c96_234 = arith.constant 96 : index
    %c0_235 = arith.constant 0 : index
    %153 = tpu.strided_load %arg13[%c96_234, %c0_235] {strides = array<i32: 2, 1>} : memref<128x32xf32, #tpu.memory_space<vmem>>, vector<3x32xf32>
    %c12_236 = arith.constant 12 : index
    %c256_237 = arith.constant 256 : index
    %154 = vector.load %arg14[%c12_236, %c256_237] : memref<18x512xf32, #tpu.memory_space<vmem>>, vector<3x32xf32>
    tpu.vector_store %arg14[%c12_236, %c256_237], %153 {strides = array<i32>} : memref<18x512xf32, #tpu.memory_space<vmem>>, vector<3x32xf32>,
    %c97 = arith.constant 97 : index
    %c0_238 = arith.constant 0 : index
    %155 = tpu.strided_load %arg13[%c97, %c0_238] {strides = array<i32: 2, 1>} : memref<128x32xf32, #tpu.memory_space<vmem>>, vector<3x32xf32>
    %c12_239 = arith.constant 12 : index
    %c288_240 = arith.constant 288 : index
    %156 = vector.load %arg14[%c12_239, %c288_240] : memref<18x512xf32, #tpu.memory_space<vmem>>, vector<3x32xf32>
    tpu.vector_store %arg14[%c12_239, %c288_240], %155 {strides = array<i32>} : memref<18x512xf32, #tpu.memory_space<vmem>>, vector<3x32xf32>,
    %c98 = arith.constant 98 : index
    %c0_241 = arith.constant 0 : index
    %157 = tpu.strided_load %arg13[%c98, %c0_241] {strides = array<i32: 2, 1>} : memref<128x32xf32, #tpu.memory_space<vmem>>, vector<3x32xf32>
    %c12_242 = arith.constant 12 : index
    %c320_243 = arith.constant 320 : index
    %158 = vector.load %arg14[%c12_242, %c320_243] : memref<18x512xf32, #tpu.memory_space<vmem>>, vector<3x32xf32>
    tpu.vector_store %arg14[%c12_242, %c320_243], %157 {strides = array<i32>} : memref<18x512xf32, #tpu.memory_space<vmem>>, vector<3x32xf32>,
    %c99 = arith.constant 99 : index
    %c0_244 = arith.constant 0 : index
    %159 = tpu.strided_load %arg13[%c99, %c0_244] {strides = array<i32: 2, 1>} : memref<128x32xf32, #tpu.memory_space<vmem>>, vector<3x32xf32>
    %c12_245 = arith.constant 12 : index
    %c352_246 = arith.constant 352 : index
    %160 = vector.load %arg14[%c12_245, %c352_246] : memref<18x512xf32, #tpu.memory_space<vmem>>, vector<3x32xf32>
    tpu.vector_store %arg14[%c12_245, %c352_246], %159 {strides = array<i32>} : memref<18x512xf32, #tpu.memory_space<vmem>>, vector<3x32xf32>,
    %c104 = arith.constant 104 : index
    %c0_247 = arith.constant 0 : index
    %161 = tpu.strided_load %arg13[%c104, %c0_247] {strides = array<i32: 2, 1>} : memref<128x32xf32, #tpu.memory_space<vmem>>, vector<3x32xf32>
    %c12_248 = arith.constant 12 : index
    %c384_249 = arith.constant 384 : index
    %162 = vector.load %arg14[%c12_248, %c384_249] : memref<18x512xf32, #tpu.memory_space<vmem>>, vector<3x32xf32>
    tpu.vector_store %arg14[%c12_248, %c384_249], %161 {strides = array<i32>} : memref<18x512xf32, #tpu.memory_space<vmem>>, vector<3x32xf32>,
    %c105 = arith.constant 105 : index
    %c0_250 = arith.constant 0 : index
    %163 = tpu.strided_load %arg13[%c105, %c0_250] {strides = array<i32: 2, 1>} : memref<128x32xf32, #tpu.memory_space<vmem>>, vector<3x32xf32>
    %c12_251 = arith.constant 12 : index
    %c416_252 = arith.constant 416 : index
    %164 = vector.load %arg14[%c12_251, %c416_252] : memref<18x512xf32, #tpu.memory_space<vmem>>, vector<3x32xf32>
    tpu.vector_store %arg14[%c12_251, %c416_252], %163 {strides = array<i32>} : memref<18x512xf32, #tpu.memory_space<vmem>>, vector<3x32xf32>,
    %c106 = arith.constant 106 : index
    %c0_253 = arith.constant 0 : index
    %165 = tpu.strided_load %arg13[%c106, %c0_253] {strides = array<i32: 2, 1>} : memref<128x32xf32, #tpu.memory_space<vmem>>, vector<3x32xf32>
    %c12_254 = arith.constant 12 : index
    %c448_255 = arith.constant 448 : index
    %166 = vector.load %arg14[%c12_254, %c448_255] : memref<18x512xf32, #tpu.memory_space<vmem>>, vector<3x32xf32>
    tpu.vector_store %arg14[%c12_254, %c448_255], %165 {strides = array<i32>} : memref<18x512xf32, #tpu.memory_space<vmem>>, vector<3x32xf32>,
    %c107 = arith.constant 107 : index
    %c0_256 = arith.constant 0 : index
    %167 = tpu.strided_load %arg13[%c107, %c0_256] {strides = array<i32: 2, 1>} : memref<128x32xf32, #tpu.memory_space<vmem>>, vector<3x32xf32>
    %c12_257 = arith.constant 12 : index
    %c480_258 = arith.constant 480 : index
    %168 = vector.load %arg14[%c12_257, %c480_258] : memref<18x512xf32, #tpu.memory_space<vmem>>, vector<3x32xf32>
    tpu.vector_store %arg14[%c12_257, %c480_258], %167 {strides = array<i32>} : memref<18x512xf32, #tpu.memory_space<vmem>>, vector<3x32xf32>,
    %c96_259 = arith.constant 96 : index
    %c0_260 = arith.constant 0 : index
    %169 = tpu.strided_load %arg13[%c96_259, %c0_260] {strides = array<i32: 2, 1>} : memref<128x32xf32, #tpu.memory_space<vmem>>, vector<3x32xf32>
    %c15 = arith.constant 15 : index
    %c0_261 = arith.constant 0 : index
    %170 = vector.load %arg14[%c15, %c0_261] : memref<18x512xf32, #tpu.memory_space<vmem>>, vector<3x32xf32>
    tpu.vector_store %arg14[%c15, %c0_261], %169 {strides = array<i32>} : memref<18x512xf32, #tpu.memory_space<vmem>>, vector<3x32xf32>,
    %c97_262 = arith.constant 97 : index
    %c0_263 = arith.constant 0 : index
    %171 = tpu.strided_load %arg13[%c97_262, %c0_263] {strides = array<i32: 2, 1>} : memref<128x32xf32, #tpu.memory_space<vmem>>, vector<3x32xf32>
    %c15_264 = arith.constant 15 : index
    %c32_265 = arith.constant 32 : index
    %172 = vector.load %arg14[%c15_264, %c32_265] : memref<18x512xf32, #tpu.memory_space<vmem>>, vector<3x32xf32>
    tpu.vector_store %arg14[%c15_264, %c32_265], %171 {strides = array<i32>} : memref<18x512xf32, #tpu.memory_space<vmem>>, vector<3x32xf32>,
    %c98_266 = arith.constant 98 : index
    %c0_267 = arith.constant 0 : index
    %173 = tpu.strided_load %arg13[%c98_266, %c0_267] {strides = array<i32: 2, 1>} : memref<128x32xf32, #tpu.memory_space<vmem>>, vector<3x32xf32>
    %c15_268 = arith.constant 15 : index
    %c64_269 = arith.constant 64 : index
    %174 = vector.load %arg14[%c15_268, %c64_269] : memref<18x512xf32, #tpu.memory_space<vmem>>, vector<3x32xf32>
    tpu.vector_store %arg14[%c15_268, %c64_269], %173 {strides = array<i32>} : memref<18x512xf32, #tpu.memory_space<vmem>>, vector<3x32xf32>,
    %c99_270 = arith.constant 99 : index
    %c0_271 = arith.constant 0 : index
    %175 = tpu.strided_load %arg13[%c99_270, %c0_271] {strides = array<i32: 2, 1>} : memref<128x32xf32, #tpu.memory_space<vmem>>, vector<3x32xf32>
    %c15_272 = arith.constant 15 : index
    %c96_273 = arith.constant 96 : index
    %176 = vector.load %arg14[%c15_272, %c96_273] : memref<18x512xf32, #tpu.memory_space<vmem>>, vector<3x32xf32>
    tpu.vector_store %arg14[%c15_272, %c96_273], %175 {strides = array<i32>} : memref<18x512xf32, #tpu.memory_space<vmem>>, vector<3x32xf32>,
    %c104_274 = arith.constant 104 : index
    %c0_275 = arith.constant 0 : index
    %177 = tpu.strided_load %arg13[%c104_274, %c0_275] {strides = array<i32: 2, 1>} : memref<128x32xf32, #tpu.memory_space<vmem>>, vector<3x32xf32>
    %c15_276 = arith.constant 15 : index
    %c128_277 = arith.constant 128 : index
    %178 = vector.load %arg14[%c15_276, %c128_277] : memref<18x512xf32, #tpu.memory_space<vmem>>, vector<3x32xf32>
    tpu.vector_store %arg14[%c15_276, %c128_277], %177 {strides = array<i32>} : memref<18x512xf32, #tpu.memory_space<vmem>>, vector<3x32xf32>,
    %c105_278 = arith.constant 105 : index
    %c0_279 = arith.constant 0 : index
    %179 = tpu.strided_load %arg13[%c105_278, %c0_279] {strides = array<i32: 2, 1>} : memref<128x32xf32, #tpu.memory_space<vmem>>, vector<3x32xf32>
    %c15_280 = arith.constant 15 : index
    %c160_281 = arith.constant 160 : index
    %180 = vector.load %arg14[%c15_280, %c160_281] : memref<18x512xf32, #tpu.memory_space<vmem>>, vector<3x32xf32>
    tpu.vector_store %arg14[%c15_280, %c160_281], %179 {strides = array<i32>} : memref<18x512xf32, #tpu.memory_space<vmem>>, vector<3x32xf32>,
    %c106_282 = arith.constant 106 : index
    %c0_283 = arith.constant 0 : index
    %181 = tpu.strided_load %arg13[%c106_282, %c0_283] {strides = array<i32: 2, 1>} : memref<128x32xf32, #tpu.memory_space<vmem>>, vector<3x32xf32>
    %c15_284 = arith.constant 15 : index
    %c192_285 = arith.constant 192 : index
    %182 = vector.load %arg14[%c15_284, %c192_285] : memref<18x512xf32, #tpu.memory_space<vmem>>, vector<3x32xf32>
    tpu.vector_store %arg14[%c15_284, %c192_285], %181 {strides = array<i32>} : memref<18x512xf32, #tpu.memory_space<vmem>>, vector<3x32xf32>,
    %c107_286 = arith.constant 107 : index
    %c0_287 = arith.constant 0 : index
    %183 = tpu.strided_load %arg13[%c107_286, %c0_287] {strides = array<i32: 2, 1>} : memref<128x32xf32, #tpu.memory_space<vmem>>, vector<3x32xf32>
    %c15_288 = arith.constant 15 : index
    %c224_289 = arith.constant 224 : index
    %184 = vector.load %arg14[%c15_288, %c224_289] : memref<18x512xf32, #tpu.memory_space<vmem>>, vector<3x32xf32>
    tpu.vector_store %arg14[%c15_288, %c224_289], %183 {strides = array<i32>} : memref<18x512xf32, #tpu.memory_space<vmem>>, vector<3x32xf32>,
    %c112 = arith.constant 112 : index
    %c0_290 = arith.constant 0 : index
    %185 = tpu.strided_load %arg13[%c112, %c0_290] {strides = array<i32: 2, 1>} : memref<128x32xf32, #tpu.memory_space<vmem>>, vector<3x32xf32>
    %c15_291 = arith.constant 15 : index
    %c256_292 = arith.constant 256 : index
    %186 = vector.load %arg14[%c15_291, %c256_292] : memref<18x512xf32, #tpu.memory_space<vmem>>, vector<3x32xf32>
    tpu.vector_store %arg14[%c15_291, %c256_292], %185 {strides = array<i32>} : memref<18x512xf32, #tpu.memory_space<vmem>>, vector<3x32xf32>,
    %c113 = arith.constant 113 : index
    %c0_293 = arith.constant 0 : index
    %187 = tpu.strided_load %arg13[%c113, %c0_293] {strides = array<i32: 2, 1>} : memref<128x32xf32, #tpu.memory_space<vmem>>, vector<3x32xf32>
    %c15_294 = arith.constant 15 : index
    %c288_295 = arith.constant 288 : index
    %188 = vector.load %arg14[%c15_294, %c288_295] : memref<18x512xf32, #tpu.memory_space<vmem>>, vector<3x32xf32>
    tpu.vector_store %arg14[%c15_294, %c288_295], %187 {strides = array<i32>} : memref<18x512xf32, #tpu.memory_space<vmem>>, vector<3x32xf32>,
    %c114 = arith.constant 114 : index
    %c0_296 = arith.constant 0 : index
    %189 = tpu.strided_load %arg13[%c114, %c0_296] {strides = array<i32: 2, 1>} : memref<128x32xf32, #tpu.memory_space<vmem>>, vector<3x32xf32>
    %c15_297 = arith.constant 15 : index
    %c320_298 = arith.constant 320 : index
    %190 = vector.load %arg14[%c15_297, %c320_298] : memref<18x512xf32, #tpu.memory_space<vmem>>, vector<3x32xf32>
    tpu.vector_store %arg14[%c15_297, %c320_298], %189 {strides = array<i32>} : memref<18x512xf32, #tpu.memory_space<vmem>>, vector<3x32xf32>,
    %c115 = arith.constant 115 : index
    %c0_299 = arith.constant 0 : index
    %191 = tpu.strided_load %arg13[%c115, %c0_299] {strides = array<i32: 2, 1>} : memref<128x32xf32, #tpu.memory_space<vmem>>, vector<3x32xf32>
    %c15_300 = arith.constant 15 : index
    %c352_301 = arith.constant 352 : index
    %192 = vector.load %arg14[%c15_300, %c352_301] : memref<18x512xf32, #tpu.memory_space<vmem>>, vector<3x32xf32>
    tpu.vector_store %arg14[%c15_300, %c352_301], %191 {strides = array<i32>} : memref<18x512xf32, #tpu.memory_space<vmem>>, vector<3x32xf32>,
    %c120 = arith.constant 120 : index
    %c0_302 = arith.constant 0 : index
    %193 = tpu.strided_load %arg13[%c120, %c0_302] {strides = array<i32: 2, 1>} : memref<128x32xf32, #tpu.memory_space<vmem>>, vector<3x32xf32>
    %c15_303 = arith.constant 15 : index
    %c384_304 = arith.constant 384 : index
    %194 = vector.load %arg14[%c15_303, %c384_304] : memref<18x512xf32, #tpu.memory_space<vmem>>, vector<3x32xf32>
    tpu.vector_store %arg14[%c15_303, %c384_304], %193 {strides = array<i32>} : memref<18x512xf32, #tpu.memory_space<vmem>>, vector<3x32xf32>,
    %c121 = arith.constant 121 : index
    %c0_305 = arith.constant 0 : index
    %195 = tpu.strided_load %arg13[%c121, %c0_305] {strides = array<i32: 2, 1>} : memref<128x32xf32, #tpu.memory_space<vmem>>, vector<3x32xf32>
    %c15_306 = arith.constant 15 : index
    %c416_307 = arith.constant 416 : index
    %196 = vector.load %arg14[%c15_306, %c416_307] : memref<18x512xf32, #tpu.memory_space<vmem>>, vector<3x32xf32>
    tpu.vector_store %arg14[%c15_306, %c416_307], %195 {strides = array<i32>} : memref<18x512xf32, #tpu.memory_space<vmem>>, vector<3x32xf32>,
    %c122 = arith.constant 122 : index
    %c0_308 = arith.constant 0 : index
    %197 = tpu.strided_load %arg13[%c122, %c0_308] {strides = array<i32: 2, 1>} : memref<128x32xf32, #tpu.memory_space<vmem>>, vector<3x32xf32>
    %c15_309 = arith.constant 15 : index
    %c448_310 = arith.constant 448 : index
    %198 = vector.load %arg14[%c15_309, %c448_310] : memref<18x512xf32, #tpu.memory_space<vmem>>, vector<3x32xf32>
    tpu.vector_store %arg14[%c15_309, %c448_310], %197 {strides = array<i32>} : memref<18x512xf32, #tpu.memory_space<vmem>>, vector<3x32xf32>,
    %c123 = arith.constant 123 : index
    %c0_311 = arith.constant 0 : index
    %199 = tpu.strided_load %arg13[%c123, %c0_311] {strides = array<i32: 2, 1>} : memref<128x32xf32, #tpu.memory_space<vmem>>, vector<3x32xf32>
    %c15_312 = arith.constant 15 : index
    %c480_313 = arith.constant 480 : index
    %200 = vector.load %arg14[%c15_312, %c480_313] : memref<18x512xf32, #tpu.memory_space<vmem>>, vector<3x32xf32>
    tpu.vector_store %arg14[%c15_312, %c480_313], %199 {strides = array<i32>} : memref<18x512xf32, #tpu.memory_space<vmem>>, vector<3x32xf32>,
    %c0_314 = arith.constant 0 : index
    %c0_315 = arith.constant 0 : index
    %201 = vector.load %arg14[%c0_314, %c0_315] : memref<18x512xf32, #tpu.memory_space<vmem>>, vector<18x512xf32>
    %202 = arith.truncf %201 : vector<18x512xf32> to vector<18x512xbf16>
    %c0_316 = arith.constant 0 : index
    %c0_317 = arith.constant 0 : index
    %203 = vector.load %arg4[%c0_316, %c0_317] : memref<512x64xbf16, #tpu.memory_space<vmem>>, vector<512x64xbf16>
    %cst_318 = arith.constant dense<0.000000e+00> : vector<18x64xf32>
    %204 = tpu.matmul %202, %203, %cst_318 {dimension_numbers = #tpu.dot_dimension_numbers<[1], [0], [0], [1], [0, 0, 1, 1], [], []>} : vector<18x512xbf16>, vector<512x64xbf16>, vector<18x64xf32> -> vector<18x64xf32>
    %c0_319 = arith.constant 0 : index
    %c0_320 = arith.constant 0 : index
    %205 = vector.load %arg5[%c0_319, %c0_320] : memref<1x64xf32, #tpu.memory_space<vmem>>, vector<1x64xf32>
    %206 = vector.broadcast %205 : vector<1x64xf32> to vector<18x64xf32>
    %207 = arith.addf %204, %206 : vector<18x64xf32>
    %cst_321 = arith.constant 0.000000e+00 : f32
    %208 = vector.broadcast %cst_321 : f32 to vector<18x64xf32>
    %209 = arith.maximumf %207, %208 : vector<18x64xf32>
    %c0_322 = arith.constant 0 : index
    %c0_323 = arith.constant 0 : index
    %210 = vector.load %arg15[%c0_322, %c0_323] : memref<18x64xf32, #tpu.memory_space<vmem>>, vector<18x64xf32>
    tpu.vector_store %arg15[%c0_322, %c0_323], %209 {strides = array<i32>} : memref<18x64xf32, #tpu.memory_space<vmem>>, vector<18x64xf32>,
    %cst_324 = arith.constant 0.000000e+00 : f32
    %211 = vector.broadcast %cst_324 : f32 to vector<2x1024xf32>
    %cst_325 = arith.constant 0.000000e+00 : f32
    %212 = vector.broadcast %cst_325 : f32 to vector<2x64xf32>
    %c0_326 = arith.constant 0 : index
    %c0_327 = arith.constant 0 : index
    %213 = tpu.strided_load %arg15[%c0_326, %c0_327] {strides = array<i32: 9, 1>} : memref<18x64xf32, #tpu.memory_space<vmem>>, vector<2x64xf32>
    %c0_328 = arith.constant 0 : index
    %c0_329 = arith.constant 0 : index
    %214 = vector.load %arg6[%c0_328, %c0_329] : memref<576x64xbf16, #tpu.memory_space<vmem>>, vector<64x64xbf16>
    %215 = arith.truncf %213 : vector<2x64xf32> to vector<2x64xbf16>
    %cst_330 = arith.constant dense<0.000000e+00> : vector<2x64xf32>
    %216 = tpu.matmul %215, %214, %cst_330 {dimension_numbers = #tpu.dot_dimension_numbers<[1], [0], [0], [1], [0, 0, 1, 1], [], []>} : vector<2x64xbf16>, vector<64x64xbf16>, vector<2x64xf32> -> vector<2x64xf32>
    %217 = arith.addf %212, %216 : vector<2x64xf32>
    %c1_331 = arith.constant 1 : index
    %c0_332 = arith.constant 0 : index
    %218 = tpu.strided_load %arg15[%c1_331, %c0_332] {strides = array<i32: 9, 1>} : memref<18x64xf32, #tpu.memory_space<vmem>>, vector<2x64xf32>
    %c64_333 = arith.constant 64 : index
    %c0_334 = arith.constant 0 : index
    %219 = vector.load %arg6[%c64_333, %c0_334] : memref<576x64xbf16, #tpu.memory_space<vmem>>, vector<64x64xbf16>
    %220 = arith.truncf %218 : vector<2x64xf32> to vector<2x64xbf16>
    %cst_335 = arith.constant dense<0.000000e+00> : vector<2x64xf32>
    %221 = tpu.matmul %220, %219, %cst_335 {dimension_numbers = #tpu.dot_dimension_numbers<[1], [0], [0], [1], [0, 0, 1, 1], [], []>} : vector<2x64xbf16>, vector<64x64xbf16>, vector<2x64xf32> -> vector<2x64xf32>
    %222 = arith.addf %217, %221 : vector<2x64xf32>
    %c2_336 = arith.constant 2 : index
    %c0_337 = arith.constant 0 : index
    %223 = tpu.strided_load %arg15[%c2_336, %c0_337] {strides = array<i32: 9, 1>} : memref<18x64xf32, #tpu.memory_space<vmem>>, vector<2x64xf32>
    %c128_338 = arith.constant 128 : index
    %c0_339 = arith.constant 0 : index
    %224 = vector.load %arg6[%c128_338, %c0_339] : memref<576x64xbf16, #tpu.memory_space<vmem>>, vector<64x64xbf16>
    %225 = arith.truncf %223 : vector<2x64xf32> to vector<2x64xbf16>
    %cst_340 = arith.constant dense<0.000000e+00> : vector<2x64xf32>
    %226 = tpu.matmul %225, %224, %cst_340 {dimension_numbers = #tpu.dot_dimension_numbers<[1], [0], [0], [1], [0, 0, 1, 1], [], []>} : vector<2x64xbf16>, vector<64x64xbf16>, vector<2x64xf32> -> vector<2x64xf32>
    %227 = arith.addf %222, %226 : vector<2x64xf32>
    %c3_341 = arith.constant 3 : index
    %c0_342 = arith.constant 0 : index
    %228 = tpu.strided_load %arg15[%c3_341, %c0_342] {strides = array<i32: 9, 1>} : memref<18x64xf32, #tpu.memory_space<vmem>>, vector<2x64xf32>
    %c192_343 = arith.constant 192 : index
    %c0_344 = arith.constant 0 : index
    %229 = vector.load %arg6[%c192_343, %c0_344] : memref<576x64xbf16, #tpu.memory_space<vmem>>, vector<64x64xbf16>
    %230 = arith.truncf %228 : vector<2x64xf32> to vector<2x64xbf16>
    %cst_345 = arith.constant dense<0.000000e+00> : vector<2x64xf32>
    %231 = tpu.matmul %230, %229, %cst_345 {dimension_numbers = #tpu.dot_dimension_numbers<[1], [0], [0], [1], [0, 0, 1, 1], [], []>} : vector<2x64xbf16>, vector<64x64xbf16>, vector<2x64xf32> -> vector<2x64xf32>
    %232 = arith.addf %227, %231 : vector<2x64xf32>
    %c4 = arith.constant 4 : index
    %c0_346 = arith.constant 0 : index
    %233 = tpu.strided_load %arg15[%c4, %c0_346] {strides = array<i32: 9, 1>} : memref<18x64xf32, #tpu.memory_space<vmem>>, vector<2x64xf32>
    %c256_347 = arith.constant 256 : index
    %c0_348 = arith.constant 0 : index
    %234 = vector.load %arg6[%c256_347, %c0_348] : memref<576x64xbf16, #tpu.memory_space<vmem>>, vector<64x64xbf16>
    %235 = arith.truncf %233 : vector<2x64xf32> to vector<2x64xbf16>
    %cst_349 = arith.constant dense<0.000000e+00> : vector<2x64xf32>
    %236 = tpu.matmul %235, %234, %cst_349 {dimension_numbers = #tpu.dot_dimension_numbers<[1], [0], [0], [1], [0, 0, 1, 1], [], []>} : vector<2x64xbf16>, vector<64x64xbf16>, vector<2x64xf32> -> vector<2x64xf32>
    %237 = arith.addf %232, %236 : vector<2x64xf32>
    %c5 = arith.constant 5 : index
    %c0_350 = arith.constant 0 : index
    %238 = tpu.strided_load %arg15[%c5, %c0_350] {strides = array<i32: 9, 1>} : memref<18x64xf32, #tpu.memory_space<vmem>>, vector<2x64xf32>
    %c320_351 = arith.constant 320 : index
    %c0_352 = arith.constant 0 : index
    %239 = vector.load %arg6[%c320_351, %c0_352] : memref<576x64xbf16, #tpu.memory_space<vmem>>, vector<64x64xbf16>
    %240 = arith.truncf %238 : vector<2x64xf32> to vector<2x64xbf16>
    %cst_353 = arith.constant dense<0.000000e+00> : vector<2x64xf32>
    %241 = tpu.matmul %240, %239, %cst_353 {dimension_numbers = #tpu.dot_dimension_numbers<[1], [0], [0], [1], [0, 0, 1, 1], [], []>} : vector<2x64xbf16>, vector<64x64xbf16>, vector<2x64xf32> -> vector<2x64xf32>
    %242 = arith.addf %237, %241 : vector<2x64xf32>
    %c6_354 = arith.constant 6 : index
    %c0_355 = arith.constant 0 : index
    %243 = tpu.strided_load %arg15[%c6_354, %c0_355] {strides = array<i32: 9, 1>} : memref<18x64xf32, #tpu.memory_space<vmem>>, vector<2x64xf32>
    %c384_356 = arith.constant 384 : index
    %c0_357 = arith.constant 0 : index
    %244 = vector.load %arg6[%c384_356, %c0_357] : memref<576x64xbf16, #tpu.memory_space<vmem>>, vector<64x64xbf16>
    %245 = arith.truncf %243 : vector<2x64xf32> to vector<2x64xbf16>
    %cst_358 = arith.constant dense<0.000000e+00> : vector<2x64xf32>
    %246 = tpu.matmul %245, %244, %cst_358 {dimension_numbers = #tpu.dot_dimension_numbers<[1], [0], [0], [1], [0, 0, 1, 1], [], []>} : vector<2x64xbf16>, vector<64x64xbf16>, vector<2x64xf32> -> vector<2x64xf32>
    %247 = arith.addf %242, %246 : vector<2x64xf32>
    %c7 = arith.constant 7 : index
    %c0_359 = arith.constant 0 : index
    %248 = tpu.strided_load %arg15[%c7, %c0_359] {strides = array<i32: 9, 1>} : memref<18x64xf32, #tpu.memory_space<vmem>>, vector<2x64xf32>
    %c448_360 = arith.constant 448 : index
    %c0_361 = arith.constant 0 : index
    %249 = vector.load %arg6[%c448_360, %c0_361] : memref<576x64xbf16, #tpu.memory_space<vmem>>, vector<64x64xbf16>
    %250 = arith.truncf %248 : vector<2x64xf32> to vector<2x64xbf16>
    %cst_362 = arith.constant dense<0.000000e+00> : vector<2x64xf32>
    %251 = tpu.matmul %250, %249, %cst_362 {dimension_numbers = #tpu.dot_dimension_numbers<[1], [0], [0], [1], [0, 0, 1, 1], [], []>} : vector<2x64xbf16>, vector<64x64xbf16>, vector<2x64xf32> -> vector<2x64xf32>
    %252 = arith.addf %247, %251 : vector<2x64xf32>
    %c8_363 = arith.constant 8 : index
    %c0_364 = arith.constant 0 : index
    %253 = tpu.strided_load %arg15[%c8_363, %c0_364] {strides = array<i32: 9, 1>} : memref<18x64xf32, #tpu.memory_space<vmem>>, vector<2x64xf32>
    %c512 = arith.constant 512 : index
    %c0_365 = arith.constant 0 : index
    %254 = vector.load %arg6[%c512, %c0_365] : memref<576x64xbf16, #tpu.memory_space<vmem>>, vector<64x64xbf16>
    %255 = arith.truncf %253 : vector<2x64xf32> to vector<2x64xbf16>
    %cst_366 = arith.constant dense<0.000000e+00> : vector<2x64xf32>
    %256 = tpu.matmul %255, %254, %cst_366 {dimension_numbers = #tpu.dot_dimension_numbers<[1], [0], [0], [1], [0, 0, 1, 1], [], []>} : vector<2x64xbf16>, vector<64x64xbf16>, vector<2x64xf32> -> vector<2x64xf32>
    %257 = arith.addf %252, %256 : vector<2x64xf32>
    %c0_367 = arith.constant 0 : index
    %c0_368 = arith.constant 0 : index
    %258 = vector.load %arg7[%c0_367, %c0_368] : memref<1x64xf32, #tpu.memory_space<vmem>>, vector<1x64xf32>
    %259 = vector.broadcast %258 : vector<1x64xf32> to vector<2x64xf32>
    %260 = arith.addf %257, %259 : vector<2x64xf32>
    %cst_369 = arith.constant 0.000000e+00 : f32
    %261 = vector.broadcast %cst_369 : f32 to vector<2x64xf32>
    %262 = arith.maximumf %260, %261 : vector<2x64xf32>
    %263 = arith.truncf %262 : vector<2x64xf32> to vector<2x64xbf16>
    %c0_370 = arith.constant 0 : index
    %c0_371 = arith.constant 0 : index
    %264 = vector.load %arg8[%c0_370, %c0_371] : memref<64x1024xbf16, #tpu.memory_space<vmem>>, vector<64x1024xbf16>
    %cst_372 = arith.constant dense<0.000000e+00> : vector<2x1024xf32>
    %265 = tpu.matmul %263, %264, %cst_372 {dimension_numbers = #tpu.dot_dimension_numbers<[1], [0], [0], [1], [0, 0, 1, 1], [], []>} : vector<2x64xbf16>, vector<64x1024xbf16>, vector<2x1024xf32> -> vector<2x1024xf32>
    %266 = arith.addf %211, %265 : vector<2x1024xf32>
    %c0_373 = arith.constant 0 : index
    %c0_374 = arith.constant 0 : index
    %267 = vector.load %arg9[%c0_373, %c0_374] : memref<1x1024xf32, #tpu.memory_space<vmem>>, vector<1x1024xf32>
    %268 = vector.broadcast %267 : vector<1x1024xf32> to vector<2x1024xf32>
    %269 = arith.addf %266, %268 : vector<2x1024xf32>
    %cst_375 = arith.constant 0.000000e+00 : f32
    %270 = vector.broadcast %cst_375 : f32 to vector<2x1024xf32>
    %271 = arith.maximumf %269, %270 : vector<2x1024xf32>
    %272 = arith.truncf %271 : vector<2x1024xf32> to vector<2x1024xbf16>
    %c0_376 = arith.constant 0 : index
    %c0_377 = arith.constant 0 : index
    %273 = vector.load %arg10[%c0_376, %c0_377] : memref<1024x6xbf16, #tpu.memory_space<vmem>>, vector<1024x6xbf16>
    %cst_378 = arith.constant dense<0.000000e+00> : vector<2x6xf32>
    %274 = tpu.matmul %272, %273, %cst_378 {dimension_numbers = #tpu.dot_dimension_numbers<[1], [0], [0], [1], [0, 0, 1, 1], [], []>} : vector<2x1024xbf16>, vector<1024x6xbf16>, vector<2x6xf32> -> vector<2x6xf32>
    %c0_379 = arith.constant 0 : index
    %c0_380 = arith.constant 0 : index
    %275 = vector.load %arg11[%c0_379, %c0_380] : memref<1x6xf32, #tpu.memory_space<vmem>>, vector<1x6xf32>
    %276 = vector.broadcast %275 : vector<1x6xf32> to vector<2x6xf32>
    %277 = arith.addf %274, %276 : vector<2x6xf32>
    %c0_381 = arith.constant 0 : index
    %c0_382 = arith.constant 0 : index
    %278 = vector.load %arg12[%c0_381, %c0_382] : memref<2x6xf32, #tpu.memory_space<vmem>>, vector<2x6xf32>
    tpu.vector_store %arg12[%c0_381, %c0_382], %277 {strides = array<i32>} : memref<2x6xf32, #tpu.memory_space<vmem>>, vector<2x6xf32>,
    return
  }
  func.func @transform_0(%arg0: i32) -> (i32, i32) {
    %c0_i32 = arith.constant 0 : i32
    %c0_i32_0 = arith.constant 0 : i32
    %c0_i32_1 = arith.constant 0 : i32
    return %c0_i32, %c0_i32_0 : i32, i32
  }
  func.func @transform_1(%arg0: i32) -> (i32, i32) {
    %c0_i32 = arith.constant 0 : i32
    %c0_i32_0 = arith.constant 0 : i32
    %c0_i32_1 = arith.constant 0 : i32
    return %c0_i32, %c0_i32_0 : i32, i32
  }
  func.func @transform_2(%arg0: i32) -> (i32, i32) {
    %c0_i32 = arith.constant 0 : i32
    %c0_i32_0 = arith.constant 0 : i32
    %c0_i32_1 = arith.constant 0 : i32
    return %c0_i32, %c0_i32_0 : i32, i32
  }
  func.func @transform_3(%arg0: i32) -> (i32, i32) {
    %c0_i32 = arith.constant 0 : i32
    %c0_i32_0 = arith.constant 0 : i32
    %c0_i32_1 = arith.constant 0 : i32
    return %c0_i32, %c0_i32_0 : i32, i32
  }
  func.func @transform_4(%arg0: i32) -> (i32, i32) {
    %c0_i32 = arith.constant 0 : i32
    %c0_i32_0 = arith.constant 0 : i32
    %c0_i32_1 = arith.constant 0 : i32
    return %c0_i32, %c0_i32_0 : i32, i32
  }
  func.func @transform_5(%arg0: i32) -> (i32, i32) {
    %c0_i32 = arith.constant 0 : i32
    %c0_i32_0 = arith.constant 0 : i32
    %c0_i32_1 = arith.constant 0 : i32
    return %c0_i32, %c0_i32_0 : i32, i32
  }
  func.func @transform_6(%arg0: i32) -> (i32, i32) {
    %c0_i32 = arith.constant 0 : i32
    %c0_i32_0 = arith.constant 0 : i32
    %c0_i32_1 = arith.constant 0 : i32
    return %c0_i32, %c0_i32_0 : i32, i32
  }
  func.func @transform_7(%arg0: i32) -> (i32, i32) {
    %c0_i32 = arith.constant 0 : i32
    %c0_i32_0 = arith.constant 0 : i32
    %c0_i32_1 = arith.constant 0 : i32
    return %c0_i32, %c0_i32_0 : i32, i32
  }
  func.func @transform_8(%arg0: i32) -> (i32, i32) {
    %c0_i32 = arith.constant 0 : i32
    %c0_i32_0 = arith.constant 0 : i32
    %c0_i32_1 = arith.constant 0 : i32
    return %c0_i32, %c0_i32_0 : i32, i32
  }
  func.func @transform_9(%arg0: i32) -> (i32, i32) {
    %c0_i32 = arith.constant 0 : i32
    %c0_i32_0 = arith.constant 0 : i32
    %c0_i32_1 = arith.constant 0 : i32
    return %c0_i32, %c0_i32_0 : i32, i32
  }
  func.func @transform_10(%arg0: i32) -> (i32, i32) {
    %c0_i32 = arith.constant 0 : i32
    %c0_i32_0 = arith.constant 0 : i32
    %c0_i32_1 = arith.constant 0 : i32
    return %c0_i32, %c0_i32_0 : i32, i32
  }
  func.func @transform_11(%arg0: i32) -> (i32, i32) {
    %c0_i32 = arith.constant 0 : i32
    %c0_i32_0 = arith.constant 0 : i32
    %c0_i32_1 = arith.constant 0 : i32
    return %c0_i32, %c0_i32_0 : i32, i32
  }
}

</mosaic_0001>

<bundles_post_ra>
// kernel: dueling_cnn_forward.1
= control target key start
LH: loop header
LB: loop body
LE: loop exit
PB: predicated region body
PF: predicated region fallthrough
CT: control target
= control target key end

     0   :  { %s5142_s0 = inlined_call_operand.vmem [shape: bf16[128,256], index: 0, kind: input, shape index: {}]   ;;  %s5143_s1 = inlined_call_operand.vmem [shape: bf16[256,32], index: 1, kind: input, shape index: {}]   ;;  %s5144_s2 = inlined_call_operand.vmem [shape: f32[1,32], index: 2, kind: input, shape index: {}]   ;;  %s5145_s3 = inlined_call_operand.vmem [shape: bf16[512,64], index: 3, kind: input, shape index: {}]   ;;  %s5146_s4 = inlined_call_operand.vmem [shape: f32[1,64], index: 4, kind: input, shape index: {}]   ;;  %s5147_s5 = inlined_call_operand.vmem [shape: bf16[576,64], index: 5, kind: input, shape index: {}]   ;;  %s5148_s6 = inlined_call_operand.vmem [shape: f32[1,64], index: 6, kind: input, shape index: {}]   ;;  %s5149_s7 = inlined_call_operand.vmem [shape: bf16[64,1024], index: 7, kind: input, shape index: {}]   ;;  %s5150_s8 = inlined_call_operand.vmem [shape: f32[1,1024], index: 8, kind: input, shape index: {}]   ;;  %s5151_s9 = inlined_call_operand.vmem [shape: bf16[1024,6], index: 9, kind: input, shape index: {}]   ;;  %s5152_s10 = inlined_call_operand.vmem [shape: f32[1,6], index: 10, kind: input, shape index: {}]   ;;  %s5153_s11 = inlined_call_operand.hbm [shape: f32[2,6], index: 11, kind: output, shape index: {}]  }
   0x1   :  { %v3926_v0 = vld [vmem:[%s5143_s1 + $0x78] sm:$0xff]   ;;  %v3928_v2 = vld [vmem:[%s5143_s1 + $0x70] sm:$0xff]   ;;  %v3930_v4 = vld [vmem:[%s5143_s1 + $0x68] sm:$0xff]  }
   0x2   :  { %v3927_v1 = vld [vmem:[%s5143_s1 + $0x38] sm:$0xff]   ;;  %3558 = vmatprep.subr.bf16.mxu0 %v3926_v0  ;;  %v3929_v3 = vld [vmem:[%s5143_s1 + $0x30] sm:$0xff]   ;;  %v3931_v5 = vld [vmem:[%s5143_s1 + $0x28] sm:$0xff]  }
   0x3   :  { %3559 = vmatpush3.bf16.msra.mxu0 %v3927_v1  ;;  %v3932_v6 = vld [vmem:[%s5143_s1 + $0x60] sm:$0xff]   ;;  %v3934_v8 = vld [vmem:[%s5143_s1 + $0x58] sm:$0xff]   ;;  %v3936_v10 = vld [vmem:[%s5143_s1 + $0x50] sm:$0xff]  }
   0x4   :  { %3560 = vmatprep.subr.bf16.mxu0 %v3928_v2  ;;  %v3933_v7 = vld [vmem:[%s5143_s1 + $0x20] sm:$0xff]   ;;  %v3935_v9 = vld [vmem:[%s5143_s1 + $0x18] sm:$0xff]   ;;  %v3937_v12 = vld [vmem:[%s5143_s1 + $0x10] sm:$0xff]  }
   0x5   :  { %v3944_v11 = vld [vmem:[%s5142_s0 + $0x4] ss:$8 sps:$4 sm:$0xff]   ;;  %v3942_v17 = vld [vmem:[%s5142_s0] ss:$8 sps:$4 sm:$0xff]   ;;  %v3945_v18 = vld [vmem:[%s5142_s0 + $0x14] ss:$8 sps:$4 sm:$0xff]  }
   0x6   :  { %303 = vmatprep.mubr.bf16.mxu0 %v3944_v11  ;;  %v3938_v13 = vld [vmem:[%s5143_s1 + $0x48] sm:$0xff]   ;;  %v3940_v15 = vld [vmem:[%s5143_s1 + $0x40] sm:$0xff]   ;;  %v3947_v19 = vld [vmem:[%s5142_s0 + $0x10] ss:$8 sps:$4 sm:$0xff]  }
   0x7   :  { %3561 = vmatpush3.bf16.msra.mxu0 %v3929_v3  ;;  %v3939_v14 = vld [vmem:[%s5143_s1 + $0x8] sm:$0xff]   ;;  %v3941_v16 = vld [vmem:[%s5143_s1] sm:$0xff]   ;;  %v3951_v22 = vld [vmem:[%s5142_s0 + $0x34] ss:$8 sps:$4 sm:$0xff]  }
   0x8   :  { %3562 = vmatprep.subr.bf16.mxu0 %v3930_v4  ;;  %v3948_v20 = vld [vmem:[%s5142_s0 + $0x24] ss:$8 sps:$4 sm:$0xff]   ;;  %v3950_v21 = vld [vmem:[%s5142_s0 + $0x20] ss:$8 sps:$4 sm:$0xff]   ;;  %v3953_v23 = vld [vmem:[%s5142_s0 + $0x30] ss:$8 sps:$4 sm:$0xff]  }
   0x9   :  { %v3954_v24 = vld [vmem:[%s5142_s0 + $0x44] ss:$8 sps:$4 sm:$0xff]   ;;  %v3956_v25 = vld [vmem:[%s5142_s0 + $0x40] ss:$8 sps:$4 sm:$0xff]   ;;  %v3957_v26 = vld [vmem:[%s5142_s0 + $0x54] ss:$8 sps:$4 sm:$0xff]  }
   0xa   :  { %v3959_v27 = vld [vmem:[%s5142_s0 + $0x50] ss:$8 sps:$4 sm:$0xff]   ;;  %v3960_v28 = vld [vmem:[%s5142_s0 + $0x64] ss:$8 sps:$4 sm:$0xff]   ;;  %v3962_v29 = vld [vmem:[%s5142_s0 + $0x60] ss:$8 sps:$4 sm:$0xff]  }
   0xb   :  { %3563 = vmatpush3.bf16.msra.mxu0 %v3931_v5  ;;  %v3963_v30 = vld [vmem:[%s5142_s0 + $0x74] ss:$8 sps:$4 sm:$0xff]   ;;  %v3965_v31 = vld [vmem:[%s5142_s0 + $0x70] ss:$8 sps:$4 sm:$0xff]  }
   0xc   :  { %3564 = vmatprep.subr.bf16.mxu0 %v3932_v6 }
   0xf   :  { %3565 = vmatpush3.bf16.msra.mxu0 %v3933_v7 }
  0x10   :  { %3566 = vmatprep.subr.bf16.mxu0 %v3934_v8 }
  0x13   :  { %3567 = vmatpush3.bf16.msra.mxu0 %v3935_v9 }
  0x14   :  { %3568 = vmatprep.subr.bf16.mxu0 %v3936_v10 }
  0x17   :  { %3569 = vmatpush3.bf16.msra.mxu0 %v3937_v12 }
  0x18   :  { %3570 = vmatprep.subr.bf16.mxu0 %v3938_v13 }
  0x1b   :  { %3571 = vmatpush3.bf16.msra.mxu0 %v3939_v14 }
  0x1c   :  { %3572 = vmatprep.subr.bf16.mxu0 %v3940_v15 }
  0x1f   :  { %3573 = vmatpush3.bf16.msra.mxu0 %v3941_v16 }
  0x22   :  { %304 = vmatmul.mubr.bf16.vlgmr.msra.gmra.mxu0 %v3942_v17 }
  0x23   :  { %311 = vmatprep.mubr.bf16.mxu0 %v3945_v18 }
  0x2a   :  { %312 = vmatmul.mubr.bf16.gmra.mxu0 %v3947_v19 }
  0x2b   :  { %319 = vmatprep.mubr.bf16.mxu0 %v3948_v20 }
  0x32   :  { %320 = vmatmul.mubr.bf16.gmra.mxu0 %v3950_v21 }
  0x33   :  { %327 = vmatprep.mubr.bf16.mxu0 %v3951_v22 }
  0x3a   :  { %328 = vmatmul.mubr.bf16.gmra.mxu0 %v3953_v23 }
  0x3b   :  { %335 = vmatprep.mubr.bf16.mxu0 %v3954_v24 }
  0x42   :  { %336 = vmatmul.mubr.bf16.gmra.mxu0 %v3956_v25 }
  0x43   :  { %343 = vmatprep.mubr.bf16.mxu0 %v3957_v26 }
  0x4a   :  { %344 = vmatmul.mubr.bf16.gmra.mxu0 %v3959_v27 }
  0x4b   :  { %351 = vmatprep.mubr.bf16.mxu0 %v3960_v28 }
  0x52   :  { %352 = vmatmul.mubr.bf16.gmra.mxu0 %v3962_v29 }
  0x53   :  { %359 = vmatprep.mubr.bf16.mxu0 %v3963_v30 }
  0x5a   :  { %360 = vmatmul.mubr.bf16.gmra.mxu0 %v3965_v31 }
  0x5b   :  { %16 = vsyncpa [#allocation6], 0  ;;  %v4286_v33 = vld [vmem:[%s5144_s2] ss:$0 sm:$0xff]  ;;  %vm384_vm0 = vcmask 261120   ;;  %vm402_vm1 = vcmask 256000  }
  0x5c   :  { %s4120_s0 = smov 32   ;;  %s4121_s2 = smov 64   ;;  %vm504_vm2 = vcmask 259075   ;;  %vm620_vm3 = vcmask 261126   ;;  %vm622_vm4 = vcmask 253952   ;;  %vm757_vm5 = vcmask 257025  }
  0x5d   :  { %s4122_s24 = smov 96   ;;  %vm880_vm6 = vcmask 260100   ;;  %vm996_vm7 = vcmask 261127   ;;  %vm998_vm8 = vcmask 254976   ;;  %vm410_vm9 = vcmask 518400   ;;  %s4126_s15 = smov [#allocation5]  }
  0x5e   :  { %vm418_vm10 = vcmask 780800   ;;  %vm426_vm11 = vcmask 1043200   ;;  %vm512_vm12 = vcmask 521475   ;;  %vm520_vm13 = vcmask 783875   ;;  %s3337_s16 = sshll.u32 %s4126_s15, 4  ;;  %s3338_s16 = int_to_ptr.vmem [resolvable:$true] %s3337_s16 }
  0x5f   :  { %vm528_vm14 = vcmask 1046275   ;;  %vm630_vm15 = vcmask 523526   ;;  %p4103_p1 = scmp.lt.s32.totalorder %s3338_s16, %s3338_s16 }
  0xe2   :  { %v3574_v32 = vpop.f32.mrf.mxu0 }
  0xe4   :  { %v3575_v34 = vpop.f32.mrf.mxu0 }
  0xe5   :  { %v3576_v35 = vadd.f32 %v3575_v34, %v3574_v32 }
  0xe6   :  { %v3577_v36 = vpop.f32.mrf.mxu0 }
  0xe7   :  { %v306_v37 = vadd.f32 %v3576_v35, %v4286_v33 }
  0xe8   :  { %v3578_v38 = vpop.f32.mrf.mxu0 }
  0xe9   :  { %v368_v39 = vmax.f32 %v306_v37, 0.0  ;;  %v3579_v40 = vadd.f32 %v3578_v38, %v3577_v36 }
  0xea   :  { %v3580_v41 = vpop.f32.mrf.mxu0 }
  0xeb   :  { %385 = vst.msk [vmem:[#allocation2] sm:$0xff] %vm384_vm0, %v368_v39  ;;  %v309_v42 = vadd.f32 %v3579_v40, %v4286_v33 }
  0xec   :  { %v3581_v43 = vpop.f32.mrf.mxu0 }
  0xed   :  { %v369_v44 = vmax.f32 %v309_v42, 0.0  ;;  %v3582_v45 = vadd.f32 %v3581_v43, %v3580_v41 }
  0xee   :  { %v3583_v46 = vpop.f32.mrf.mxu0 }
  0xef   :  { %386 = vst.msk [vmem:[#allocation2 + $0x8] sm:$0xff] %vm384_vm0, %v369_v44  ;;  %v314_v47 = vadd.f32 %v3582_v45, %v4286_v33 }
  0xf0   :  { %v3584_v48 = vpop.f32.mrf.mxu0 }
  0xf1   :  { %v370_v49 = vmax.f32 %v314_v47, 0.0  ;;  %v3585_v50 = vadd.f32 %v3584_v48, %v3583_v46 }
  0xf2   :  { %v405_v51 = vld [vmem:[#allocation2 + $0x1] ss:$2 sm:$0x7]  ;;  %v3586_v52 = vpop.f32.mrf.mxu0  ;;  %v401_v54 = vld [vmem:[#allocation2] ss:$2 sm:$0x7] }
  0xf3   :  { %387 = vst.msk [vmem:[#allocation2 + $0x10] sm:$0xff] %vm384_vm0, %v370_v49  ;;  %v317_v53 = vadd.f32 %v3585_v50, %v4286_v33  ;;  %407 = vrot.lane.b32.xlu0 %v405_v51, %s4120_s0  ;;  %v413_v59 = vld [vmem:[#allocation2 + $0x2] ss:$2 sm:$0x7] }
  0xf4   :  { %v3587_v55 = vpop.f32.mrf.mxu0  ;;  %403 = vst.msk [vmem:[#allocation3] sm:$0x7] %vm402_vm1, %v401_v54  ;;  %v421_v1 = vld [vmem:[#allocation2 + $0x3] ss:$2 sm:$0x7] }
  0xf5   :  { %v371_v56 = vmax.f32 %v317_v53, 0.0  ;;  %v3588_v57 = vadd.f32 %v3587_v55, %v3586_v52 }
  0xf6   :  { %v439_v58 = vld [vmem:[#allocation2 + $0xa] ss:$2 sm:$0x7]  ;;  %v3589_v60 = vpop.f32.mrf.mxu0  ;;  %v446_v3 = vld [vmem:[#allocation2 + $0xb] ss:$2 sm:$0x7] }
  0xf7   :  { %388 = vst.msk [vmem:[#allocation2 + $0x18] sm:$0xff] %vm384_vm0, %v371_v56  ;;  %441 = vrot.lane.b32.xlu1 %v439_v58, %s4121_s2  ;;  %415 = vrot.lane.b32.xlu0 %v413_v59, %s4121_s2  ;;  %v322_v61 = vadd.f32 %v3588_v57, %v4286_v33  ;;  %v429_v62 = vld [vmem:[#allocation2 + $0x8] ss:$2 sm:$0x7] }
  0xf8   :  { %v3590_v63 = vpop.f32.mrf.mxu0  ;;  %430 = vst.msk [vmem:[#allocation3 + $0x8] sm:$0x7] %vm402_vm1, %v429_v62  ;;  %v432_v11 = vld [vmem:[#allocation2 + $0x9] ss:$2 sm:$0x7] }
  0xf9   :  { %v372_v0 = vmax.f32 %v322_v61, 0.0  ;;  %v3591_v2 = vadd.f32 %v3590_v63, %v3589_v60 }
  0xfa   :  { %v522_v4 = vld [vmem:[#allocation2 + $0x13] ss:$2 sm:$0x7]  ;;  %v3592_v5 = vpop.f32.mrf.mxu0  ;;  %v463_v21 = vld [vmem:[#allocation2 + $0x12] ss:$2 sm:$0x7] }
  0xfb   :  { %389 = vst.msk [vmem:[#allocation2 + $0x20] sm:$0xff] %vm384_vm0, %v372_v0  ;;  %448 = vrot.lane.b32.xlu1 %v446_v3, %s4122_s24  ;;  %423 = vrot.lane.b32.xlu0 %v421_v1, %s4122_s24  ;;  %v325_v6 = vadd.f32 %v3591_v2, %v4286_v33  ;;  %v524_v9 = vrot.slane %v522_v4, 5  ;;  %v456_v18 = vld [vmem:[#allocation2 + $0x11] ss:$2 sm:$0x7] }
  0xfc   :  { %v3593_v7 = vpop.f32.mrf.mxu0  ;;  %v506_v23 = vld [vmem:[#allocation2 + $0x11] ss:$2 sm:$0x7]  ;;  %v514_v37 = vld [vmem:[#allocation2 + $0x12] ss:$2 sm:$0x7] }
  0xfd   :  { %v373_v8 = vmax.f32 %v325_v6, 0.0  ;;  %v3594_v10 = vadd.f32 %v3593_v7, %v3592_v5  ;;  %v508_v32 = vrot.slane %v506_v23, 5  ;;  %v516_v42 = vrot.slane %v514_v37, 5  ;;  %v453_v59 = vld [vmem:[#allocation2 + $0x10] ss:$2 sm:$0x7] }
  0xfe   :  { %v3595_v12 = vpop.f32.mrf.mxu0  ;;  %v487_v17 = vld [vmem:[#allocation2 + $0x1a] ss:$2 sm:$0x7]  ;;  %v494_v26 = vld [vmem:[#allocation2 + $0x1b] ss:$2 sm:$0x7] }
  0xff   :  { %390 = vst.msk [vmem:[#allocation2 + $0x28] sm:$0xff] %vm384_vm0, %v373_v8  ;;  %525 = vrot.lane.b32.xlu1 %v524_v9, %s4122_s24  ;;  %434 = vrot.lane.b32.xlu0 %v432_v11, %s4120_s0  ;;  %v330_v13 = vadd.f32 %v3594_v10, %v4286_v33  ;;  %v542_v27 = vld [vmem:[#allocation2 + $0x1a] ss:$2 sm:$0x7] }
 0x100   :  { %v3596_v14 = vpop.f32.mrf.mxu0  ;;  %v544_v31 = vrot.slane %v542_v27, 5  ;;  %v549_v36 = vld [vmem:[#allocation2 + $0x1b] ss:$2 sm:$0x7]  ;;  %454 = vst.msk [vmem:[#allocation3 + $0x10] sm:$0x7] %vm402_vm1, %v453_v59 }
 0x101   :  { %v374_v15 = vmax.f32 %v330_v13, 0.0  ;;  %v3597_v16 = vadd.f32 %v3596_v14, %v3595_v12  ;;  %v551_v41 = vrot.slane %v549_v36, 5  ;;  %v480_v50 = vld [vmem:[#allocation2 + $0x19] ss:$2 sm:$0x7] }
 0x102   :  { %v3598_v19 = vpop.f32.mrf.mxu0  ;;  %v535_v54 = vld [vmem:[#allocation2 + $0x19] ss:$2 sm:$0x7]  ;;  %v624_v57 = vld [vmem:[#allocation2 + $0x21] ss:$2 sm:$0x7] }
 0x103   :  { %489 = vrot.lane.b32.xlu1 %v487_v17, %s4121_s2  ;;  %458 = vrot.lane.b32.xlu0 %v456_v18, %s4120_s0  ;;  %391 = vst.msk [vmem:[#allocation2 + $0x30] sm:$0xff] %vm384_vm0, %v374_v15  ;;  %v333_v20 = vadd.f32 %v3597_v16, %v4286_v33  ;;  %v537_v61 = vrot.slane %v535_v54, 5  ;;  %v500_v0 = vld [vmem:[#allocation2 + $0x10] ss:$2 sm:$0x7]  ;;  %v626_v5 = vrot.slane %v624_v57, 2 }
 0x104   :  { %v3599_v22 = vpop.f32.mrf.mxu0  ;;  %v502_v4 = vrot.slane %v500_v0, 5  ;;  %v477_v12 = vld [vmem:[#allocation2 + $0x18] ss:$2 sm:$0x7] }
 0x105   :  { %v375_v24 = vmax.f32 %v333_v20, 0.0  ;;  %v3600_v25 = vadd.f32 %v3599_v22, %v3598_v19  ;;  %v634_v14 = vld [vmem:[#allocation2 + $0x22] ss:$2 sm:$0x7]  ;;  %478 = vst.msk [vmem:[#allocation3 + $0x18] sm:$0x7] %vm402_vm1, %v477_v12 }
 0x106   :  { %v3601_v28 = vpop.f32.mrf.mxu0  ;;  %v660_v45 = vld [vmem:[#allocation2 + $0x29] ss:$2 sm:$0x7]  ;;  %v668_v53 = vld [vmem:[#allocation2 + $0x2a] ss:$2 sm:$0x7] }
 0x107   :  { %496 = vrot.lane.b32.xlu1 %v494_v26, %s4122_s24  ;;  %465 = vrot.lane.b32.xlu0 %v463_v21, %s4121_s2  ;;  %392 = vst.msk [vmem:[#allocation2 + $0x38] sm:$0xff] %vm384_vm0, %v375_v24  ;;  %v338_v29 = vadd.f32 %v3600_v25, %v4286_v33  ;;  %v662_v49 = vrot.slane %v660_v45, 2  ;;  %v670_v60 = vrot.slane %v668_v53, 2  ;;  %v676_v1 = vld [vmem:[#allocation2 + $0x2b] ss:$2 sm:$0x7] }
 0x108   :  { %v3602_v30 = vpop.f32.mrf.mxu0  ;;  %v654_v7 = vld [vmem:[#allocation2 + $0x28] ss:$2 sm:$0x7]  ;;  %v678_v8 = vrot.slane %v676_v1, 2  ;;  %505 = vst.msk [vmem:[#allocation3] sm:$0x38] %vm504_vm2, %v502_v4 }
 0x109   :  { %v376_v34 = vmax.f32 %v338_v29, 0.0  ;;  %v3603_v35 = vadd.f32 %v3602_v30, %v3601_v28  ;;  %v656_v11 = vrot.slane %v654_v7, 2  ;;  %v593_v13 = vld [vmem:[#allocation2 + $0x29] ss:$2 sm:$0x7]  ;;  %v636_v19 = vrot.slane %v634_v14, 2 }
 0x10a   :  { %v3604_v38 = vpop.f32.mrf.mxu0  ;;  %v595_v18 = vrot.slane %v593_v13, 5  ;;  %v601_v22 = vld [vmem:[#allocation2 + $0x2a] ss:$2 sm:$0x7]  ;;  %vm640_vm1 = vcmask 785926  }
 0x10b   :  { %545 = vrot.lane.b32.xlu1 %v544_v31, %s4121_s2  ;;  %509 = vrot.lane.b32.xlu0 %v508_v32, %s4120_s0  ;;  %393 = vst.msk [vmem:[#allocation2 + $0x40] sm:$0xff] %vm384_vm0, %v376_v34  ;;  %v341_v39 = vadd.f32 %v3603_v35, %v4286_v33  ;;  %v644_v23 = vld [vmem:[#allocation2 + $0x23] ss:$2 sm:$0x7]  ;;  %v603_v27 = vrot.slane %v601_v22, 5 }
 0x10c   :  { %v3605_v40 = vpop.f32.mrf.mxu0  ;;  %658 = vst.msk [vmem:[#allocation3 + $0x8] sm:$0xc0] %vm620_vm3, %v656_v11  ;;  %v646_v28 = vrot.slane %v644_v23, 2  ;;  %v609_v31 = vld [vmem:[#allocation2 + $0x2b] ss:$2 sm:$0x7] }
 0x10d   :  { %v377_v43 = vmax.f32 %v341_v39, 0.0  ;;  %v3606_v44 = vadd.f32 %v3605_v40, %v3604_v38  ;;  %659 = vst.msk [vmem:[#allocation3 + $0x28] sm:$0x1] %vm622_vm4, %v656_v11  ;;  %v563_v32 = vld [vmem:[#allocation2 + $0x21] ss:$2 sm:$0x7] }
 0x10e   :  { %v3607_v46 = vpop.f32.mrf.mxu0  ;;  %v611_v35 = vrot.slane %v609_v31, 5  ;;  %v565_v36 = vrot.slane %v563_v32, 5  ;;  %v735_v38 = vld [vmem:[#allocation2 + $0x3a] ss:$2 sm:$0x7]  ;;  %v3969_v31 = vld [vmem:[%s5145_s3 + $0x30] sm:$0xff]  }
 0x10f   :  { %552 = vrot.lane.b32.xlu1 %v551_v41, %s4122_s24  ;;  %517 = vrot.lane.b32.xlu0 %v516_v42, %s4121_s2  ;;  %394 = vst.msk [vmem:[#allocation2 + $0x48] sm:$0xff] %vm384_vm0, %v377_v43  ;;  %v346_v47 = vadd.f32 %v3606_v44, %v4286_v33  ;;  %v571_v39 = vld [vmem:[#allocation2 + $0x22] ss:$2 sm:$0x7]  ;;  %v737_v40 = vrot.slane %v735_v38, 2 }
 0x110   :  { %v3608_v48 = vpop.f32.mrf.mxu0  ;;  %v573_v41 = vrot.slane %v571_v39, 5  ;;  %v744_v42 = vld [vmem:[#allocation2 + $0x3b] ss:$2 sm:$0x7] }
 0x111   :  { %v378_v51 = vmax.f32 %v346_v47, 0.0  ;;  %v3609_v52 = vadd.f32 %v3608_v48, %v3607_v46  ;;  %v692_v43 = vld [vmem:[#allocation2 + $0x31] ss:$2 sm:$0x7] }
 0x112   :  { %v3610_v55 = vpop.f32.mrf.mxu0  ;;  %v694_v44 = vrot.slane %v692_v43, 2  ;;  %v778_v45 = vld [vmem:[#allocation2 + $0x43] ss:$2 sm:$0x7] }
 0x113   :  { %663 = vrot.lane.b32.xlu1 %v662_v49, %s4120_s0  ;;  %482 = vrot.lane.b32.xlu0 %v480_v50, %s4120_s0  ;;  %395 = vst.msk [vmem:[#allocation2 + $0x50] sm:$0xff] %vm384_vm0, %v378_v51  ;;  %v349_v56 = vadd.f32 %v3609_v52, %v4286_v33  ;;  %v701_v46 = vld [vmem:[#allocation2 + $0x32] ss:$2 sm:$0x7]  ;;  %v780_v47 = vrot.slane %v778_v45, 7  ;;  %v3971_v45 = vld [vmem:[%s5145_s3 + $0x28] sm:$0xff]  }
 0x114   :  { %v3611_v58 = vpop.f32.mrf.mxu0  ;;  %v703_v48 = vrot.slane %v701_v46, 2  ;;  %v726_v50 = vld [vmem:[#allocation2 + $0x39] ss:$2 sm:$0x7] }
 0x115   :  { %v379_v62 = vmax.f32 %v349_v56, 0.0  ;;  %v3612_v63 = vadd.f32 %v3611_v58, %v3610_v55  ;;  %v760_v52 = vld [vmem:[#allocation2 + $0x41] ss:$2 sm:$0x7]  ;;  %v728_v54 = vrot.slane %v726_v50, 2 }
 0x116   :  { %v3613_v2 = vpop.f32.mrf.mxu0  ;;  %v793_v49 = vld [vmem:[#allocation2 + $0x49] ss:$2 sm:$0x7]  ;;  %v801_v51 = vld [vmem:[#allocation2 + $0x4a] ss:$2 sm:$0x7] }
 0x117   :  { %671 = vrot.lane.b32.xlu1 %v670_v60, %s4121_s2  ;;  %538 = vrot.lane.b32.xlu0 %v537_v61, %s4120_s0  ;;  %396 = vst.msk [vmem:[#allocation2 + $0x58] sm:$0xff] %vm384_vm0, %v379_v62  ;;  %v354_v3 = vadd.f32 %v3612_v63, %v4286_v33  ;;  %v795_v53 = vrot.slane %v793_v49, 7  ;;  %v530_v55 = vld [vmem:[#allocation2 + $0x18] ss:$2 sm:$0x7]  ;;  %v803_v0 = vrot.slane %v801_v51, 7 }
 0x118   :  { %v3614_v6 = vpop.f32.mrf.mxu0  ;;  %v532_v56 = vrot.slane %v530_v55, 5  ;;  %v616_v57 = vld [vmem:[#allocation2 + $0x20] ss:$2 sm:$0x7]  ;;  %v762_v1 = vrot.slane %v760_v52, 7 }
 0x119   :  { %v380_v9 = vmax.f32 %v354_v3, 0.0  ;;  %v3615_v10 = vadd.f32 %v3614_v6, %v3613_v2  ;;  %v618_v58 = vrot.slane %v616_v57, 2  ;;  %v587_v59 = vld [vmem:[#allocation2 + $0x28] ss:$2 sm:$0x7] }
 0x11a   :  { %v3616_v15 = vpop.f32.mrf.mxu0  ;;  %v809_v60 = vld [vmem:[#allocation2 + $0x4b] ss:$2 sm:$0x7]  ;;  %v769_v61 = vld [vmem:[#allocation2 + $0x42] ss:$2 sm:$0x7] }
 0x11b   :  { %679 = vrot.lane.b32.xlu1 %v678_v8, %s4122_s24  ;;  %627 = vrot.lane.b32.xlu0 %v626_v5, %s4120_s0  ;;  %397 = vst.msk [vmem:[#allocation2 + $0x60] sm:$0xff] %vm384_vm0, %v380_v9  ;;  %v357_v16 = vadd.f32 %v3615_v10, %v4286_v33  ;;  %v589_v62 = vrot.slane %v587_v59, 5  ;;  %v557_v63 = vld [vmem:[#allocation2 + $0x20] ss:$2 sm:$0x7]  ;;  %v811_v12 = vrot.slane %v809_v60, 7 }
 0x11c   :  { %v3617_v17 = vpop.f32.mrf.mxu0  ;;  %534 = vst.msk [vmem:[#allocation3 + $0x8] sm:$0x38] %vm504_vm2, %v532_v56  ;;  %v559_v2 = vrot.slane %v557_v63, 5  ;;  %v685_v3 = vld [vmem:[#allocation2 + $0x30] ss:$2 sm:$0x7] }
 0x11d   :  { %v381_v20 = vmax.f32 %v357_v16, 0.0  ;;  %v3618_v21 = vadd.f32 %v3617_v17, %v3616_v15  ;;  %621 = vst.msk [vmem:[#allocation3] sm:$0xc0] %vm620_vm3, %v618_v58  ;;  %v687_v4 = vrot.slane %v685_v3, 2  ;;  %v771_v13 = vrot.slane %v769_v61, 7  ;;  %v3974_v59 = vld [vmem:[%s5145_s3 + $0x58] sm:$0xff]  }
 0x11e   :  { %v3619_v24 = vpop.f32.mrf.mxu0  ;;  %623 = vst.msk [vmem:[#allocation3 + $0x20] sm:$0x1] %vm622_vm4, %v618_v58  ;;  %v787_v5 = vld [vmem:[#allocation2 + $0x48] ss:$2 sm:$0x7]  ;;  %v3975_v60 = vld [vmem:[%s5145_s3 + $0x18] sm:$0xff]  }
 0x11f   :  { %596 = vrot.lane.b32.xlu1 %v595_v18, %s4120_s0  ;;  %637 = vrot.lane.b32.xlu0 %v636_v19, %s4121_s2  ;;  %398 = vst.msk [vmem:[#allocation2 + $0x68] sm:$0xff] %vm384_vm0, %v381_v20  ;;  %v362_v25 = vadd.f32 %v3618_v21, %v4286_v33  ;;  %v789_v6 = vrot.slane %v787_v5, 7  ;;  %v719_v7 = vld [vmem:[#allocation2 + $0x38] ss:$2 sm:$0x7] }
 0x120   :  { %v3620_v26 = vpop.f32.mrf.mxu0  ;;  %591 = vst.msk [vmem:[#allocation3 + $0x18] sm:$0x38] %vm504_vm2, %v589_v62  ;;  %561 = vst.msk [vmem:[#allocation3 + $0x10] sm:$0x38] %vm504_vm2, %v559_v2  ;;  %v721_v10 = vrot.slane %v719_v7, 2  ;;  %v3966_v18 = vld [vmem:[%s5145_s3 + $0x78] sm:$0xff]  }
 0x121   :  { %v382_v29 = vmax.f32 %v362_v25, 0.0  ;;  %v3621_v30 = vadd.f32 %v3620_v26, %v3619_v24  ;;  %v918_v8 = vld [vmem:[#allocation2 + $0x5a] ss:$2 sm:$0x7]  ;;  %689 = vst.msk [vmem:[#allocation3 + $0x10] sm:$0xc0] %vm620_vm3, %v687_v4  ;;  %3622 = vmatprep.subr.bf16.mxu1 %v3966_v18 }
 0x122   :  { %v882_v9 = vld [vmem:[#allocation2 + $0x51] ss:$2 sm:$0x7]  ;;  %690 = vst.msk [vmem:[#allocation3 + $0x30] sm:$0x1] %vm622_vm4, %v687_v4  ;;  %v3967_v20 = vld [vmem:[%s5145_s3 + $0x38] sm:$0xff]  }
 0x123   :  { %604 = vrot.lane.b32.xlu1 %v603_v27, %s4121_s2  ;;  %647 = vrot.lane.b32.xlu0 %v646_v28, %s4122_s24  ;;  %399 = vst.msk [vmem:[#allocation2 + $0x70] sm:$0xff] %vm384_vm0, %v382_v29  ;;  %v365_v34 = vadd.f32 %v3621_v30, %v4286_v33  ;;  %v746_v33 = vrot.slane %v744_v42, 2  ;;  %v753_v11 = vld [vmem:[#allocation2 + $0x40] ss:$2 sm:$0x7]  ;;  %v920_v26 = vrot.slane %v918_v8, 4 }
 0x124   :  { %791 = vst.msk [vmem:[#allocation3 + $0x28] sm:$0xe] %vm757_vm5, %v789_v6  ;;  %v755_v14 = vrot.slane %v753_v11, 7  ;;  %v876_v15 = vld [vmem:[#allocation2 + $0x50] ss:$2 sm:$0x7]  ;;  %3623 = vmatpush3.bf16.msra.mxu1 %v3967_v20 }
 0x125   :  { %v383_v37 = vmax.f32 %v365_v34, 0.0  ;;  %723 = vst.msk [vmem:[#allocation3 + $0x18] sm:$0xc0] %vm620_vm3, %v721_v10  ;;  %v878_v16 = vrot.slane %v876_v15, 4  ;;  %v884_v27 = vrot.slane %v882_v9, 4  ;;  %v3968_v30 = vld [vmem:[%s5145_s3 + $0x70] sm:$0xff]  }
 0x126   :  { %724 = vst.msk [vmem:[#allocation3 + $0x38] sm:$0x1] %vm622_vm4, %v721_v10  ;;  %v847_v17 = vld [vmem:[#allocation2 + $0x58] ss:$2 sm:$0x7]  ;;  %3624 = vmatprep.subr.bf16.mxu1 %v3968_v30  ;;  %v3977_v2 = vld [vmem:[%s5145_s3 + $0x10] sm:$0xff]  }
 0x127   :  { %612 = vrot.lane.b32.xlu1 %v611_v35, %s4122_s24  ;;  %566 = vrot.lane.b32.xlu0 %v565_v36, %s4120_s0  ;;  %400 = vst.msk [vmem:[#allocation2 + $0x78] sm:$0xff] %vm384_vm0, %v383_v37  ;;  %v849_v19 = vrot.slane %v847_v17, 7  ;;  %v817_v21 = vld [vmem:[#allocation2 + $0x50] ss:$2 sm:$0x7]  ;;  %v3978_v7 = vld [vmem:[%s5145_s3 + $0x48] sm:$0xff]  }
 0x128   :  { %758 = vst.msk [vmem:[#allocation3 + $0x20] sm:$0xe] %vm757_vm5, %v755_v14  ;;  %v925_v22 = vld [vmem:[#allocation2 + $0x5b] ss:$2 sm:$0x7]  ;;  %v819_v24 = vrot.slane %v817_v21, 7  ;;  %3625 = vmatpush3.bf16.msra.mxu1 %v3969_v31 }
 0x129   :  { %v890_v23 = vld [vmem:[#allocation2 + $0x52] ss:$2 sm:$0x7]  ;;  %881 = vst.msk [vmem:[#allocation3 + $0x20] sm:$0x70] %vm880_vm6, %v878_v16  ;;  %v3979_v8 = vld [vmem:[%s5145_s3 + $0x8] sm:$0xff]  }
 0x12a   :  { %v906_v25 = vld [vmem:[#allocation2 + $0x58] ss:$2 sm:$0x7]  ;;  %851 = vst.msk [vmem:[#allocation3 + $0x38] sm:$0xe] %vm757_vm5, %v849_v19  ;;  %v892_v42 = vrot.slane %v890_v23, 4 }
 0x12b   :  { %738 = vrot.lane.b32.xlu1 %v737_v40, %s4121_s2  ;;  %574 = vrot.lane.b32.xlu0 %v573_v41, %s4121_s2  ;;  %v908_v28 = vrot.slane %v906_v25, 4  ;;  %v1030_v29 = vld [vmem:[#allocation2 + $0x68] ss:$2 sm:$0x7]  ;;  %821 = vst.msk [vmem:[#allocation3 + $0x30] sm:$0xe] %vm757_vm5, %v819_v24 }
 0x12c   :  { %v1032_v32 = vrot.slane %v1030_v29, 1  ;;  %v992_v34 = vld [vmem:[#allocation2 + $0x60] ss:$2 sm:$0x7]  ;;  %v927_v41 = vrot.slane %v925_v22, 4  ;;  %v3982_v18 = vld [vmem:[%s5145_s3 + $0xf8] sm:$0xff]  }
 0x12d   :  { %910 = vst.msk [vmem:[#allocation3 + $0x28] sm:$0x70] %vm880_vm6, %v908_v28  ;;  %v994_v35 = vrot.slane %v992_v34, 1  ;;  %v933_v36 = vld [vmem:[#allocation2 + $0x60] ss:$2 sm:$0x7] }
 0x12e   :  { %v853_v37 = vld [vmem:[#allocation2 + $0x59] ss:$2 sm:$0x7]  ;;  %v898_v38 = vld [vmem:[#allocation2 + $0x53] ss:$2 sm:$0x7] }
 0x12f   :  { %747 = vrot.lane.b32.xlu1 %v746_v33, %s4122_s24  ;;  %695 = vrot.lane.b32.xlu0 %v694_v44, %s4120_s0  ;;  %1034 = vst.msk [vmem:[#allocation3 + $0x28] sm:$0x80] %vm996_vm7, %v1032_v32  ;;  %v935_v39 = vrot.slane %v933_v36, 4  ;;  %v963_v40 = vld [vmem:[#allocation2 + $0x68] ss:$2 sm:$0x7] }
 0x130   :  { %1035 = vst.msk [vmem:[#allocation3 + $0x48] sm:$0x3] %vm998_vm8, %v1032_v32  ;;  %999 = vst.msk [vmem:[#allocation3 + $0x40] sm:$0x3] %vm998_vm8, %v994_v35  ;;  %v965_v43 = vrot.slane %v963_v40, 4  ;;  %v3970_v44 = vld [vmem:[%s5145_s3 + $0x68] sm:$0xff]  }
 0x131   :  { %997 = vst.msk [vmem:[#allocation3 + $0x20] sm:$0x80] %vm996_vm7, %v994_v35  ;;  %v1095_v33 = vld [vmem:[#allocation2 + $0x78] ss:$2 sm:$0x7]  ;;  %3626 = vmatprep.subr.bf16.mxu1 %v3970_v44  ;;  %v855_v49 = vrot.slane %v853_v37, 7 }
 0x132   :  { %937 = vst.msk [vmem:[#allocation3 + $0x30] sm:$0x70] %vm880_vm6, %v935_v39  ;;  %v1097_v46 = vrot.slane %v1095_v33, 1  ;;  %967 = vst.msk [vmem:[#allocation3 + $0x38] sm:$0x70] %vm880_vm6, %v965_v43  ;;  %v900_v50 = vrot.slane %v898_v38, 4  ;;  %3627 = vmatpush3.bf16.msra.mxu1 %v3971_v45 }
 0x133   :  { %781 = vrot.lane.b32.xlu1 %v780_v47, %s4122_s24  ;;  %704 = vrot.lane.b32.xlu0 %v703_v48, %s4121_s2  ;;  %v1061_v47 = vld [vmem:[#allocation2 + $0x70] ss:$2 sm:$0x7]  ;;  %v861_v51 = vld [vmem:[#allocation2 + $0x5a] ss:$2 sm:$0x7] }
 0x134   :  { %v1063_v48 = vrot.slane %v1061_v47, 1  ;;  %1099 = vst.msk [vmem:[#allocation3 + $0x38] sm:$0x80] %vm996_vm7, %v1097_v46  ;;  %v823_v52 = vld [vmem:[#allocation2 + $0x51] ss:$2 sm:$0x7] }
 0x135   :  { %1100 = vst.msk [vmem:[#allocation3 + $0x58] sm:$0x3] %vm998_vm8, %v1097_v46  ;;  %v863_v55 = vrot.slane %v861_v51, 7  ;;  %v825_v56 = vrot.slane %v823_v52, 7  ;;  %v3981_v14 = vld [vmem:[%s5145_s3] sm:$0xff]   ;;  %vm632_vm0 = vcmask 516352  }
 0x136   :  { %1065 = vst.msk [vmem:[#allocation3 + $0x30] sm:$0x80] %vm996_vm7, %v1063_v48  ;;  %v831_v57 = vld [vmem:[#allocation2 + $0x52] ss:$2 sm:$0x7]  ;;  %vm642_vm2 = vcmask 778752  }
 0x137   :  { %796 = vrot.lane.b32.xlu1 %v795_v53, %s4120_s0  ;;  %729 = vrot.lane.b32.xlu0 %v728_v54, %s4120_s0  ;;  %1066 = vst.msk [vmem:[#allocation3 + $0x50] sm:$0x3] %vm998_vm8, %v1063_v48  ;;  %v3972_v53 = vld [vmem:[%s5145_s3 + $0x60] sm:$0xff]   ;;  %v869_v58 = vld [vmem:[#allocation2 + $0x5b] ss:$2 sm:$0x7] }
 0x138   :  { %v3973_v54 = vld [vmem:[%s5145_s3 + $0x20] sm:$0xff]   ;;  %3628 = vmatprep.subr.bf16.mxu1 %v3972_v53  ;;  %v871_v61 = vrot.slane %v869_v58, 7  ;;  %v833_v62 = vrot.slane %v831_v57, 7  ;;  %v1036_v6 = vld [vmem:[#allocation2 + $0x69] ss:$2 sm:$0x7] }
 0x139   :  { %3629 = vmatpush3.bf16.msra.mxu1 %v3973_v54  ;;  %v1020_v63 = vld [vmem:[#allocation2 + $0x63] ss:$2 sm:$0x7]  ;;  %v1038_v9 = vrot.slane %v1036_v6, 1  ;;  %vm650_vm3 = vcmask 1048326   ;;  %vm652_vm4 = vcmask 1041152  }
 0x13a   :  { %3630 = vmatprep.subr.bf16.mxu1 %v3974_v59  ;;  %v1022_v3 = vrot.slane %v1020_v63, 1  ;;  %v1000_v5 = vld [vmem:[#allocation2 + $0x61] ss:$2 sm:$0x7]  ;;  %vm766_vm5 = vcmask 519425   ;;  %vm775_vm6 = vcmask 781825  }
 0x13b   :  { %804 = vrot.lane.b32.xlu1 %v803_v0, %s4121_s2  ;;  %763 = vrot.lane.b32.xlu0 %v762_v1, %s4120_s0  ;;  %v911_v0 = vld [vmem:[#allocation2 + $0x59] ss:$2 sm:$0x7]  ;;  %v3976_v1 = vld [vmem:[%s5145_s3 + $0x50] sm:$0xff]   ;;  %v1002_v10 = vrot.slane %v1000_v5, 1  ;;  %vm784_vm7 = vcmask 1044225  }
 0x13c   :  { %v913_v4 = vrot.slane %v911_v0, 4  ;;  %v1010_v11 = vld [vmem:[#allocation2 + $0x62] ss:$2 sm:$0x7]  ;;  %vm888_vm8 = vcmask 522500  }
 0x13d   :  { %3631 = vmatpush3.bf16.msra.mxu1 %v3975_v60  ;;  %v1012_v16 = vrot.slane %v1010_v11, 1  ;;  %v1052_v17 = vld [vmem:[#allocation2 + $0x6b] ss:$2 sm:$0x7] }
 0x13e   :  { %3632 = vmatprep.subr.bf16.mxu1 %v3976_v1  ;;  %v1054_v19 = vrot.slane %v1052_v17, 1  ;;  %v470_v20 = vld [vmem:[#allocation2 + $0x13] ss:$2 sm:$0x7] }
 0x13f   :  { %812 = vrot.lane.b32.xlu1 %v811_v12, %s4122_s24  ;;  %772 = vrot.lane.b32.xlu0 %v771_v13, %s4121_s2  ;;  %v1044_v12 = vld [vmem:[#allocation2 + $0x6a] ss:$2 sm:$0x7]  ;;  %v3980_v13 = vld [vmem:[%s5145_s3 + $0x40] sm:$0xff]  }
 0x140   :  { %v1046_v15 = vrot.slane %v1044_v12, 1  ;;  %v579_v21 = vld [vmem:[#allocation2 + $0x23] ss:$2 sm:$0x7] }
 0x141   :  { %3633 = vmatpush3.bf16.msra.mxu1 %v3977_v2  ;;  %v939_v22 = vld [vmem:[#allocation2 + $0x61] ss:$2 sm:$0x7]  ;;  %v581_v24 = vrot.slane %v579_v21, 5 }
 0x142   :  { %3634 = vmatprep.subr.bf16.mxu1 %v3978_v7  ;;  %v941_v25 = vrot.slane %v939_v22, 4  ;;  %v977_v32 = vld [vmem:[#allocation2 + $0x6a] ss:$2 sm:$0x7] }
 0x143   :  { %921 = vrot.lane.b32.xlu1 %v920_v26, %s4121_s2  ;;  %885 = vrot.lane.b32.xlu0 %v884_v27, %s4120_s0  ;;  %v839_v26 = vld [vmem:[#allocation2 + $0x53] ss:$2 sm:$0x7]  ;;  %v947_v27 = vld [vmem:[#allocation2 + $0x62] ss:$2 sm:$0x7] }
 0x144   :  { %v841_v30 = vrot.slane %v839_v26, 7  ;;  %v949_v31 = vrot.slane %v947_v27, 4  ;;  %v710_v34 = vld [vmem:[#allocation2 + $0x33] ss:$2 sm:$0x7]  ;;  %v979_v37 = vrot.slane %v977_v32, 4 }
 0x145   :  { %3635 = vmatpush3.bf16.msra.mxu1 %v3979_v8  ;;  %v712_v38 = vrot.slane %v710_v34, 2  ;;  %v985_v39 = vld [vmem:[#allocation2 + $0x6b] ss:$2 sm:$0x7] }
 0x146   :  { %3636 = vmatprep.subr.bf16.mxu1 %v3980_v13  ;;  %v969_v40 = vld [vmem:[#allocation2 + $0x69] ss:$2 sm:$0x7]  ;;  %v987_v43 = vrot.slane %v985_v39, 4 }
 0x147   :  { %928 = vrot.lane.b32.xlu1 %v927_v41, %s4122_s24  ;;  %893 = vrot.lane.b32.xlu0 %v892_v42, %s4121_s2  ;;  %v971_v33 = vrot.slane %v969_v40, 4  ;;  %v1102_v44 = vld [vmem:[#allocation2 + $0x79] ss:$2 sm:$0x7] }
 0x148   :  { %v1068_v45 = vld [vmem:[#allocation2 + $0x71] ss:$2 sm:$0x7]  ;;  %v1104_v48 = vrot.slane %v1102_v44, 1 }
 0x149   :  { %3637 = vmatpush3.bf16.msra.mxu1 %v3981_v14  ;;  %v1077_v51 = vld [vmem:[#allocation2 + $0x72] ss:$2 sm:$0x7]  ;;  %v955_v57 = vld [vmem:[#allocation2 + $0x63] ss:$2 sm:$0x7] }
 0x14a   :  { %3650 = vmatprep.subr.bf16.mxu1 %v3982_v18 }
 0x14b   :  { %856 = vrot.lane.b32.xlu1 %v855_v49, %s4120_s0  ;;  %901 = vrot.lane.b32.xlu0 %v900_v50, %s4122_s24  ;;  %v1070_v49 = vrot.slane %v1068_v45, 1  ;;  %v1111_v50 = vld [vmem:[#allocation2 + $0x7a] ss:$2 sm:$0x7] }
 0x14c   :  { %v1113_v54 = vrot.slane %v1111_v50, 1 }
 0x14f   :  { %864 = vrot.lane.b32.xlu1 %v863_v55, %s4121_s2  ;;  %826 = vrot.lane.b32.xlu0 %v825_v56, %s4120_s0  ;;  %v1079_v55 = vrot.slane %v1077_v51, 1  ;;  %v1120_v56 = vld [vmem:[#allocation2 + $0x7b] ss:$2 sm:$0x7] }
 0x150   :  { %v1122_v60 = vrot.slane %v1120_v56, 1  ;;  %v3984_v56 = vld [vmem:[%s5145_s3 + $0xf0] sm:$0xff]  }
 0x153   :  { %872 = vrot.lane.b32.xlu1 %v871_v61, %s4122_s24  ;;  %834 = vrot.lane.b32.xlu0 %v833_v62, %s4121_s2  ;;  %v957_v61 = vrot.slane %v955_v57, 4  ;;  %v1086_v62 = vld [vmem:[#allocation2 + $0x73] ss:$2 sm:$0x7] }
 0x154   :  { %v1088_v1 = vrot.slane %v1086_v62, 1 }
 0x157   :  { %1023 = vrot.lane.b32.xlu1 %v1022_v3, %s4122_s24  ;;  %914 = vrot.lane.b32.xlu0 %v913_v4, %s4120_s0 }
 0x15b   :  { %1039 = vrot.lane.b32.xlu1 %v1038_v9, %s4120_s0  ;;  %1003 = vrot.lane.b32.xlu0 %v1002_v10, %s4120_s0 }
 0x15f   :  { %1047 = vrot.lane.b32.xlu1 %v1046_v15, %s4121_s2  ;;  %1013 = vrot.lane.b32.xlu0 %v1012_v16, %s4121_s2 }
 0x163   :  { %1055 = vrot.lane.b32.xlu1 %v1054_v19, %s4122_s24  ;;  %472 = vrot.lane.b32.xlu0 %v470_v20, %s4122_s24 }
 0x165   :  { %v408_v23 = vpop.permute.xlu0 %407 }
 0x166   :  { %411 = vst.msk [vmem:[#allocation3] sm:$0x7] %vm410_vm9, %v408_v23 }
 0x167   :  { %582 = vrot.lane.b32.xlu1 %v581_v24, %s4122_s24  ;;  %942 = vrot.lane.b32.xlu0 %v941_v25, %s4120_s0 }
 0x169   :  { %v442_v28 = vpop.permute.xlu1 %441  ;;  %v416_v29 = vpop.permute.xlu0 %415 }
 0x16a   :  { %419 = vst.msk [vmem:[#allocation3] sm:$0x7] %vm418_vm10, %v416_v29 }
 0x16b   :  { %842 = vrot.lane.b32.xlu1 %v841_v30, %s4122_s24  ;;  %950 = vrot.lane.b32.xlu0 %v949_v31, %s4121_s2 }
 0x16d   :  { %v449_v35 = vpop.permute.xlu1 %448  ;;  %v424_v36 = vpop.permute.xlu0 %423 }
 0x16e   :  { %427 = vst.msk [vmem:[#allocation3] sm:$0x7] %vm426_vm11, %v424_v36 }
 0x16f   :  { %980 = vrot.lane.b32.xlu1 %v979_v37, %s4121_s2  ;;  %713 = vrot.lane.b32.xlu0 %v712_v38, %s4122_s24 }
 0x171   :  { %v526_v41 = vpop.permute.xlu1 %525  ;;  %v435_v42 = vpop.permute.xlu0 %434 }
 0x172   :  { %437 = vst.msk [vmem:[#allocation3 + $0x8] sm:$0x7] %vm410_vm9, %v435_v42 }
 0x173   :  { %444 = vst.msk [vmem:[#allocation3 + $0x8] sm:$0x7] %vm418_vm10, %v442_v28  ;;  %988 = vrot.lane.b32.xlu1 %v987_v43, %s4122_s24  ;;  %972 = vrot.lane.b32.xlu0 %v971_v33, %s4120_s0 }
 0x174   :  { %451 = vst.msk [vmem:[#allocation3 + $0x8] sm:$0x7] %vm426_vm11, %v449_v35 }
 0x175   :  { %v490_v46 = vpop.permute.xlu1 %489  ;;  %v459_v47 = vpop.permute.xlu0 %458 }
 0x176   :  { %461 = vst.msk [vmem:[#allocation3 + $0x10] sm:$0x7] %vm410_vm9, %v459_v47 }
 0x177   :  { %1105 = vrot.lane.b32.xlu1 %v1104_v48, %s4120_s0  ;;  %1071 = vrot.lane.b32.xlu0 %v1070_v49, %s4120_s0 }
 0x179   :  { %v497_v52 = vpop.permute.xlu1 %496  ;;  %v466_v53 = vpop.permute.xlu0 %465 }
 0x17a   :  { %468 = vst.msk [vmem:[#allocation3 + $0x10] sm:$0x7] %vm418_vm10, %v466_v53 }
 0x17b   :  { %1114 = vrot.lane.b32.xlu1 %v1113_v54, %s4121_s2  ;;  %1080 = vrot.lane.b32.xlu0 %v1079_v55, %s4121_s2  ;;  %v3983_v54 = vld [vmem:[%s5145_s3 + $0xb8] sm:$0xff]  }
 0x17d   :  { %v546_v58 = vpop.permute.xlu1 %545  ;;  %v510_v59 = vpop.permute.xlu0 %509 }
 0x17e   :  { %513 = vst.msk [vmem:[#allocation3] sm:$0x38] %vm512_vm12, %v510_v59 }
 0x17f   :  { %1123 = vrot.lane.b32.xlu1 %v1122_v60, %s4122_s24  ;;  %958 = vrot.lane.b32.xlu0 %v957_v61, %s4122_s24  ;;  %v3985_v60 = vld [vmem:[%s5145_s3 + $0xb0] sm:$0xff]   ;;  %v3986_v61 = vld [vmem:[%s5145_s3 + $0xe8] sm:$0xff]  }
 0x181   :  { %v553_v63 = vpop.permute.xlu1 %552  ;;  %v518_v0 = vpop.permute.xlu0 %517 }
 0x182   :  { %521 = vst.msk [vmem:[#allocation3] sm:$0x38] %vm520_vm13, %v518_v0 }
 0x183   :  { %529 = vst.msk [vmem:[#allocation3] sm:$0x38] %vm528_vm14, %v526_v41  ;;  %1089 = vrot.lane.b32.xlu1 %v1088_v1, %s4122_s24  ;;  %v3987_v1 = vld [vmem:[%s5145_s3 + $0xa8] sm:$0xff]  }
 0x185   :  { %v664_v2 = vpop.permute.xlu1 %663  ;;  %v483_v3 = vpop.permute.xlu0 %482 }
 0x186   :  { %666 = vst.msk [vmem:[#allocation3 + $0x8] sm:$0xc0] %vm630_vm15, %v664_v2 }
 0x187   :  { %667 = vst.msk [vmem:[#allocation3 + $0x28] sm:$0x1] %vm632_vm0, %v664_v2 }
 0x188   :  { %485 = vst.msk [vmem:[#allocation3 + $0x18] sm:$0x7] %vm410_vm9, %v483_v3  ;;  %vm896_vm9 = vcmask 784900   ;;  %v3988_v3 = vld [vmem:[%s5145_s3 + $0xe0] sm:$0xff]  }
 0x189   :  { %492 = vst.msk [vmem:[#allocation3 + $0x18] sm:$0x7] %vm418_vm10, %v490_v46  ;;  %v672_v4 = vpop.permute.xlu1 %671  ;;  %v539_v5 = vpop.permute.xlu0 %538  ;;  %vm904_vm10 = vcmask 1047300  }
 0x18a   :  { %499 = vst.msk [vmem:[#allocation3 + $0x18] sm:$0x7] %vm426_vm11, %v497_v52 }
 0x18b   :  { %674 = vst.msk [vmem:[#allocation3 + $0x8] sm:$0xc0] %vm640_vm1, %v672_v4 }
 0x18c   :  { %675 = vst.msk [vmem:[#allocation3 + $0x28] sm:$0x1] %vm642_vm2, %v672_v4 }
 0x18d   :  { %541 = vst.msk [vmem:[#allocation3 + $0x8] sm:$0x38] %vm512_vm12, %v539_v5  ;;  %v680_v6 = vpop.permute.xlu1 %679  ;;  %v628_v7 = vpop.permute.xlu0 %627 }
 0x18e   :  { %548 = vst.msk [vmem:[#allocation3 + $0x8] sm:$0x38] %vm520_vm13, %v546_v58 }
 0x18f   :  { %555 = vst.msk [vmem:[#allocation3 + $0x8] sm:$0x38] %vm528_vm14, %v553_v63 }
 0x190   :  { %682 = vst.msk [vmem:[#allocation3 + $0x8] sm:$0xc0] %vm650_vm3, %v680_v6 }
 0x191   :  { %683 = vst.msk [vmem:[#allocation3 + $0x28] sm:$0x1] %vm652_vm4, %v680_v6  ;;  %v597_v8 = vpop.permute.xlu1 %596  ;;  %v638_v9 = vpop.permute.xlu0 %637  ;;  %v3989_v6 = vld [vmem:[%s5145_s3 + $0xa0] sm:$0xff]  }
 0x192   :  { %631 = vst.msk [vmem:[#allocation3] sm:$0xc0] %vm630_vm15, %v628_v7 }
 0x193   :  { %633 = vst.msk [vmem:[#allocation3 + $0x20] sm:$0x1] %vm632_vm0, %v628_v7  ;;  %v3990_v7 = vld [vmem:[%s5145_s3 + $0xd8] sm:$0xff]  }
 0x194   :  { %599 = vst.msk [vmem:[#allocation3 + $0x18] sm:$0x38] %vm512_vm12, %v597_v8 }
 0x195   :  { %641 = vst.msk [vmem:[#allocation3] sm:$0xc0] %vm640_vm1, %v638_v9  ;;  %v605_v10 = vpop.permute.xlu1 %604  ;;  %v648_v11 = vpop.permute.xlu0 %647 }
 0x196   :  { %643 = vst.msk [vmem:[#allocation3 + $0x20] sm:$0x1] %vm642_vm2, %v638_v9 }
 0x197   :  { %607 = vst.msk [vmem:[#allocation3 + $0x18] sm:$0x38] %vm520_vm13, %v605_v10  ;;  %v1129_v49 = vld [vmem:[#allocation3 + $0x8] sm:$0xff]  ;;  %v3991_v10 = vld [vmem:[%s5145_s3 + $0x98] sm:$0xff]  }
 0x198   :  { %651 = vst.msk [vmem:[#allocation3] sm:$0xc0] %vm650_vm3, %v648_v11 }
 0x199   :  { %653 = vst.msk [vmem:[#allocation3 + $0x20] sm:$0x1] %vm652_vm4, %v648_v11  ;;  %v613_v12 = vpop.permute.xlu1 %612  ;;  %v567_v13 = vpop.permute.xlu0 %566  ;;  %v3992_v11 = vld [vmem:[%s5145_s3 + $0xd0] sm:$0xff]  }
 0x19a   :  { %615 = vst.msk [vmem:[#allocation3 + $0x18] sm:$0x38] %vm528_vm14, %v613_v12 }
 0x19b   :  { %569 = vst.msk [vmem:[#allocation3 + $0x10] sm:$0x38] %vm512_vm12, %v567_v13  ;;  %vm1006_vm12 = vcmask 523527  }
 0x19d   :  { %v739_v14 = vpop.permute.xlu1 %738  ;;  %v575_v15 = vpop.permute.xlu0 %574 }
 0x19e   :  { %577 = vst.msk [vmem:[#allocation3 + $0x10] sm:$0x38] %vm520_vm13, %v575_v15  ;;  %vm1008_vm13 = vcmask 517376   ;;  %v3994_v15 = vld [vmem:[%s5145_s3 + $0xc8] sm:$0xff]  }
 0x19f   :  { %v1128_v53 = vld [vmem:[#allocation3] sm:$0xff] }
 0x1a1   :  { %v748_v16 = vpop.permute.xlu1 %747  ;;  %v696_v17 = vpop.permute.xlu0 %695 }
 0x1a2   :  { %698 = vst.msk [vmem:[#allocation3 + $0x10] sm:$0xc0] %vm630_vm15, %v696_v17 }
 0x1a3   :  { %699 = vst.msk [vmem:[#allocation3 + $0x30] sm:$0x1] %vm632_vm0, %v696_v17  ;;  %v3995_v17 = vld [vmem:[%s5145_s3 + $0x88] sm:$0xff]  }
 0x1a5   :  { %v782_v18 = vpop.permute.xlu1 %781  ;;  %v705_v19 = vpop.permute.xlu0 %704 }
 0x1a6   :  { %707 = vst.msk [vmem:[#allocation3 + $0x10] sm:$0xc0] %vm640_vm1, %v705_v19 }
 0x1a7   :  { %708 = vst.msk [vmem:[#allocation3 + $0x30] sm:$0x1] %vm642_vm2, %v705_v19 }
 0x1a9   :  { %v797_v20 = vpop.permute.xlu1 %796  ;;  %v730_v21 = vpop.permute.xlu0 %729 }
 0x1aa   :  { %799 = vst.msk [vmem:[#allocation3 + $0x28] sm:$0xe] %vm766_vm5, %v797_v20 }
 0x1ab   :  { %732 = vst.msk [vmem:[#allocation3 + $0x18] sm:$0xc0] %vm630_vm15, %v730_v21  ;;  %vm1016_vm15 = vcmask 785927  }
 0x1ac   :  { %733 = vst.msk [vmem:[#allocation3 + $0x38] sm:$0x1] %vm632_vm0, %v730_v21  ;;  %vm1018_vm0 = vcmask 779776  }
 0x1ad   :  { %741 = vst.msk [vmem:[#allocation3 + $0x18] sm:$0xc0] %vm640_vm1, %v739_v14  ;;  %v805_v22 = vpop.permute.xlu1 %804  ;;  %v764_v23 = vpop.permute.xlu0 %763  ;;  %vm1026_vm1 = vcmask 1048327  }
 0x1ae   :  { %742 = vst.msk [vmem:[#allocation3 + $0x38] sm:$0x1] %vm642_vm2, %v739_v14  ;;  %vm1028_vm2 = vcmask 1042176   ;;  %v3993_v14 = vld [vmem:[%s5145_s3 + $0x90] sm:$0xff]  }
 0x1af   :  { %750 = vst.msk [vmem:[#allocation3 + $0x18] sm:$0xc0] %vm650_vm3, %v748_v16 }
 0x1b0   :  { %751 = vst.msk [vmem:[#allocation3 + $0x38] sm:$0x1] %vm652_vm4, %v748_v16 }
 0x1b1   :  { %807 = vst.msk [vmem:[#allocation3 + $0x28] sm:$0xe] %vm775_vm6, %v805_v22  ;;  %v813_v24 = vpop.permute.xlu1 %812  ;;  %v773_v25 = vpop.permute.xlu0 %772  ;;  %v3997_v22 = vld [vmem:[%s5145_s3 + $0x80] sm:$0xff]  }
 0x1b2   :  { %767 = vst.msk [vmem:[#allocation3 + $0x20] sm:$0xe] %vm766_vm5, %v764_v23 }
 0x1b3   :  { %815 = vst.msk [vmem:[#allocation3 + $0x28] sm:$0xe] %vm784_vm7, %v813_v24 }
 0x1b4   :  { %776 = vst.msk [vmem:[#allocation3 + $0x20] sm:$0xe] %vm775_vm6, %v773_v25 }
 0x1b5   :  { %785 = vst.msk [vmem:[#allocation3 + $0x20] sm:$0xe] %vm784_vm7, %v782_v18  ;;  %v922_v26 = vpop.permute.xlu1 %921  ;;  %v886_v27 = vpop.permute.xlu0 %885  ;;  %v3996_v18 = vld [vmem:[%s5145_s3 + $0xc0] sm:$0xff]  }
 0x1b6   :  { %889 = vst.msk [vmem:[#allocation3 + $0x20] sm:$0x70] %vm888_vm8, %v886_v27  ;;  %v1131_v19 = vld [vmem:[#allocation3 + $0x18] sm:$0xff] }
 0x1b9   :  { %v929_v28 = vpop.permute.xlu1 %928  ;;  %v894_v29 = vpop.permute.xlu0 %893 }
 0x1ba   :  { %897 = vst.msk [vmem:[#allocation3 + $0x20] sm:$0x70] %vm896_vm9, %v894_v29 }
 0x1bd   :  { %v857_v30 = vpop.permute.xlu1 %856  ;;  %v902_v31 = vpop.permute.xlu0 %901 }
 0x1be   :  { %859 = vst.msk [vmem:[#allocation3 + $0x38] sm:$0xe] %vm766_vm5, %v857_v30  ;;  %v3998_v30 = vld [vmem:[%s5147_s5 + $0x18] sm:$0xff]  }
 0x1bf   :  { %905 = vst.msk [vmem:[#allocation3 + $0x20] sm:$0x70] %vm904_vm10, %v902_v31  ;;  %v4123_v31 = vmov 0.0  }
 0x1c0   :  { %3823 = vmatprep.subr.bf16.mxu0 %v4123_v31 }
 0x1c1   :  { %v865_v32 = vpop.permute.xlu1 %864  ;;  %v827_v34 = vpop.permute.xlu0 %826  ;;  %3824 = vmatpush3.bf16.msra.mxu0 %v3998_v30  ;;  %v4021_v30 = vld [vmem:[%s5147_s5 + $0xa0] sm:$0xff]  }
 0x1c2   :  { %867 = vst.msk [vmem:[#allocation3 + $0x38] sm:$0xe] %vm775_vm6, %v865_v32  ;;  %3825 = vmatprep.subr.bf16.mxu0 %v4123_v31  ;;  %v3999_v32 = vld [vmem:[%s5147_s5 + $0x10] sm:$0xff]  }
 0x1c3   :  { %829 = vst.msk [vmem:[#allocation3 + $0x30] sm:$0xe] %vm766_vm5, %v827_v34  ;;  %v4000_v34 = vld [vmem:[%s5147_s5 + $0x8] sm:$0xff]  }
 0x1c5   :  { %v873_v35 = vpop.permute.xlu1 %872  ;;  %v835_v36 = vpop.permute.xlu0 %834  ;;  %3826 = vmatpush3.bf16.msra.mxu0 %v3999_v32 }
 0x1c6   :  { %875 = vst.msk [vmem:[#allocation3 + $0x38] sm:$0xe] %vm784_vm7, %v873_v35  ;;  %3827 = vmatprep.subr.bf16.mxu0 %v4123_v31  ;;  %v4001_v35 = vld [vmem:[%s5147_s5 + $0x38] sm:$0xff]  }
 0x1c7   :  { %837 = vst.msk [vmem:[#allocation3 + $0x30] sm:$0xe] %vm775_vm6, %v835_v36  ;;  %v4002_v36 = vld [vmem:[%s5147_s5 + $0x30] sm:$0xff]  }
 0x1c9   :  { %v1024_v37 = vpop.permute.xlu1 %1023  ;;  %v915_v38 = vpop.permute.xlu0 %914  ;;  %3828 = vmatpush3.bf16.msra.mxu0 %v4000_v34 }
 0x1ca   :  { %917 = vst.msk [vmem:[#allocation3 + $0x28] sm:$0x70] %vm888_vm8, %v915_v38  ;;  %3829 = vmatprep.subr.bf16.mxu0 %v4123_v31  ;;  %v4003_v38 = vld [vmem:[%s5147_s5 + $0x28] sm:$0xff]  }
 0x1cb   :  { %924 = vst.msk [vmem:[#allocation3 + $0x28] sm:$0x70] %vm896_vm9, %v922_v26 }
 0x1cc   :  { %931 = vst.msk [vmem:[#allocation3 + $0x28] sm:$0x70] %vm904_vm10, %v929_v28 }
 0x1cd   :  { %v1040_v39 = vpop.permute.xlu1 %1039  ;;  %v1004_v40 = vpop.permute.xlu0 %1003 }
 0x1ce   :  { %1042 = vst.msk [vmem:[#allocation3 + $0x28] sm:$0x80] %vm1006_vm12, %v1040_v39  ;;  %1007 = vst.msk [vmem:[#allocation3 + $0x20] sm:$0x80] %vm1006_vm12, %v1004_v40 }
 0x1cf   :  { %1043 = vst.msk [vmem:[#allocation3 + $0x48] sm:$0x3] %vm1008_vm13, %v1040_v39  ;;  %1009 = vst.msk [vmem:[#allocation3 + $0x40] sm:$0x3] %vm1008_vm13, %v1004_v40  ;;  %v4004_v39 = vld [vmem:[%s5147_s5 + $0x20] sm:$0xff]  }
 0x1d1   :  { %v1048_v41 = vpop.permute.xlu1 %1047  ;;  %v1014_v42 = vpop.permute.xlu0 %1013 }
 0x1d2   :  { %1050 = vst.msk [vmem:[#allocation3 + $0x28] sm:$0x80] %vm1016_vm15, %v1048_v41  ;;  %1017 = vst.msk [vmem:[#allocation3 + $0x20] sm:$0x80] %vm1016_vm15, %v1014_v42 }
 0x1d3   :  { %1051 = vst.msk [vmem:[#allocation3 + $0x48] sm:$0x3] %vm1018_vm0, %v1048_v41  ;;  %1019 = vst.msk [vmem:[#allocation3 + $0x40] sm:$0x3] %vm1018_vm0, %v1014_v42 }
 0x1d4   :  { %1027 = vst.msk [vmem:[#allocation3 + $0x20] sm:$0x80] %vm1026_vm1, %v1024_v37 }
 0x1d5   :  { %1029 = vst.msk [vmem:[#allocation3 + $0x40] sm:$0x3] %vm1028_vm2, %v1024_v37  ;;  %v1056_v43 = vpop.permute.xlu1 %1055  ;;  %v473_v33 = vpop.permute.xlu0 %472  ;;  %v4005_v37 = vld [vmem:[%s5147_s5] sm:$0xff]  }
 0x1d6   :  { %1058 = vst.msk [vmem:[#allocation3 + $0x28] sm:$0x80] %vm1026_vm1, %v1056_v43  ;;  %3830 = vmatpush3.bf16.msra.mxu0 %v4005_v37 }
 0x1d7   :  { %1059 = vst.msk [vmem:[#allocation3 + $0x48] sm:$0x3] %vm1028_vm2, %v1056_v43  ;;  %3847 = vmatprep.subr.bf16.mxu0 %v4123_v31 }
 0x1d8   :  { %475 = vst.msk [vmem:[#allocation3 + $0x10] sm:$0x7] %vm426_vm11, %v473_v33  ;;  %vm4124_vm11 = vmmov 0  }
 0x1d9   :  { %v583_v44 = vpop.permute.xlu1 %582  ;;  %v943_v45 = vpop.permute.xlu0 %942  ;;  %3831 = vmatprep.mubr.msk.bf16.mxu0 %vm4124_vm11, %v4123_v31 }
 0x1da   :  { %585 = vst.msk [vmem:[#allocation3 + $0x10] sm:$0x38] %vm528_vm14, %v583_v44  ;;  %vm1510_vm14 = vcmask 523264  }
 0x1db   :  { %945 = vst.msk [vmem:[#allocation3 + $0x30] sm:$0x70] %vm888_vm8, %v943_v45  ;;  %v1132_v46 = vld [vmem:[#allocation3 + $0x20] sm:$0xff] }
 0x1dc   :  { %v1140_v55 = vpack.c.bf16 %v1132_v46, %v1128_v53  ;;  %v1136_v62 = vld [vmem:[#allocation3 + $0x40] sm:$0x3] }
 0x1dd   :  { %v843_v47 = vpop.permute.xlu1 %842  ;;  %v951_v48 = vpop.permute.xlu0 %950  ;;  %v1133_v50 = vld [vmem:[#allocation3 + $0x28] sm:$0xff]  ;;  %v1144_v2 = vpack.c.bf16 %v1136_v62, %v1136_v62 }
 0x1de   :  { %v1137_v51 = vld [vmem:[#allocation3 + $0x48] sm:$0x3]  ;;  %845 = vst.msk [vmem:[#allocation3 + $0x30] sm:$0xe] %vm784_vm7, %v843_v47  ;;  %v1141_v52 = vpack.c.bf16 %v1133_v50, %v1129_v49 }
 0x1df   :  { %953 = vst.msk [vmem:[#allocation3 + $0x30] sm:$0x70] %vm896_vm9, %v951_v48  ;;  %v1145_v57 = vpack.c.bf16 %v1137_v51, %v1137_v51  ;;  %v3378_v48 = vld [vmem:[%s5146_s4] ss:$0 sm:$0xff] }
 0x1e0   :  { %1443 = vmatprep.mubr.bf16.mxu1 %v1141_v52 }
 0x1e1   :  { %v981_v58 = vpop.permute.xlu1 %980  ;;  %v714_v59 = vpop.permute.xlu0 %713  ;;  %1444 = vmatmul.mubr.bf16.vlgmr.msra.gmra.mxu1 %v1140_v55 }
 0x1e2   :  { %716 = vst.msk [vmem:[#allocation3 + $0x10] sm:$0xc0] %vm650_vm3, %v714_v59  ;;  %3651 = vmatpush3.bf16.msra.mxu1 %v3983_v54  ;;  %1451 = vmatprep.mubr.bf16.mxu1 %v1145_v57  ;;  %vm1513_vm3 = vcmask 517120  }
 0x1e3   :  { %717 = vst.msk [vmem:[#allocation3 + $0x30] sm:$0x1] %vm652_vm4, %v714_v59  ;;  %3652 = vmatprep.subr.bf16.mxu1 %v3984_v56  ;;  %vm3329_vm4 = vcmask 41984  }
 0x1e5   :  { %v989_v63 = vpop.permute.xlu1 %988  ;;  %v973_v0 = vpop.permute.xlu0 %972 }
 0x1e6   :  { %975 = vst.msk [vmem:[#allocation3 + $0x38] sm:$0x70] %vm888_vm8, %v973_v0  ;;  %3653 = vmatpush3.bf16.msra.mxu1 %v3985_v60 }
 0x1e7   :  { %983 = vst.msk [vmem:[#allocation3 + $0x38] sm:$0x70] %vm896_vm9, %v981_v58  ;;  %3654 = vmatprep.subr.bf16.mxu1 %v3986_v61 }
 0x1e8   :  { %991 = vst.msk [vmem:[#allocation3 + $0x38] sm:$0x70] %vm904_vm10, %v989_v63 }
 0x1e9   :  { %v1106_v4 = vpop.permute.xlu1 %1105  ;;  %v1072_v5 = vpop.permute.xlu0 %1071  ;;  %1452 = vmatmul.mubr.bf16.gmra.mxu1 %v1144_v2  ;;  %v1130_v23 = vld [vmem:[#allocation3 + $0x10] sm:$0xff] }
 0x1ea   :  { %1108 = vst.msk [vmem:[#allocation3 + $0x38] sm:$0x80] %vm1006_vm12, %v1106_v4  ;;  %1074 = vst.msk [vmem:[#allocation3 + $0x30] sm:$0x80] %vm1006_vm12, %v1072_v5  ;;  %3655 = vmatpush3.bf16.msra.mxu1 %v3987_v1 }
 0x1eb   :  { %1109 = vst.msk [vmem:[#allocation3 + $0x58] sm:$0x3] %vm1008_vm13, %v1106_v4  ;;  %1075 = vst.msk [vmem:[#allocation3 + $0x50] sm:$0x3] %vm1008_vm13, %v1072_v5  ;;  %3656 = vmatprep.subr.bf16.mxu1 %v3988_v3 }
 0x1ed   :  { %v1115_v8 = vpop.permute.xlu1 %1114  ;;  %v1081_v9 = vpop.permute.xlu0 %1080 }
 0x1ee   :  { %1117 = vst.msk [vmem:[#allocation3 + $0x38] sm:$0x80] %vm1016_vm15, %v1115_v8  ;;  %1083 = vst.msk [vmem:[#allocation3 + $0x30] sm:$0x80] %vm1016_vm15, %v1081_v9  ;;  %3657 = vmatpush3.bf16.msra.mxu1 %v3989_v6 }
 0x1ef   :  { %1118 = vst.msk [vmem:[#allocation3 + $0x58] sm:$0x3] %vm1018_vm0, %v1115_v8  ;;  %1084 = vst.msk [vmem:[#allocation3 + $0x50] sm:$0x3] %vm1018_vm0, %v1081_v9  ;;  %3658 = vmatprep.subr.bf16.mxu1 %v3990_v7  ;;  %v4006_v7 = vld [vmem:[%s5147_s5 + $0x58] sm:$0xff]  }
 0x1f0   :  { %v4007_v8 = vld [vmem:[%s5147_s5 + $0x78] sm:$0xff]  }
 0x1f1   :  { %v1124_v12 = vpop.permute.xlu1 %1123  ;;  %v959_v13 = vpop.permute.xlu0 %958 }
 0x1f2   :  { %1126 = vst.msk [vmem:[#allocation3 + $0x38] sm:$0x80] %vm1026_vm1, %v1124_v12  ;;  %3659 = vmatpush3.bf16.msra.mxu1 %v3991_v10 }
 0x1f3   :  { %1127 = vst.msk [vmem:[#allocation3 + $0x58] sm:$0x3] %vm1028_vm2, %v1124_v12  ;;  %3660 = vmatprep.subr.bf16.mxu1 %v3992_v11 }
 0x1f4   :  { %961 = vst.msk [vmem:[#allocation3 + $0x30] sm:$0x70] %vm904_vm10, %v959_v13  ;;  %v4008_v13 = vld [vmem:[%s5147_s5 + $0x50] sm:$0xff]  }
 0x1f5   :  { %v1090_v16 = vpop.permute.xlu1 %1089 }
 0x1f6   :  { %1092 = vst.msk [vmem:[#allocation3 + $0x30] sm:$0x80] %vm1026_vm1, %v1090_v16  ;;  %3661 = vmatpush3.bf16.msra.mxu1 %v3993_v14  ;;  %v4009_v14 = vld [vmem:[%s5147_s5 + $0x70] sm:$0xff]  }
 0x1f7   :  { %1093 = vst.msk [vmem:[#allocation3 + $0x50] sm:$0x3] %vm1028_vm2, %v1090_v16  ;;  %3662 = vmatprep.subr.bf16.mxu1 %v3994_v15  ;;  %v4010_v15 = vld [vmem:[%s5147_s5 + $0x48] sm:$0xff]  }
 0x1f8   :  { %v4011_v16 = vld [vmem:[%s5147_s5 + $0x68] sm:$0xff]  }
 0x1f9   :  { %v1135_v20 = vld [vmem:[#allocation3 + $0x38] sm:$0xff] }
 0x1fa   :  { %3663 = vmatpush3.bf16.msra.mxu1 %v3995_v17  ;;  %v1143_v21 = vpack.c.bf16 %v1135_v20, %v1131_v19  ;;  %v1139_v25 = vld [vmem:[#allocation3 + $0x58] sm:$0x3]  ;;  %v4012_v17 = vld [vmem:[%s5147_s5 + $0x40] sm:$0xff]  }
 0x1fb   :  { %3664 = vmatprep.subr.bf16.mxu1 %v3996_v18  ;;  %v1147_v27 = vpack.c.bf16 %v1139_v25, %v1139_v25  ;;  %v4013_v18 = vld [vmem:[%s5147_s5 + $0x60] sm:$0xff]   ;;  %v4016_v25 = vld [vmem:[%s5147_s5 + $0x90] sm:$0xff]  }
 0x1fc   :  { %1491 = vmatprep.mubr.bf16.mxu1 %v1143_v21  ;;  %v4014_v21 = vld [vmem:[%s5147_s5 + $0x98] sm:$0xff]  }
 0x1fd   :  { %v1134_v24 = vld [vmem:[#allocation3 + $0x30] sm:$0xff] }
 0x1fe   :  { %3665 = vmatpush3.bf16.msra.mxu1 %v3997_v22  ;;  %v1142_v26 = vpack.c.bf16 %v1134_v24, %v1130_v23  ;;  %v1138_v28 = vld [vmem:[#allocation3 + $0x50] sm:$0x3]  ;;  %v4015_v22 = vld [vmem:[%s5147_s5 + $0xb8] sm:$0xff]  }
 0x1ff   :  { %v1146_v29 = vpack.c.bf16 %v1138_v28, %v1138_v28  ;;  %3811 = vmatprep.subr.bf16.mxu1 %v4123_v31  ;;  %v4019_v28 = vld [vmem:[%s5147_s5 + $0xa8] sm:$0xff]  }
 0x201   :  { %1492 = vmatmul.mubr.bf16.vlgmr.msra.gmra.mxu1 %v1142_v26  ;;  %v4017_v26 = vld [vmem:[%s5147_s5 + $0xb0] sm:$0xff]  }
 0x202   :  { %1499 = vmatprep.mubr.bf16.mxu1 %v1147_v27  ;;  %3812 = vmatpush3.bf16.msra.mxu1 %v4001_v35  ;;  %v4018_v27 = vld [vmem:[%s5147_s5 + $0x88] sm:$0xff]   ;;  %v4022_v35 = vld [vmem:[%s5147_s5 + $0xd8] sm:$0xff]  }
 0x203   :  { %3813 = vmatprep.subr.bf16.mxu1 %v4123_v31 }
 0x206   :  { %3814 = vmatpush3.bf16.msra.mxu1 %v4002_v36  ;;  %v4023_v36 = vld [vmem:[%s5147_s5 + $0xf8] sm:$0xff]  }
 0x207   :  { %3815 = vmatprep.subr.bf16.mxu1 %v4123_v31 }
 0x209   :  { %1500 = vmatmul.mubr.bf16.gmra.mxu1 %v1146_v29  ;;  %v4020_v29 = vld [vmem:[%s5147_s5 + $0x80] sm:$0xff]  }
 0x20a   :  { %3819 = vmatprep.mubr.msk.bf16.mxu1 %vm4124_vm11, %v4123_v31  ;;  %3816 = vmatpush3.bf16.msra.mxu1 %v4003_v38 }
 0x20b   :  { %3817 = vmatprep.subr.bf16.mxu1 %v4123_v31 }
 0x20e   :  { %3818 = vmatpush3.bf16.msra.mxu1 %v4004_v39  ;;  %v4024_v39 = vld [vmem:[%s5147_s5 + $0xd0] sm:$0xff]  }
 0x20f   :  { %3835 = vmatprep.subr.bf16.mxu1 %v4123_v31 }
 0x2a1   :  { %v3638_v40 = vpop.f32.mrf.mxu1 }
 0x2a3   :  { %v3639_v41 = vpop.f32.mrf.mxu1 }
 0x2a4   :  { %v3640_v47 = vadd.f32 %v3639_v41, %v3638_v40  ;;  %v4025_v40 = vld [vmem:[%s5147_s5 + $0xf0] sm:$0xff]   ;;  %v4026_v41 = vld [vmem:[%s5147_s5 + $0xc8] sm:$0xff]  }
 0x2a5   :  { %v3641_v42 = vpop.f32.mrf.mxu1 }
 0x2a6   :  { %v1446_v51 = vadd.f32 %v3640_v47, %v3378_v48 }
 0x2a7   :  { %v3642_v43 = vpop.f32.mrf.mxu1 }
 0x2a8   :  { %v3643_v52 = vadd.f32 %v3642_v43, %v3641_v42  ;;  %v4027_v42 = vld [vmem:[%s5147_s5 + $0xe8] sm:$0xff]   ;;  %v4028_v43 = vld [vmem:[%s5147_s5 + $0xc0] sm:$0xff]  }
 0x2a9   :  { %v3644_v33 = vpop.f32.mrf.mxu1 }
 0x2aa   :  { %v1449_v57 = vadd.f32 %v3643_v52, %v3378_v48 }
 0x2ab   :  { %v3645_v44 = vpop.f32.mrf.mxu1 }
 0x2ac   :  { %v3646_v58 = vadd.f32 %v3645_v44, %v3644_v33  ;;  %v4029_v33 = vld [vmem:[%s5147_s5 + $0xe0] sm:$0xff]  }
 0x2ad   :  { %v3647_v45 = vpop.f32.mrf.mxu1 }
 0x2ae   :  { %v1454_v0 = vadd.f32 %v3646_v58, %v3378_v48 }
 0x2af   :  { %v3648_v46 = vpop.f32.mrf.mxu1 }
 0x2b0   :  { %v4030_v46 = vld [vmem:[%s5147_s5 + $0x118] sm:$0xff]  }
 0x2c1   :  { %v3666_v49 = vpop.f32.mrf.mxu1 }
 0x2c3   :  { %v3667_v50 = vpop.f32.mrf.mxu1 }
 0x2c4   :  { %v3668_v53 = vadd.f32 %v3667_v50, %v3666_v49  ;;  %v4031_v49 = vld [vmem:[%s5147_s5 + $0x110] sm:$0xff]   ;;  %v4032_v50 = vld [vmem:[%s5147_s5 + $0x108] sm:$0xff]  }
 0x2c5   :  { %v3669_v54 = vpop.f32.mrf.mxu1 }
 0x2c6   :  { %v1494_v55 = vadd.f32 %v3668_v53, %v1446_v51  ;;  %v4033_v51 = vld [vmem:[%s5147_s5 + $0x100] sm:$0xff]  }
 0x2c7   :  { %v3670_v56 = vpop.f32.mrf.mxu1 }
 0x2c8   :  { %v1507_v59 = vmax.f32 %v1494_v55, 0.0  ;;  %v3671_v60 = vadd.f32 %v3670_v56, %v3669_v54  ;;  %v2257_v54 = vld [vmem:[%s5149_s7 + $0xc0] sm:$0xff]  ;;  %v2258_v56 = vld [vmem:[%s5149_s7 + $0xc8] sm:$0xff] }
 0x2c9   :  { %v3672_v61 = vpop.f32.mrf.mxu1  ;;  %v2261_v55 = vld [vmem:[%s5149_s7 + $0xe0] sm:$0xff] }
 0x2ca   :  { %1511 = vst.msk [vmem:[#allocation4] sm:$0xff] %vm1510_vm14, %v1507_v59  ;;  %v1497_v62 = vadd.f32 %v3671_v60, %v1449_v57  ;;  %v3481_v57 = vcombine.low %v2257_v54, %v2261_v55  ;;  %v3482_v58 = vcombine.high %v2257_v54, %v2261_v55  ;;  %v2249_v59 = vld [vmem:[%s5149_s7 + $0x80] sm:$0xff] }
 0x2cb   :  { %v3673_v63 = vpop.f32.mrf.mxu1  ;;  %v2253_v60 = vld [vmem:[%s5149_s7 + $0xa0] sm:$0xff] }
 0x2cc   :  { %v1508_v1 = vmax.f32 %v1497_v62, 0.0  ;;  %v3674_v2 = vadd.f32 %v3673_v63, %v3672_v61  ;;  %v3474_v63 = vcombine.high %v2249_v59, %v2253_v60 }
 0x2cd   :  { %v3675_v3 = vpop.f32.mrf.mxu1 }
 0x2ce   :  { %1512 = vst.msk [vmem:[#allocation4 + $0x8] sm:$0xff] %vm1510_vm14, %v1508_v1  ;;  %v1502_v4 = vadd.f32 %v3674_v2, %v1454_v0  ;;  %v2250_v0 = vld [vmem:[%s5149_s7 + $0x88] sm:$0xff]  ;;  %v3473_v3 = vcombine.low %v2249_v59, %v2253_v60 }
 0x2cf   :  { %v3676_v5 = vpop.f32.mrf.mxu1  ;;  %v2254_v1 = vld [vmem:[%s5149_s7 + $0xa8] sm:$0xff] }
 0x2d0   :  { %v1509_v6 = vmax.f32 %v1502_v4, 0.0  ;;  %v3476_v2 = vcombine.high %v2250_v0, %v2254_v1  ;;  %v3475_v4 = vcombine.low %v2250_v0, %v2254_v1  ;;  %v2241_v5 = vld [vmem:[%s5149_s7 + $0x40] sm:$0xff] }
 0x2d2   :  { %1514 = vst.msk [vmem:[#allocation4 + $0x10] sm:$0x3] %vm1513_vm3, %v1509_v6  ;;  %v2245_v6 = vld [vmem:[%s5149_s7 + $0x60] sm:$0xff] }
 0x2d5   :  { %v1526_v9 = vld [vmem:[#allocation4 + $0x1] ss:$9 sm:$0x3]  ;;  %v1515_v10 = vld [vmem:[#allocation4] ss:$9 sm:$0x3] }
 0x2d6   :  { %v1535_v11 = vpack.c.bf16 %v1526_v9, %v1526_v9  ;;  %v1524_v12 = vpack.c.bf16 %v1515_v10, %v1515_v10  ;;  %v1671_v19 = vld [vmem:[#allocation4 + $0x2] ss:$9 sm:$0x3]  ;;  %v1750_v20 = vld [vmem:[#allocation4 + $0x3] ss:$9 sm:$0x3]  ;;  %v3466_v9 = vcombine.high %v2241_v5, %v2245_v6 }
 0x2d7   :  { %v1680_v23 = vpack.c.bf16 %v1671_v19, %v1671_v19  ;;  %v1759_v24 = vpack.c.bf16 %v1750_v20, %v1750_v20  ;;  %v1829_v32 = vld [vmem:[#allocation4 + $0x4] ss:$9 sm:$0x3]  ;;  %v1908_v34 = vld [vmem:[#allocation4 + $0x5] ss:$9 sm:$0x3] }
 0x2d8   :  { %3820 = vmatmul.mubr.msk.bf16.vlgmr.msra.gmra.mxu1 %vm1510_vm14, %v1535_v11  ;;  %3832 = vmatmul.mubr.msk.bf16.vlgmr.msra.gmra.mxu0 %vm1510_vm14, %v1524_v12  ;;  %v1838_v37 = vpack.c.bf16 %v1829_v32, %v1829_v32  ;;  %v1917_v38 = vpack.c.bf16 %v1908_v34, %v1908_v34  ;;  %v1987_v44 = vld [vmem:[#allocation4 + $0x6] ss:$9 sm:$0x3]  ;;  %v4845_v19 = vld [vmem:[%s5149_s7 + $0xd0] sm:$0xff] }
 0x2d9   :  { %3836 = vmatpush3.bf16.msra.mxu1 %v4006_v7  ;;  %3848 = vmatpush3.bf16.msra.mxu0 %v4007_v8  ;;  %v2066_v45 = vld [vmem:[#allocation4 + $0x7] ss:$9 sm:$0x3]  ;;  %v1996_v47 = vpack.c.bf16 %v1987_v44, %v1987_v44  ;;  %v2145_v52 = vld [vmem:[#allocation4 + $0x8] ss:$9 sm:$0x3]  ;;  %v3465_v8 = vcombine.low %v2241_v5, %v2245_v6 }
 0x2da   :  { %3837 = vmatprep.subr.bf16.mxu1 %v4123_v31  ;;  %3849 = vmatprep.subr.bf16.mxu0 %v4123_v31  ;;  %v2075_v48 = vpack.c.bf16 %v2066_v45, %v2066_v45  ;;  %v2154_v53 = vpack.c.bf16 %v2145_v52, %v2145_v52  ;;  %v2242_v7 = vld [vmem:[%s5149_s7 + $0x48] sm:$0xff]  ;;  %v2233_v11 = vld [vmem:[%s5149_s7] sm:$0xff] }
 0x2db   :  { %3843 = vmatprep.mubr.msk.bf16.mxu1 %vm4124_vm11, %v4123_v31  ;;  %3855 = vmatprep.mubr.msk.bf16.mxu0 %vm4124_vm11, %v4123_v31  ;;  %v2246_v10 = vld [vmem:[%s5149_s7 + $0x68] sm:$0xff]  ;;  %v2237_v12 = vld [vmem:[%s5149_s7 + $0x20] sm:$0xff] }
 0x2dc   :  { %v3456_v6 = vld [vmem:[%s5148_s6] ss:$0 sm:$0xff] }
 0x2dd   :  { %3838 = vmatpush3.bf16.msra.mxu1 %v4008_v13  ;;  %3850 = vmatpush3.bf16.msra.mxu0 %v4009_v14  ;;  %v4125_v13 = vmov 0   ;;  %v3467_v14 = vcombine.low %v2242_v7, %v2246_v10 }
 0x2de   :  { %3839 = vmatprep.subr.bf16.mxu1 %v4123_v31  ;;  %3851 = vmatprep.subr.bf16.mxu0 %v4123_v31 }
 0x2e1   :  { %3840 = vmatpush3.bf16.msra.mxu1 %v4010_v15  ;;  %3852 = vmatpush3.bf16.msra.mxu0 %v4011_v16  ;;  %v3468_v15 = vcombine.high %v2242_v7, %v2246_v10  ;;  %v3458_v16 = vcombine.high %v2233_v11, %v2237_v12  ;;  %v2251_v10 = vld [vmem:[%s5149_s7 + $0x90] sm:$0xff] }
 0x2e2   :  { %3841 = vmatprep.subr.bf16.mxu1 %v4123_v31  ;;  %3853 = vmatprep.subr.bf16.mxu0 %v4123_v31 }
 0x2e5   :  { %3842 = vmatpush3.bf16.msra.mxu1 %v4012_v17  ;;  %3854 = vmatpush3.bf16.msra.mxu0 %v4013_v18  ;;  %v2234_v17 = vld [vmem:[%s5149_s7 + $0x8] sm:$0xff] }
 0x2e6   :  { %3859 = vmatprep.subr.bf16.mxu1 %v4123_v31  ;;  %3871 = vmatprep.subr.bf16.mxu0 %v4123_v31  ;;  %v2238_v18 = vld [vmem:[%s5149_s7 + $0x28] sm:$0xff] }
 0x2e7   :  { %v3460_v20 = vcombine.high %v2234_v17, %v2238_v18 }
 0x2e8   :  { %3844 = vmatmul.mubr.msk.bf16.vlgmr.msra.gmra.mxu1 %vm1510_vm14, %v1680_v23  ;;  %3856 = vmatmul.mubr.msk.bf16.vlgmr.msra.gmra.mxu0 %vm1510_vm14, %v1759_v24  ;;  %v4860_v23 = vld [vmem:[%s5149_s7 + $0xf8] sm:$0xff]  ;;  %v3457_v24 = vcombine.low %v2233_v11, %v2237_v12  ;;  %v2255_v12 = vld [vmem:[%s5149_s7 + $0xb0] sm:$0xff] }
 0x2e9   :  { %3860 = vmatpush3.bf16.msra.mxu1 %v4014_v21  ;;  %3872 = vmatpush3.bf16.msra.mxu0 %v4015_v22  ;;  %v4850_v21 = vld [vmem:[%s5149_s7 + $0xf0] sm:$0xff]  ;;  %v4855_v22 = vld [vmem:[%s5149_s7 + $0xd8] sm:$0xff] }
 0x2ea   :  { %3861 = vmatprep.subr.bf16.mxu1 %v4123_v31  ;;  %3873 = vmatprep.subr.bf16.mxu0 %v4123_v31 }
 0x2eb   :  { %3867 = vmatprep.mubr.msk.bf16.mxu1 %vm4124_vm11, %v4123_v31  ;;  %3879 = vmatprep.mubr.msk.bf16.mxu0 %vm4124_vm11, %v4123_v31 }
 0x2ed   :  { %3862 = vmatpush3.bf16.msra.mxu1 %v4016_v25  ;;  %3874 = vmatpush3.bf16.msra.mxu0 %v4017_v26  ;;  %v3485_v25 = vcombine.low %v4845_v19, %v4850_v21  ;;  %v3487_v26 = vcombine.low %v4855_v22, %v4860_v23 }
 0x2ee   :  { %3863 = vmatprep.subr.bf16.mxu1 %v4123_v31  ;;  %3875 = vmatprep.subr.bf16.mxu0 %v4123_v31 }
 0x2f1   :  { %3864 = vmatpush3.bf16.msra.mxu1 %v4018_v27  ;;  %3876 = vmatpush3.bf16.msra.mxu0 %v4019_v28  ;;  %v3459_v27 = vcombine.low %v2234_v17, %v2238_v18  ;;  %v3486_v28 = vcombine.high %v4845_v19, %v4850_v21  ;;  %v2236_v19 = vld [vmem:[%s5149_s7 + $0x18] sm:$0xff] }
 0x2f2   :  { %3865 = vmatprep.subr.bf16.mxu1 %v4123_v31  ;;  %3877 = vmatprep.subr.bf16.mxu0 %v4123_v31  ;;  %v2240_v21 = vld [vmem:[%s5149_s7 + $0x38] sm:$0xff] }
 0x2f5   :  { %3866 = vmatpush3.bf16.msra.mxu1 %v4020_v29  ;;  %3878 = vmatpush3.bf16.msra.mxu0 %v4021_v30  ;;  %v3488_v29 = vcombine.high %v4855_v22, %v4860_v23 }
 0x2f6   :  { %3883 = vmatprep.subr.bf16.mxu1 %v4123_v31  ;;  %3895 = vmatprep.subr.bf16.mxu0 %v4123_v31 }
 0x2f8   :  { %3868 = vmatmul.mubr.msk.bf16.vlgmr.msra.gmra.mxu1 %vm1510_vm14, %v1838_v37  ;;  %3880 = vmatmul.mubr.msk.bf16.vlgmr.msra.gmra.mxu0 %vm1510_vm14, %v1917_v38 }
 0x2f9   :  { %3884 = vmatpush3.bf16.msra.mxu1 %v4022_v35  ;;  %3896 = vmatpush3.bf16.msra.mxu0 %v4023_v36 }
 0x2fa   :  { %3885 = vmatprep.subr.bf16.mxu1 %v4123_v31  ;;  %3897 = vmatprep.subr.bf16.mxu0 %v4123_v31 }
 0x2fb   :  { %3891 = vmatprep.mubr.msk.bf16.mxu1 %vm4124_vm11, %v4123_v31  ;;  %3903 = vmatprep.mubr.msk.bf16.mxu0 %vm4124_vm11, %v4123_v31 }
 0x2fd   :  { %3886 = vmatpush3.bf16.msra.mxu1 %v4024_v39  ;;  %3898 = vmatpush3.bf16.msra.mxu0 %v4025_v40 }
 0x2fe   :  { %3887 = vmatprep.subr.bf16.mxu1 %v4123_v31  ;;  %3899 = vmatprep.subr.bf16.mxu0 %v4123_v31 }
 0x301   :  { %3888 = vmatpush3.bf16.msra.mxu1 %v4026_v41  ;;  %3900 = vmatpush3.bf16.msra.mxu0 %v4027_v42 }
 0x302   :  { %3889 = vmatprep.subr.bf16.mxu1 %v4123_v31  ;;  %3901 = vmatprep.subr.bf16.mxu0 %v4123_v31 }
 0x305   :  { %3890 = vmatpush3.bf16.msra.mxu1 %v4028_v43  ;;  %3902 = vmatpush3.bf16.msra.mxu0 %v4029_v33 }
 0x306   :  { %3907 = vmatprep.subr.bf16.mxu1 %v4123_v31  ;;  %2478 = vmatprep.subr.bf16.mxu0 %v3482_v58 }
 0x308   :  { %3892 = vmatmul.mubr.msk.bf16.vlgmr.msra.gmra.mxu1 %vm1510_vm14, %v1996_v47  ;;  %3904 = vmatmul.mubr.msk.bf16.vlgmr.msra.gmra.mxu0 %vm1510_vm14, %v2075_v48 }
 0x309   :  { %3908 = vmatpush3.bf16.msra.mxu1 %v4030_v46  ;;  %3915 = vmatprep.mubr.msk.bf16.mxu1 %vm4124_vm11, %v4123_v31 }
 0x30a   :  { %3909 = vmatprep.subr.bf16.mxu1 %v4123_v31  ;;  %2479 = vmatpush1.bf16.msra.mxu0 %v3481_v57 }
 0x30b   :  { %2480 = vmatprep.subr.bf16.mxu0 %v3474_v63  ;;  %2502 = vmatprep.mubr.bf16.mxu0 %v4125_v13 }
 0x30d   :  { %3910 = vmatpush3.bf16.msra.mxu1 %v4031_v49 }
 0x30e   :  { %3911 = vmatprep.subr.bf16.mxu1 %v4123_v31  ;;  %2481 = vmatpush1.bf16.msra.mxu0 %v3473_v3 }
 0x30f   :  { %2482 = vmatprep.subr.bf16.mxu0 %v3466_v9 }
 0x311   :  { %3912 = vmatpush3.bf16.msra.mxu1 %v4032_v50 }
 0x312   :  { %3913 = vmatprep.subr.bf16.mxu1 %v4123_v31  ;;  %v2262_v31 = vld [vmem:[%s5149_s7 + $0xe8] sm:$0xff]  ;;  %2483 = vmatpush1.bf16.msra.mxu0 %v3465_v8 }
 0x313   :  { %v3483_v61 = vcombine.low %v2258_v56, %v2262_v31  ;;  %v3484_v62 = vcombine.high %v2258_v56, %v2262_v31  ;;  %2484 = vmatprep.subr.bf16.mxu0 %v3458_v16 }
 0x315   :  { %3914 = vmatpush3.bf16.msra.mxu1 %v4033_v51 }
 0x316   :  { %2519 = vmatprep.subr.bf16.mxu1 %v3484_v62  ;;  %2485 = vmatpush1.bf16.msra.mxu0 %v3457_v24 }
 0x317   :  { %2560 = vmatprep.subr.bf16.mxu0 %v3486_v28  ;;  %v2247_v28 = vld [vmem:[%s5149_s7 + $0x70] sm:$0xff] }
 0x318   :  { %3916 = vmatmul.mubr.msk.bf16.vlgmr.msra.gmra.mxu1 %vm1510_vm14, %v2154_v53 }
 0x319   :  { %2520 = vmatpush1.bf16.msra.mxu1 %v3483_v61  ;;  %2543 = vmatprep.mubr.bf16.mxu1 %v4125_v13 }
 0x31a   :  { %2521 = vmatprep.subr.bf16.mxu1 %v3476_v2 }
 0x31d   :  { %2522 = vmatpush1.bf16.msra.mxu1 %v3475_v4 }
 0x31e   :  { %2523 = vmatprep.subr.bf16.mxu1 %v3468_v15  ;;  %v2256_v15 = vld [vmem:[%s5149_s7 + $0xb8] sm:$0xff] }
 0x321   :  { %2524 = vmatpush1.bf16.msra.mxu1 %v3467_v14  ;;  %v2252_v14 = vld [vmem:[%s5149_s7 + $0x98] sm:$0xff] }
 0x322   :  { %2525 = vmatprep.subr.bf16.mxu1 %v3460_v20  ;;  %v3478_v20 = vcombine.high %v2251_v10, %v2255_v12  ;;  %v3480_v24 = vcombine.high %v2252_v14, %v2256_v15 }
 0x325   :  { %2526 = vmatpush1.bf16.msra.mxu1 %v3459_v27  ;;  %v2243_v27 = vld [vmem:[%s5149_s7 + $0x50] sm:$0xff] }
 0x326   :  { %2601 = vmatprep.subr.bf16.mxu1 %v3488_v29  ;;  %v2244_v29 = vld [vmem:[%s5149_s7 + $0x58] sm:$0xff]  ;;  %v3469_v22 = vcombine.low %v2243_v27, %v2247_v28 }
 0x398   :  { %v1597_v30 = vpop.f32.mrf.mxu1  ;;  %v1664_v32 = vpop.f32.mrf.mxu0 }
 0x399   :  { %v1665_v55 = vadd.f32 %v1664_v32, %v1597_v30  ;;  %v2248_v30 = vld [vmem:[%s5149_s7 + $0x78] sm:$0xff]  ;;  %v3477_v32 = vcombine.low %v2251_v10, %v2255_v12  ;;  %v5030_v12 = vld [vmem:[%s5150_s8] sm:$0xff] }
 0x39a   :  { %v3821_v34 = vpop.f32.mrf.mxu1  ;;  %v3833_v35 = vpop.f32.mrf.mxu0  ;;  %v3471_v23 = vcombine.low %v2244_v29, %v2248_v30 }
 0x39b   :  { %v3479_v34 = vcombine.low %v2252_v14, %v2256_v15  ;;  %v3470_v35 = vcombine.high %v2243_v27, %v2247_v28 }
 0x39c   :  { %v1600_v36 = vpop.f32.mrf.mxu1  ;;  %v1667_v37 = vpop.f32.mrf.mxu0 }
 0x39d   :  { %v3472_v36 = vcombine.high %v2244_v29, %v2248_v30  ;;  %v2235_v37 = vld [vmem:[%s5149_s7 + $0x10] sm:$0xff] }
 0x39e   :  { %v3822_v38 = vpop.f32.mrf.mxu1  ;;  %v3834_v39 = vpop.f32.mrf.mxu0 }
 0x39f   :  { %v2239_v38 = vld [vmem:[%s5149_s7 + $0x30] sm:$0xff] }
 0x3a0   :  { %v3461_v39 = vcombine.low %v2235_v37, %v2239_v38 }
 0x3a8   :  { %v1742_v40 = vpop.f32.mrf.mxu1  ;;  %v1821_v41 = vpop.f32.mrf.mxu0 }
 0x3a9   :  { %v1748_v56 = vadd.f32 %v1742_v40, %v1665_v55  ;;  %v3463_v40 = vcombine.low %v2236_v19, %v2240_v21  ;;  %v4050_v55 = vld [vmem:[%s5151_s9 + $0x58] sm:$0xff]  }
 0x3aa   :  { %v3845_v42 = vpop.f32.mrf.mxu1  ;;  %v3857_v43 = vpop.f32.mrf.mxu0 }
 0x3ab   :  { %v1827_v60 = vadd.f32 %v1821_v41, %v1748_v56  ;;  %v4034_v41 = vld [vmem:[%s5151_s9 + $0x78] sm:$0xff]  }
 0x3ac   :  { %v1745_v33 = vpop.f32.mrf.mxu1  ;;  %v1824_v44 = vpop.f32.mrf.mxu0  ;;  %v4036_v42 = vld [vmem:[%s5151_s9 + $0x38] sm:$0xff]  }
 0x3ad   :  { %v4037_v43 = vld [vmem:[%s5151_s9 + $0xb8] sm:$0xff]   ;;  %v4038_v33 = vld [vmem:[%s5151_s9 + $0x70] sm:$0xff]  }
 0x3ae   :  { %v3846_v45 = vpop.f32.mrf.mxu1  ;;  %v3858_v46 = vpop.f32.mrf.mxu0  ;;  %v4039_v44 = vld [vmem:[%s5151_s9 + $0xf0] sm:$0xff]   ;;  %v4051_v56 = vld [vmem:[%s5151_s9 + $0xd8] sm:$0xff]  }
 0x3af   :  { %v4040_v45 = vld [vmem:[%s5151_s9 + $0x30] sm:$0xff]  }
 0x3b0   :  { %v4041_v46 = vld [vmem:[%s5151_s9 + $0xb0] sm:$0xff]  }
 0x3b8   :  { %v1900_v47 = vpop.f32.mrf.mxu1  ;;  %v1979_v48 = vpop.f32.mrf.mxu0 }
 0x3b9   :  { %v1906_v63 = vadd.f32 %v1900_v47, %v1827_v60  ;;  %v4042_v47 = vld [vmem:[%s5151_s9 + $0x68] sm:$0xff]   ;;  %v4056_v60 = vld [vmem:[%s5151_s9 + $0x10] sm:$0xff]  }
 0x3ba   :  { %v3869_v49 = vpop.f32.mrf.mxu1  ;;  %v3881_v50 = vpop.f32.mrf.mxu0 }
 0x3bb   :  { %v1985_v2 = vadd.f32 %v1979_v48, %v1906_v63  ;;  %v4043_v48 = vld [vmem:[%s5151_s9 + $0xe8] sm:$0xff]  }
 0x3bc   :  { %v1903_v51 = vpop.f32.mrf.mxu1  ;;  %v1982_v52 = vpop.f32.mrf.mxu0  ;;  %v4044_v49 = vld [vmem:[%s5151_s9 + $0x28] sm:$0xff]  }
 0x3bd   :  { %v4045_v50 = vld [vmem:[%s5151_s9 + $0xa8] sm:$0xff]   ;;  %v4046_v51 = vld [vmem:[%s5151_s9 + $0x60] sm:$0xff]  }
 0x3be   :  { %v3870_v53 = vpop.f32.mrf.mxu1  ;;  %v3882_v54 = vpop.f32.mrf.mxu0  ;;  %v4047_v52 = vld [vmem:[%s5151_s9 + $0xe0] sm:$0xff]   ;;  %v4059_v63 = vld [vmem:[%s5151_s9 + $0xc8] sm:$0xff]  }
 0x3bf   :  { %v4048_v53 = vld [vmem:[%s5151_s9 + $0x20] sm:$0xff]  }
 0x3c0   :  { %v4049_v54 = vld [vmem:[%s5151_s9 + $0xa0] sm:$0xff]  }
 0x3c8   :  { %v2058_v57 = vpop.f32.mrf.mxu1  ;;  %v2137_v58 = vpop.f32.mrf.mxu0 }
 0x3c9   :  { %v2064_v3 = vadd.f32 %v2058_v57, %v1985_v2  ;;  %v4052_v57 = vld [vmem:[%s5151_s9 + $0x18] sm:$0xff]   ;;  %v4062_v2 = vld [vmem:[%s5151_s9 + $0x40] sm:$0xff]  }
 0x3ca   :  { %v3893_v31 = vpop.f32.mrf.mxu1  ;;  %v3905_v59 = vpop.f32.mrf.mxu0 }
 0x3cb   :  { %v2143_v4 = vadd.f32 %v2137_v58, %v2064_v3  ;;  %v4053_v58 = vld [vmem:[%s5151_s9 + $0x98] sm:$0xff]   ;;  %v4054_v31 = vld [vmem:[%s5151_s9 + $0x50] sm:$0xff]   ;;  %v4063_v3 = vld [vmem:[%s5151_s9 + $0xc0] sm:$0xff]  }
 0x3cc   :  { %v2061_v61 = vpop.f32.mrf.mxu1  ;;  %v2140_v62 = vpop.f32.mrf.mxu0  ;;  %v4055_v59 = vld [vmem:[%s5151_s9 + $0xd0] sm:$0xff]  }
 0x3cd   :  { %v4057_v61 = vld [vmem:[%s5151_s9 + $0x90] sm:$0xff]   ;;  %v4058_v62 = vld [vmem:[%s5151_s9 + $0x48] sm:$0xff]  }
 0x3ce   :  { %v3894_v0 = vpop.f32.mrf.mxu1  ;;  %v3906_v1 = vpop.f32.mrf.mxu0 }
 0x3cf   :  { %v4060_v0 = vld [vmem:[%s5151_s9 + $0x8] sm:$0xff]  }
 0x3d0   :  { %v4061_v1 = vld [vmem:[%s5151_s9 + $0x88] sm:$0xff]  }
 0x3d8   :  { %v2216_v5 = vpop.f32.mrf.mxu1 }
 0x3d9   :  { %v2222_v7 = vadd.f32 %v2216_v5, %v2143_v4  ;;  %v4064_v4 = vld [vmem:[%s5151_s9] sm:$0xff]  }
 0x3da   :  { %v3917_v8 = vpop.f32.mrf.mxu1  ;;  %v4065_v5 = vld [vmem:[%s5151_s9 + $0x80] sm:$0xff]  }
 0x3db   :  { %v2230_v9 = vadd.f32 %v3456_v6, %v2222_v7  ;;  %v4066_v6 = vld [vmem:[%s5151_s9 + $0x178] sm:$0xff]   ;;  %v2267_v8 = vlaneseq }
 0x3dc   :  { %v2219_v11 = vpop.f32.mrf.mxu1  ;;  %v4067_v7 = vld [vmem:[%s5151_s9 + $0x1f8] sm:$0xff]  }
 0x3dd   :  { %v2231_v16 = vmax.f32 %v2230_v9, 0.0  ;;  %v5023_v9 = vshrl.u32 %v2267_v8, 7 }
 0x3de   :  { %v3918_v17 = vpop.f32.mrf.mxu1 }
 0x3df   :  { %v2232_v18 = vpack.c.bf16 %v2231_v16, %v2231_v16  ;;  %v2269_v10 = vsub.s32 0, %v5023_v9  ;;  %v2277_v11 = vsub.s32 2, %v5023_v9  ;;  %v2273_v14 = vsub.s32 1, %v5023_v9 }
 0x3e0   :  { %v2281_v15 = vsub.s32 3, %v5023_v9 }
 0x3e1   :  { %3489 = vmatmul.mubr.msk.bf16.vlgmr.msra.gmra.mxu0 %vm1510_vm14, %v2232_v18  ;;  %3490 = vmatmul.mubr.msk.bf16.vlgmr.msra.gmra.mxu1 %vm1510_vm14, %v2232_v18  ;;  %v2270_v16 = vrot.slane %v5030_v12, %v2269_v10  ;;  %v2278_v17 = vrot.slane %v5030_v12, %v2277_v11  ;;  %v4084_v10 = vld [vmem:[%s5151_s9 + $0x118] sm:$0xff]  }
 0x3e2   :  { %2561 = vmatpush1.bf16.msra.mxu0 %v3485_v25  ;;  %2602 = vmatpush1.bf16.msra.mxu1 %v3487_v26  ;;  %v3462_v25 = vcombine.high %v2235_v37, %v2239_v38  ;;  %v3464_v26 = vcombine.high %v2236_v19, %v2240_v21  ;;  %v4085_v11 = vld [vmem:[%s5151_s9 + $0x198] sm:$0xff]  }
 0x3e3   :  { %2562 = vmatprep.subr.bf16.mxu0 %v3478_v20  ;;  %2603 = vmatprep.subr.bf16.mxu1 %v3480_v24  ;;  %v2282_v20 = vrot.slane %v5030_v12, %v2281_v15  ;;  %v2293_v15 = vsub.s32 6, %v5023_v9 }
 0x3e4   :  { %2584 = vmatprep.mubr.bf16.mxu0 %v4125_v13  ;;  %2625 = vmatprep.mubr.bf16.mxu1 %v4125_v13  ;;  %v4035_v13 = vld [vmem:[%s5151_s9 + $0xf8] sm:$0xff]  }
 0x3e6   :  { %2563 = vmatpush1.bf16.msra.mxu0 %v3477_v32  ;;  %2604 = vmatpush1.bf16.msra.mxu1 %v3479_v34 }
 0x3e7   :  { %2564 = vmatprep.subr.bf16.mxu0 %v3470_v35  ;;  %2605 = vmatprep.subr.bf16.mxu1 %v3472_v36 }
 0x3ea   :  { %2565 = vmatpush1.bf16.msra.mxu0 %v3469_v22  ;;  %2606 = vmatpush1.bf16.msra.mxu1 %v3471_v23 }
 0x3eb   :  { %2566 = vmatprep.subr.bf16.mxu0 %v3462_v25  ;;  %2607 = vmatprep.subr.bf16.mxu1 %v3464_v26 }
 0x3ee   :  { %2567 = vmatpush1.bf16.msra.mxu0 %v3461_v39  ;;  %2608 = vmatpush1.bf16.msra.mxu1 %v3463_v40  ;;  %v4068_v40 = vld [vmem:[%s5151_s9 + $0x138] sm:$0xff]  }
 0x3ef   :  { %3723 = vmatprep.subr.bf16.mxu0 %v4034_v41  ;;  %3745 = vmatprep.subr.bf16.mxu1 %v4035_v13  ;;  %v4069_v41 = vld [vmem:[%s5151_s9 + $0x1b8] sm:$0xff]  }
 0x3f1   :  { %3491 = vmatmul.mubr.msk.bf16.vlgmr.msra.gmra.mxu0 %vm1510_vm14, %v2232_v18  ;;  %3492 = vmatmul.mubr.msk.bf16.vlgmr.msra.gmra.mxu1 %vm1510_vm14, %v2232_v18  ;;  %v2274_v18 = vrot.slane %v5030_v12, %v2273_v14  ;;  %v2285_v14 = vsub.s32 4, %v5023_v9 }
 0x3f2   :  { %3724 = vmatpush3.bf16.msra.mxu0 %v4036_v42  ;;  %3746 = vmatpush3.bf16.msra.mxu1 %v4037_v43  ;;  %v4070_v43 = vld [vmem:[%s5151_s9 + $0x170] sm:$0xff]  }
 0x3f3   :  { %3725 = vmatprep.subr.bf16.mxu0 %v4038_v33  ;;  %3747 = vmatprep.subr.bf16.mxu1 %v4039_v44  ;;  %v4071_v33 = vld [vmem:[%s5151_s9 + $0x1f0] sm:$0xff]  }
 0x3f4   :  { %v4072_v44 = vld [vmem:[%s5151_s9 + $0x130] sm:$0xff]  }
 0x3f6   :  { %3726 = vmatpush3.bf16.msra.mxu0 %v4040_v45  ;;  %3748 = vmatpush3.bf16.msra.mxu1 %v4041_v46  ;;  %v4073_v45 = vld [vmem:[%s5151_s9 + $0x1b0] sm:$0xff]   ;;  %v2289_v46 = vsub.s32 5, %v5023_v9 }
 0x3f7   :  { %3727 = vmatprep.subr.bf16.mxu0 %v4042_v47  ;;  %3749 = vmatprep.subr.bf16.mxu1 %v4043_v48  ;;  %v2297_v47 = vsub.s32 7, %v5023_v9  ;;  %v4074_v48 = vld [vmem:[%s5151_s9 + $0x168] sm:$0xff]   ;;  %v4089_v9 = vld [vmem:[%s5151_s9 + $0x190] sm:$0xff]  }
 0x3fa   :  { %3728 = vmatpush3.bf16.msra.mxu0 %v4044_v49  ;;  %3750 = vmatpush3.bf16.msra.mxu1 %v4045_v50  ;;  %v4075_v49 = vld [vmem:[%s5151_s9 + $0x1e8] sm:$0xff]   ;;  %v2290_v50 = vrot.slane %v5030_v12, %v2289_v46 }
 0x3fb   :  { %3729 = vmatprep.subr.bf16.mxu0 %v4046_v51  ;;  %3751 = vmatprep.subr.bf16.mxu1 %v4047_v52  ;;  %v2298_v51 = vrot.slane %v5030_v12, %v2297_v47  ;;  %v4076_v52 = vld [vmem:[%s5151_s9 + $0x128] sm:$0xff]  }
 0x3fe   :  { %3730 = vmatpush3.bf16.msra.mxu0 %v4048_v53  ;;  %3752 = vmatpush3.bf16.msra.mxu1 %v4049_v54  ;;  %v4077_v53 = vld [vmem:[%s5151_s9 + $0x1a8] sm:$0xff]  }
 0x3ff   :  { %3731 = vmatprep.subr.bf16.mxu0 %v4050_v55  ;;  %3753 = vmatprep.subr.bf16.mxu1 %v4051_v56  ;;  %v4078_v56 = vld [vmem:[%s5151_s9 + $0x160] sm:$0xff]  }
 0x402   :  { %3732 = vmatpush3.bf16.msra.mxu0 %v4052_v57  ;;  %3754 = vmatpush3.bf16.msra.mxu1 %v4053_v58  ;;  %v4079_v57 = vld [vmem:[%s5151_s9 + $0x1e0] sm:$0xff]  }
 0x403   :  { %3733 = vmatprep.subr.bf16.mxu0 %v4054_v31  ;;  %3755 = vmatprep.subr.bf16.mxu1 %v4055_v59 }
 0x406   :  { %3734 = vmatpush3.bf16.msra.mxu0 %v4056_v60  ;;  %3756 = vmatpush3.bf16.msra.mxu1 %v4057_v61  ;;  %v4080_v61 = vld [vmem:[%s5151_s9 + $0x120] sm:$0xff]  }
 0x407   :  { %3735 = vmatprep.subr.bf16.mxu0 %v4058_v62  ;;  %3757 = vmatprep.subr.bf16.mxu1 %v4059_v63  ;;  %v4081_v62 = vld [vmem:[%s5151_s9 + $0x1a0] sm:$0xff]  }
 0x40a   :  { %3736 = vmatpush3.bf16.msra.mxu0 %v4060_v0  ;;  %3758 = vmatpush3.bf16.msra.mxu1 %v4061_v1  ;;  %v4082_v1 = vld [vmem:[%s5151_s9 + $0x158] sm:$0xff]  }
 0x40b   :  { %3737 = vmatprep.subr.bf16.mxu0 %v4062_v2  ;;  %3759 = vmatprep.subr.bf16.mxu1 %v4063_v3  ;;  %v4083_v2 = vld [vmem:[%s5151_s9 + $0x1d8] sm:$0xff]  }
 0x40e   :  { %3738 = vmatpush3.bf16.msra.mxu0 %v4064_v4  ;;  %3760 = vmatpush3.bf16.msra.mxu1 %v4065_v5 }
 0x40f   :  { %3767 = vmatprep.subr.bf16.mxu0 %v4066_v6  ;;  %3789 = vmatprep.subr.bf16.mxu1 %v4067_v7 }
 0x4a1   :  { %v2504_v24 = vpop.f32.mrf.mxu0  ;;  %v2545_v27 = vpop.f32.mrf.mxu1 }
 0x4a2   :  { %v2505_v28 = vadd.f32 %v2504_v24, %v2270_v16  ;;  %v2546_v29 = vadd.f32 %v2545_v27, %v2278_v17  ;;  %v4086_v16 = vld [vmem:[%s5151_s9 + $0x150] sm:$0xff]   ;;  %v2294_v24 = vrot.slane %v5030_v12, %v2293_v15  ;;  %v4090_v27 = vld [vmem:[%s5151_s9 + $0x148] sm:$0xff]  }
 0x4a3   :  { %v2506_v30 = vpop.f32.mrf.mxu0  ;;  %v2547_v32 = vpop.f32.mrf.mxu1  ;;  %v4087_v17 = vld [vmem:[%s5151_s9 + $0x1d0] sm:$0xff]  }
 0x4a4   :  { %v2507_v34 = vadd.f32 %v2506_v30, %v2274_v18  ;;  %v2548_v35 = vadd.f32 %v2547_v32, %v2282_v20  ;;  %v2634_v36 = vmax.f32 %v2505_v28, 0.0  ;;  %v2636_v37 = vmax.f32 %v2546_v29, 0.0  ;;  %v4088_v18 = vld [vmem:[%s5151_s9 + $0x110] sm:$0xff]   ;;  %v4091_v28 = vld [vmem:[%s5151_s9 + $0x1c8] sm:$0xff]  }
 0x4a5   :  { %v2508_v38 = vpop.f32.mrf.mxu0  ;;  %v2549_v19 = vpop.f32.mrf.mxu1  ;;  %v2286_v20 = vrot.slane %v5030_v12, %v2285_v14  ;;  %v4092_v29 = vld [vmem:[%s5151_s9 + $0x108] sm:$0xff]  }
 0x4a6   :  { %v2635_v21 = vmax.f32 %v2507_v34, 0.0  ;;  %v2637_v22 = vmax.f32 %v2548_v35, 0.0  ;;  %v2642_v13 = vpack.c.bf16 %v2634_v36, %v2634_v36  ;;  %v2644_v42 = vpack.c.bf16 %v2636_v37, %v2636_v37  ;;  %v4093_v12 = vld [vmem:[%s5151_s9 + $0x188] sm:$0xff]   ;;  %v4094_v34 = vld [vmem:[%s5151_s9 + $0x140] sm:$0xff]  }
 0x4a7   :  { %v2509_v23 = vpop.f32.mrf.mxu0  ;;  %v2550_v25 = vpop.f32.mrf.mxu1  ;;  %v4095_v35 = vld [vmem:[%s5151_s9 + $0x1c0] sm:$0xff]  }
 0x4a8   :  { %v2643_v26 = vpack.c.bf16 %v2635_v21, %v2635_v21  ;;  %v2645_v39 = vpack.c.bf16 %v2637_v22, %v2637_v22  ;;  %v4096_v36 = vld [vmem:[%s5151_s9 + $0x100] sm:$0xff]  }
 0x4a9   :  { %v4097_v37 = vld [vmem:[%s5151_s9 + $0x180] sm:$0xff]  }
 0x4aa   :  { %3201 = vmatprep.mubr.bf16.mxu0 %v2643_v26  ;;  %3241 = vmatprep.mubr.bf16.mxu1 %v2645_v39 }
 0x4ab   :  { %3202 = vmatmul.mubr.bf16.vlgmr.msra.gmra.mxu0 %v2642_v13  ;;  %3242 = vmatmul.mubr.bf16.vlgmr.msra.gmra.mxu1 %v2644_v42 }
 0x4ac   :  { %3768 = vmatpush3.bf16.msra.mxu0 %v4068_v40  ;;  %3790 = vmatpush3.bf16.msra.mxu1 %v4069_v41 }
 0x4ad   :  { %3769 = vmatprep.subr.bf16.mxu0 %v4070_v43  ;;  %3791 = vmatprep.subr.bf16.mxu1 %v4071_v33  ;;  %v3493_v33 = vld [vmem:[%s5152_s10] ss:$0 sm:$0xff]  ;;  %s4098_s10 = scalar_lea.vmem %s3338_s16, 32 }
 0x4ae   :  { %p4099_p0 = scmp.ne.s32.totalorder %s3338_s16, %s4098_s10  ;;  %p4104_p2 = scmp.lt.s32.totalorder %s4098_s10, %s4098_s10 }
 0x4b0   :  { %3770 = vmatpush3.bf16.msra.mxu0 %v4072_v44  ;;  %3792 = vmatpush3.bf16.msra.mxu1 %v4073_v45  ;;  %p4105_p3 = por %p4104_p2, %p4103_p1 }
 0x4b1   :  { %v2586_v54 = vpop.f32.mrf.mxu0  ;;  %v2627_v55 = vpop.f32.mrf.mxu1  ;;  %3771 = vmatprep.subr.bf16.mxu0 %v4074_v48  ;;  %3793 = vmatprep.subr.bf16.mxu1 %v4075_v49 }
 0x4b2   :  { %v2587_v30 = vadd.f32 %v2586_v54, %v2286_v20  ;;  %v2628_v32 = vadd.f32 %v2627_v55, %v2294_v24  ;;  %p4106_p4 = pnand %p4105_p3, %p4099_p0 }
 0x4b3   :  { %v2588_v58 = vpop.f32.mrf.mxu0  ;;  %v2629_v31 = vpop.f32.mrf.mxu1 }
 0x4b4   :  { %v2589_v59 = vadd.f32 %v2588_v58, %v2290_v50  ;;  %v2630_v60 = vadd.f32 %v2629_v31, %v2298_v51  ;;  %3772 = vmatpush3.bf16.msra.mxu0 %v4076_v52  ;;  %3794 = vmatpush3.bf16.msra.mxu1 %v4077_v53  ;;  %v2638_v38 = vmax.f32 %v2587_v30, 0.0  ;;  %v2640_v19 = vmax.f32 %v2628_v32, 0.0 }
 0x4b5   :  { %v2590_v63 = vpop.f32.mrf.mxu0  ;;  %v2631_v0 = vpop.f32.mrf.mxu1  ;;  %3773 = vmatprep.subr.bf16.mxu0 %v4078_v56  ;;  %3795 = vmatprep.subr.bf16.mxu1 %v4079_v57 }
 0x4b6   :  { %v2639_v3 = vmax.f32 %v2589_v59, 0.0  ;;  %v2641_v4 = vmax.f32 %v2630_v60, 0.0  ;;  %v2646_v21 = vpack.c.bf16 %v2638_v38, %v2638_v38  ;;  %v2648_v22 = vpack.c.bf16 %v2640_v19, %v2640_v19 }
 0x4b7   :  { %v2591_v5 = vpop.f32.mrf.mxu0  ;;  %v2632_v6 = vpop.f32.mrf.mxu1 }
 0x4b8   :  { %v2647_v7 = vpack.c.bf16 %v2639_v3, %v2639_v3  ;;  %v2649_v8 = vpack.c.bf16 %v2641_v4, %v2641_v4  ;;  %3774 = vmatpush3.bf16.msra.mxu0 %v4080_v61  ;;  %3796 = vmatpush3.bf16.msra.mxu1 %v4081_v62 }
 0x4b9   :  { %3775 = vmatprep.subr.bf16.mxu0 %v4082_v1  ;;  %3797 = vmatprep.subr.bf16.mxu1 %v4083_v2 }
 0x4ba   :  { %3281 = vmatprep.mubr.bf16.mxu0 %v2647_v7  ;;  %3321 = vmatprep.mubr.bf16.mxu1 %v2649_v8 }
 0x4bc   :  { %3776 = vmatpush3.bf16.msra.mxu0 %v4084_v10  ;;  %3798 = vmatpush3.bf16.msra.mxu1 %v4085_v11 }
 0x4bd   :  { %3777 = vmatprep.subr.bf16.mxu0 %v4086_v16  ;;  %3799 = vmatprep.subr.bf16.mxu1 %v4087_v17 }
 0x4c0   :  { %3778 = vmatpush3.bf16.msra.mxu0 %v4088_v18  ;;  %3800 = vmatpush3.bf16.msra.mxu1 %v4089_v9 }
 0x4c1   :  { %3779 = vmatprep.subr.bf16.mxu0 %v4090_v27  ;;  %3801 = vmatprep.subr.bf16.mxu1 %v4091_v28 }
 0x4c4   :  { %3780 = vmatpush3.bf16.msra.mxu0 %v4092_v29  ;;  %3802 = vmatpush3.bf16.msra.mxu1 %v4093_v12 }
 0x4c5   :  { %3781 = vmatprep.subr.bf16.mxu0 %v4094_v34  ;;  %3803 = vmatprep.subr.bf16.mxu1 %v4095_v35 }
 0x4c8   :  { %3782 = vmatpush3.bf16.msra.mxu0 %v4096_v36  ;;  %3804 = vmatpush3.bf16.msra.mxu1 %v4097_v37 }
 0x4cb   :  { %3282 = vmatmul.mubr.bf16.vlgmr.msra.gmra.mxu0 %v2646_v21  ;;  %3322 = vmatmul.mubr.bf16.vlgmr.msra.gmra.mxu1 %v2648_v22 }
 0x56b   :  { %v3739_v23 = vpop.f32.mrf.mxu0  ;;  %v3761_v25 = vpop.f32.mrf.mxu1 }
 0x56d   :  { %v3740_v26 = vpop.f32.mrf.mxu0  ;;  %v3762_v39 = vpop.f32.mrf.mxu1 }
 0x56e   :  { %v3741_v43 = vadd.f32 %v3740_v26, %v3739_v23  ;;  %v3763_v47 = vadd.f32 %v3762_v39, %v3761_v25 }
 0x56f   :  { %v3742_v40 = vpop.f32.mrf.mxu0  ;;  %v3764_v41 = vpop.f32.mrf.mxu1 }
 0x570   :  { %v3204_v44 = vadd.f32 %v3741_v43, %v3493_v33 }
 0x571   :  { %v3743_v13 = vpop.f32.mrf.mxu0  ;;  %v3765_v42 = vpop.f32.mrf.mxu1 }
 0x572   :  { %v3244_v50 = vadd.f32 %v3763_v47, %v3204_v44 }
 0x58b   :  { %v3783_v45 = vpop.f32.mrf.mxu0  ;;  %v3805_v46 = vpop.f32.mrf.mxu1 }
 0x58d   :  { %v3784_v48 = vpop.f32.mrf.mxu0  ;;  %v3806_v49 = vpop.f32.mrf.mxu1 }
 0x58e   :  { %v3785_v51 = vadd.f32 %v3784_v48, %v3783_v45  ;;  %v3807_v55 = vadd.f32 %v3806_v49, %v3805_v46 }
 0x58f   :  { %v3786_v52 = vpop.f32.mrf.mxu0  ;;  %v3808_v53 = vpop.f32.mrf.mxu1 }
 0x590   :  { %v3284_v54 = vadd.f32 %v3785_v51, %v3244_v50 }
 0x591   :  { %v3787_v56 = vpop.f32.mrf.mxu0  ;;  %v3809_v57 = vpop.f32.mrf.mxu1 }
 0x592   :  { %v3324_v58 = vadd.f32 %v3807_v55, %v3284_v54 }
 0x594   :  { %3330 = vst.msk [vmem:[#allocation5] sm:$0x3] %vm3329_vm4, %v3324_v58 }
 0x595   :  { %4109 = shalt.err (!%p4106_p4)
}
 0x596   :  { %3340 = dma.vmem_to_hbm [thread:$0]  %s3338_s16, 32, %s5153_s11, [#allocation6]  }
 0x597   :  { %4118 = dma.done.wait [#allocation6], 32  }
 0x598   :  { %4119 = vsyncadd [#allocation6], 4294967264 }
 0x599   :  { %3344 = vsyncpa [#allocation6], 1 }

</bundles_post_ra>
